<compile_context>
chip_gen: v7x
topology: tpu7x:2x2x1
jax: 0.10.0
libtpu: 0.0.40
codegen_flags: <defaults>
</compile_context>

<pallas_src>
import numpy as np

import jax
import jax.numpy as jnp
from jax.experimental import pallas as pl
from jax.experimental.pallas import tpu as pltpu


# ---------------------------------------------------------------------------
# In-kernel building blocks (traced inside the single fused Pallas kernel).
# ---------------------------------------------------------------------------
def _conv3x3(sources, bias_ref, hin, hout, stride, apply_act):
    """3x3 conv (pad=1) on [H, W*Cin] slabs via a single banded-GEMM per source.

    sources: list of (reader, B_ref); reader(di) -> [hin, Win*Cin] bf16 (rows di..di+hin-1
             of the H-padded buffer), B_ref -> [3*Win*Cin, Wout*Cout] bf16 banded matrix
             (kh taps stacked along the reduction dim).
    The W stride / W padding live inside B; an H stride of 2 is applied with a tiny
    0/1 selection matmul (exact).
    """
    acc = None
    for reader, b_ref in sources:
        x_cat = jnp.concatenate([reader(0), reader(1), reader(2)], axis=1)
        p = jnp.dot(x_cat, b_ref[...], preferred_element_type=jnp.float32)
        acc = p if acc is None else acc + p
    if stride == 2:
        r = jax.lax.broadcasted_iota(jnp.int32, (hout, hin), 0)
        c = jax.lax.broadcasted_iota(jnp.int32, (hout, hin), 1)
        sel = (c == 2 * r).astype(jnp.float32)
        acc = jnp.dot(sel, acc, preferred_element_type=jnp.float32)
    acc = acc + bias_ref[...]
    if apply_act:                                   # conv -> (norm=None) -> LeakyReLU(0.01)
        acc = jnp.where(acc >= 0, acc, 0.01 * acc)
    return acc


def _transp2x2(x, t_ref, bias_ref, hin):
    """ConvTranspose2d(k=2, s=2) on a [hin, Win*Cin] slab.

    t_ref[a] ([Win*Cin, Wout*Cout]) produces the output rows of parity a; the two row sets
    are interleaved with exact 0/1 selection matmuls (no XLA transpose)."""
    hout = 2 * hin
    xb = x.astype(jnp.bfloat16)
    r0 = jnp.dot(xb, t_ref[0], preferred_element_type=jnp.float32)
    r1 = jnp.dot(xb, t_ref[1], preferred_element_type=jnp.float32)
    rr = jax.lax.broadcasted_iota(jnp.int32, (hout, hin), 0)
    cc = jax.lax.broadcasted_iota(jnp.int32, (hout, hin), 1)
    e0 = (rr == 2 * cc).astype(jnp.float32)
    e1 = (rr == 2 * cc + 1).astype(jnp.float32)
    out = (jnp.dot(e0, r0, preferred_element_type=jnp.float32)
           + jnp.dot(e1, r1, preferred_element_type=jnp.float32))
    return out + bias_ref[...]


# ---------------------------------------------------------------------------
# The single fused UNet kernel: one grid step == full forward for one image.
# ---------------------------------------------------------------------------
def _unet_kernel(x_ref,
                 e00_B, e00_b, e01_B, e01_b,
                 e10_B, e10_b, e11_B, e11_b,
                 e20_B, e20_b, e21_B, e21_b,
                 d0t_T, d0t_b, d00_Bu, d00_Bs, d00_b, d01_B, d01_b,
                 d1t_T, d1t_b, d10_Bu, d10_Bs, d10_b, d11_B, d11_b,
                 seg_B, seg_b,
                 o_ref,
                 s0_a, s0_skip, s0_up, s1_a, s1_skip, s1_up, s2_a):
    # Only the H-halo rows must be zero; interiors are fully rewritten before reads.
    for ref in (s0_a, s0_skip, s0_up, s1_a, s1_skip, s1_up, s2_a):
        hp, lw = ref.shape
        zrow = jnp.zeros((1, lw), ref.dtype)
        ref[0:1, :] = zrow
        ref[hp - 1:hp, :] = zrow

    def rd(ref, hin):
        return lambda di: ref[di:di + hin, :].astype(jnp.bfloat16)

    # ------------------------- encoder (return_skips) -------------------------
    y = _conv3x3([(rd(x_ref, 16), e00_B)], e00_b, 16, 16, 1, True)      # 4 -> 8 ch, 16x16
    s0_a[1:17, :] = y
    y = _conv3x3([(rd(s0_a, 16), e01_B)], e01_b, 16, 16, 1, True)       # skip0: 8 ch, 16x16
    s0_skip[1:17, :] = y

    y = _conv3x3([(rd(s0_skip, 16), e10_B)], e10_b, 16, 8, 2, True)     # 8 -> 16 ch, stride 2
    s1_a[1:9, :] = y
    y = _conv3x3([(rd(s1_a, 8), e11_B)], e11_b, 8, 8, 1, True)          # skip1: 16 ch, 8x8
    s1_skip[1:9, :] = y

    y = _conv3x3([(rd(s1_skip, 8), e20_B)], e20_b, 8, 4, 2, True)       # 16 -> 32 ch, stride 2
    s2_a[1:5, :] = y
    bott = _conv3x3([(rd(s2_a, 4), e21_B)], e21_b, 4, 4, 1, True)       # bottleneck 32 ch, 4x4

    # ----------------------- decoder stage 0: 4x4 -> 8x8 ----------------------
    up = _transp2x2(bott, d0t_T, d0t_b, 4)                              # 32 -> 16 ch
    s1_up[1:9, :] = up
    # torch.cat((up, skip1)) is folded in by splitting the conv weights (linear in Cin).
    y = _conv3x3([(rd(s1_up, 8), d00_Bu), (rd(s1_skip, 8), d00_Bs)],
                 d00_b, 8, 8, 1, True)
    s1_a[1:9, :] = y
    lres = _conv3x3([(rd(s1_a, 8), d01_B)], d01_b, 8, 8, 1, True)       # 16 ch, 8x8

    # ---------------------- decoder stage 1: 8x8 -> 16x16 ---------------------
    up = _transp2x2(lres, d1t_T, d1t_b, 8)                              # 16 -> 8 ch
    s0_up[1:17, :] = up
    y = _conv3x3([(rd(s0_up, 16), d10_Bu), (rd(s0_skip, 16), d10_Bs)],
                 d10_b, 16, 16, 1, True)
    s0_a[1:17, :] = y
    y = _conv3x3([(rd(s0_a, 16), d11_B)], d11_b, 16, 16, 1, True)       # 8 ch, 16x16

    # ------------- 1x1 seg head (Cout padded 3 -> 8 for lane-dense store) -----
    seg = jnp.dot(y.astype(jnp.bfloat16), seg_B[...],
                  preferred_element_type=jnp.float32) + seg_b[...]
    o_ref[...] = seg


# ---------------------------------------------------------------------------
# Host-side weight packing: fold kw taps / W-padding / W-stride / channel splits
# into banded matrices (one-time, tiny).  kh taps are stacked along the GEMM K dim.
# ---------------------------------------------------------------------------
def _band_conv_np(w, w_in, stride=1, pad=1, cout_pad=None):
    kh, kw, cin, cout = w.shape
    cout_p = cout if cout_pad is None else cout_pad
    w_out = (w_in + 2 * pad - kw) // stride + 1
    B = np.zeros((kh, w_in * cin, w_out * cout_p), np.float32)
    for di in range(kh):
        for dj in range(kw):
            for wo in range(w_out):
                wi = stride * wo + dj - pad
                if 0 <= wi < w_in:
                    B[di, wi * cin:(wi + 1) * cin, wo * cout_p:wo * cout_p + cout] = w[di, dj]
    return B


def _band_conv_flat(w, w_in, stride=1, pad=1, cout_pad=None):
    B = _band_conv_np(w, w_in, stride, pad, cout_pad)
    # [kh, Win*Cin, Wout*Cout] -> [kh*Win*Cin, Wout*Cout]; kh is the slow (outer) index,
    # matching the lane-concat order of the three H-shifted reads in the kernel.
    return B.reshape(-1, B.shape[-1])


def _band_transp_np(w, w_in):
    cin, s, _, cout = w.shape
    w_out = w_in * s
    T = np.zeros((s, w_in * cin, w_out * cout), np.float32)
    for a in range(s):
        for b in range(s):
            for wi in range(w_in):
                wo = s * wi + b
                T[a, wi * cin:(wi + 1) * cin, wo * cout:(wo + 1) * cout] = w[:, a, b, :]
    return T


def _tile_bias_np(b, w_out, cout_pad=None):
    cout = b.shape[0]
    cout_p = cout if cout_pad is None else cout_pad
    bp = np.zeros(cout_p, np.float32)
    bp[:cout] = b
    return np.tile(bp, w_out)[None, :]


def pack_params(params):
    bf = lambda a: jnp.asarray(a, jnp.bfloat16)
    f32 = lambda a: jnp.asarray(a, jnp.float32)
    g = lambda t: (np.asarray(t[0], np.float32), np.asarray(t[1], np.float32))
    enc, dec, seg = params["enc"], params["dec"], params["seg"]

    ws = []
    lvl_w = (16, 16, 8)          # input spatial width of each encoder stage
    strides = (1, 2, 2)
    for s_idx in range(3):
        w0, b0 = g(enc[s_idx][0]); w1, b1 = g(enc[s_idx][1])
        win, st = lvl_w[s_idx], strides[s_idx]
        wout = win // st
        ws += [bf(_band_conv_flat(w0, win, st)),  f32(_tile_bias_np(b0, wout)),
               bf(_band_conv_flat(w1, wout, 1)),  f32(_tile_bias_np(b1, wout))]

    # decoder stage 0: transpconv 32->16 (4x4 -> 8x8), convs on (up 16 | skip1 16) -> 16
    tw, tb = g(dec[0]["transp"]); c0w, c0b = g(dec[0]["convs"][0]); c1w, c1b = g(dec[0]["convs"][1])
    ws += [bf(_band_transp_np(tw, 4)),              f32(_tile_bias_np(tb, 8)),
           bf(_band_conv_flat(c0w[:, :, :16, :], 8, 1)),
           bf(_band_conv_flat(c0w[:, :, 16:, :], 8, 1)),
           f32(_tile_bias_np(c0b, 8)),
           bf(_band_conv_flat(c1w, 8, 1)),          f32(_tile_bias_np(c1b, 8))]

    # decoder stage 1: transpconv 16->8 (8x8 -> 16x16), convs on (up 8 | skip0 8) -> 8
    tw, tb = g(dec[1]["transp"]); c0w, c0b = g(dec[1]["convs"][0]); c1w, c1b = g(dec[1]["convs"][1])
    ws += [bf(_band_transp_np(tw, 8)),              f32(_tile_bias_np(tb, 16)),
           bf(_band_conv_flat(c0w[:, :, :8, :], 16, 1)),
           bf(_band_conv_flat(c0w[:, :, 8:, :], 16, 1)),
           f32(_tile_bias_np(c0b, 16)),
           bf(_band_conv_flat(c1w, 16, 1)),         f32(_tile_bias_np(c1b, 16))]

    # 1x1 seg head, output channels padded 3 -> 8
    sw, sb = g(seg)
    ws += [bf(_band_conv_flat(sw, 16, 1, pad=0, cout_pad=8)),
           f32(_tile_bias_np(sb, 16, cout_pad=8))]
    return ws


# ---------------------------------------------------------------------------
# Wrapper: one fused pallas_call over grid=(batch,).
# ---------------------------------------------------------------------------
def unet_forward(ws, x_nchw):
    n, c, h, w = x_nchw.shape
    assert (c, h, w) == (4, 16, 16)
    x = jnp.transpose(x_nchw, (0, 2, 3, 1)).astype(jnp.float32)   # NHWC
    x = x.reshape(n, h, w * c)                                    # [N, H, W*C] lane-interleaved
    x = jnp.pad(x, ((0, 0), (1, 1), (0, 0)))                      # H halo only (W pad is in B)

    def wspec(a):
        nd = a.ndim
        return pl.BlockSpec(a.shape, lambda i, _nd=nd: (0,) * _nd)   # resident full block

    out = pl.pallas_call(
        _unet_kernel,
        out_shape=jax.ShapeDtypeStruct((n, h, w * 8), jnp.float32),
        grid=(n,),
        in_specs=[pl.BlockSpec((None, h + 2, w * c), lambda i: (i, 0, 0))]
                 + [wspec(a) for a in ws],
        out_specs=pl.BlockSpec((None, h, w * 8), lambda i: (i, 0, 0)),
        scratch_shapes=[
            pltpu.VMEM((h + 2, 128), jnp.float32),        # s0_a   (16x16 level work buf)
            pltpu.VMEM((h + 2, 128), jnp.float32),        # s0_skip
            pltpu.VMEM((h + 2, 128), jnp.float32),        # s0_up
            pltpu.VMEM((h // 2 + 2, 128), jnp.float32),   # s1_a   (8x8 level)
            pltpu.VMEM((h // 2 + 2, 128), jnp.float32),   # s1_skip
            pltpu.VMEM((h // 2 + 2, 128), jnp.float32),   # s1_up
            pltpu.VMEM((h // 4 + 2, 128), jnp.float32),   # s2_a   (4x4 level)
        ],
        compiler_params=pltpu.CompilerParams(
            dimension_semantics=("parallel",),            # shard batch across TCs on v7x
            vmem_limit_bytes=32 * 1024 * 1024,            # explicit budget (v7x-safe)
        ),
        cost_estimate=pl.CostEstimate(
            flops=30_000_000, transcendentals=0, bytes_accessed=1_500_000),
    )(x, *ws)

    seg = out.reshape(n, h, w, 8)[..., :3]                # drop padded output channels
    return jnp.transpose(seg, (0, 3, 1, 2))               # NCHW like PyTorch


# ---------------------------------------------------------------------------
# Deterministic He-style init (same layouts as the previous, reviewed version).
# ---------------------------------------------------------------------------
def init_params(key):
    def conv_p(k, cin, cout, ks=3):
        kw_, kb_ = jax.random.split(k)
        fan_in = cin * ks * ks
        w = jax.random.normal(kw_, (ks, ks, cin, cout), jnp.float32) * jnp.sqrt(2.0 / fan_in)
        b = jax.random.normal(kb_, (cout,), jnp.float32) * 0.01
        return (w, b)

    def transp_p(k, cin, cout, s=2):
        kw_, kb_ = jax.random.split(k)
        w = jax.random.normal(kw_, (cin, s, s, cout), jnp.float32) * jnp.sqrt(2.0 / cin)
        b = jax.random.normal(kb_, (cout,), jnp.float32) * 0.01
        return (w, b)

    keys = iter(jax.random.split(key, 16))
    enc = [
        [conv_p(next(keys), 4, 8),   conv_p(next(keys), 8, 8)],
        [conv_p(next(keys), 8, 16),  conv_p(next(keys), 16, 16)],
        [conv_p(next(keys), 16, 32), conv_p(next(keys), 32, 32)],
    ]
    dec = [
        dict(transp=transp_p(next(keys), 32, 16),
             convs=[conv_p(next(keys), 32, 16), conv_p(next(keys), 16, 16)]),
        dict(transp=transp_p(next(keys), 16, 8),
             convs=[conv_p(next(keys), 16, 8), conv_p(next(keys), 8, 8)]),
    ]
    seg = conv_p(next(keys), 8, 3, ks=1)
    return dict(enc=enc, dec=dec, seg=seg)


# ---------------------------------------------------------------------------
# Pure-JAX f32 reference (im2col formulation, previously reviewed as correct).
# ---------------------------------------------------------------------------
def _ref_conv2d(x, w, b, stride, act):
    kh, kw, cin, cout = w.shape
    ph, pw = (kh - 1) // 2, (kw - 1) // 2
    xp = jnp.pad(x, ((0, 0), (ph, ph), (pw, pw), (0, 0)))
    n, hp, wp, _ = xp.shape
    ho = (hp - kh) // stride + 1
    wo = (wp - kw) // stride + 1
    cols = []
    for i in range(kh):
        for j in range(kw):
            cols.append(xp[:, i:i + (ho - 1) * stride + 1:stride,
                            j:j + (wo - 1) * stride + 1:stride, :])
    patches = jnp.concatenate(cols, axis=-1)
    y = patches.reshape(n * ho * wo, kh * kw * cin) @ w.reshape(kh * kw * cin, cout) + b
    y = y.reshape(n, ho, wo, cout)
    return jnp.where(y >= 0, y, 0.01 * y) if act else y


def _ref_transp(x, w, b):
    n, h, wd, cin = x.shape
    s = w.shape[1]
    cout = w.shape[-1]
    y = x.reshape(n * h * wd, cin) @ w.reshape(cin, s * s * cout) + jnp.tile(b, s * s)
    y = y.reshape(n, h, wd, s, s, cout).transpose(0, 1, 3, 2, 4, 5)
    return y.reshape(n, h * s, wd * s, cout)


def reference_forward(params, x_nchw):
    h = jnp.transpose(x_nchw, (0, 2, 3, 1)).astype(jnp.float32)
    skips = []
    for stage, strides in zip(params["enc"], ((1, 1), (2, 1), (2, 1))):
        for (w, b), st in zip(stage, strides):
            h = _ref_conv2d(h, w, b, st, True)
        skips.append(h)
    lres = skips[-1]
    for s_idx, d in enumerate(params["dec"]):
        tw, tb = d["transp"]
        up = _ref_transp(lres, tw, tb)
        h = jnp.concatenate([up, skips[-(s_idx + 2)]], axis=-1)
        for (w, b) in d["convs"]:
            h = _ref_conv2d(h, w, b, 1, True)
        lres = h
    sw, sb = params["seg"]
    seg = _ref_conv2d(lres, sw, sb, 1, False)
    return jnp.transpose(seg, (0, 3, 1, 2))


if __name__ == "__main__":
    key = jax.random.PRNGKey(0)
    pkey, xkey = jax.random.split(key)
    params = init_params(pkey)
    ws = pack_params(params)
    x = jax.random.normal(xkey, (2, 4, 16, 16), jnp.float32)      # NCHW, like PyTorch

    out = jax.jit(unet_forward)(ws, x)
    out = jax.block_until_ready(out)
    assert out.shape == (2, 3, 16, 16), out.shape
    assert out.dtype == jnp.float32

    ref = jax.block_until_ready(jax.jit(reference_forward)(params, x))
    np.testing.assert_allclose(np.asarray(out), np.asarray(ref), rtol=0.05, atol=0.25)
    print("KERNEL_OK")
</pallas_src>

<mosaic_0001>
module attributes {stable_mosaic.version = 11 : i64} {
  func.func @_unet_kernel(%arg0: i32, %arg1: memref<1x18x64xf32, #tpu.memory_space<vmem>>, %arg2: memref<192x128xbf16, #tpu.memory_space<vmem>>, %arg3: memref<1x128xf32, #tpu.memory_space<vmem>>, %arg4: memref<384x128xbf16, #tpu.memory_space<vmem>>, %arg5: memref<1x128xf32, #tpu.memory_space<vmem>>, %arg6: memref<384x128xbf16, #tpu.memory_space<vmem>>, %arg7: memref<1x128xf32, #tpu.memory_space<vmem>>, %arg8: memref<384x128xbf16, #tpu.memory_space<vmem>>, %arg9: memref<1x128xf32, #tpu.memory_space<vmem>>, %arg10: memref<384x128xbf16, #tpu.memory_space<vmem>>, %arg11: memref<1x128xf32, #tpu.memory_space<vmem>>, %arg12: memref<384x128xbf16, #tpu.memory_space<vmem>>, %arg13: memref<1x128xf32, #tpu.memory_space<vmem>>, %arg14: memref<2x128x128xbf16, #tpu.memory_space<vmem>>, %arg15: memref<1x128xf32, #tpu.memory_space<vmem>>, %arg16: memref<384x128xbf16, #tpu.memory_space<vmem>>, %arg17: memref<384x128xbf16, #tpu.memory_space<vmem>>, %arg18: memref<1x128xf32, #tpu.memory_space<vmem>>, %arg19: memref<384x128xbf16, #tpu.memory_space<vmem>>, %arg20: memref<1x128xf32, #tpu.memory_space<vmem>>, %arg21: memref<2x128x128xbf16, #tpu.memory_space<vmem>>, %arg22: memref<1x128xf32, #tpu.memory_space<vmem>>, %arg23: memref<384x128xbf16, #tpu.memory_space<vmem>>, %arg24: memref<384x128xbf16, #tpu.memory_space<vmem>>, %arg25: memref<1x128xf32, #tpu.memory_space<vmem>>, %arg26: memref<384x128xbf16, #tpu.memory_space<vmem>>, %arg27: memref<1x128xf32, #tpu.memory_space<vmem>>, %arg28: memref<128x128xbf16, #tpu.memory_space<vmem>>, %arg29: memref<1x128xf32, #tpu.memory_space<vmem>>, %arg30: memref<1x16x128xf32, #tpu.memory_space<vmem>>, %arg31: memref<18x128xf32, #tpu.memory_space<vmem>>, %arg32: memref<18x128xf32, #tpu.memory_space<vmem>>, %arg33: memref<18x128xf32, #tpu.memory_space<vmem>>, %arg34: memref<10x128xf32, #tpu.memory_space<vmem>>, %arg35: memref<10x128xf32, #tpu.memory_space<vmem>>, %arg36: memref<10x128xf32, #tpu.memory_space<vmem>>, %arg37: memref<6x128xf32, #tpu.memory_space<vmem>>) attributes {dimension_semantics = [#tpu.dimension_semantics<parallel>], iteration_bounds = array<i64: 2>, scalar_prefetch = 0 : i64, scratch_operands = 7 : i64, tpu.core_type = #tpu.core_type<tc>, window_params = [{transform_indices = @transform_0, window_bounds = array<i64: 1, 18, 64>}, {pipeline_mode = #tpu.pipeline_mode<synchronous>, transform_indices = @transform_1, window_bounds = array<i64: 192, 128>}, {pipeline_mode = #tpu.pipeline_mode<synchronous>, transform_indices = @transform_2, window_bounds = array<i64: 1, 128>}, {pipeline_mode = #tpu.pipeline_mode<synchronous>, transform_indices = @transform_3, window_bounds = array<i64: 384, 128>}, {pipeline_mode = #tpu.pipeline_mode<synchronous>, transform_indices = @transform_4, window_bounds = array<i64: 1, 128>}, {pipeline_mode = #tpu.pipeline_mode<synchronous>, transform_indices = @transform_5, window_bounds = array<i64: 384, 128>}, {pipeline_mode = #tpu.pipeline_mode<synchronous>, transform_indices = @transform_6, window_bounds = array<i64: 1, 128>}, {pipeline_mode = #tpu.pipeline_mode<synchronous>, transform_indices = @transform_7, window_bounds = array<i64: 384, 128>}, {pipeline_mode = #tpu.pipeline_mode<synchronous>, transform_indices = @transform_8, window_bounds = array<i64: 1, 128>}, {pipeline_mode = #tpu.pipeline_mode<synchronous>, transform_indices = @transform_9, window_bounds = array<i64: 384, 128>}, {pipeline_mode = #tpu.pipeline_mode<synchronous>, transform_indices = @transform_10, window_bounds = array<i64: 1, 128>}, {pipeline_mode = #tpu.pipeline_mode<synchronous>, transform_indices = @transform_11, window_bounds = array<i64: 384, 128>}, {pipeline_mode = #tpu.pipeline_mode<synchronous>, transform_indices = @transform_12, window_bounds = array<i64: 1, 128>}, {pipeline_mode = #tpu.pipeline_mode<synchronous>, transform_indices = @transform_13, window_bounds = array<i64: 2, 128, 128>}, {pipeline_mode = #tpu.pipeline_mode<synchronous>, transform_indices = @transform_14, window_bounds = array<i64: 1, 128>}, {pipeline_mode = #tpu.pipeline_mode<synchronous>, transform_indices = @transform_15, window_bounds = array<i64: 384, 128>}, {pipeline_mode = #tpu.pipeline_mode<synchronous>, transform_indices = @transform_16, window_bounds = array<i64: 384, 128>}, {pipeline_mode = #tpu.pipeline_mode<synchronous>, transform_indices = @transform_17, window_bounds = array<i64: 1, 128>}, {pipeline_mode = #tpu.pipeline_mode<synchronous>, transform_indices = @transform_18, window_bounds = array<i64: 384, 128>}, {pipeline_mode = #tpu.pipeline_mode<synchronous>, transform_indices = @transform_19, window_bounds = array<i64: 1, 128>}, {pipeline_mode = #tpu.pipeline_mode<synchronous>, transform_indices = @transform_20, window_bounds = array<i64: 2, 128, 128>}, {pipeline_mode = #tpu.pipeline_mode<synchronous>, transform_indices = @transform_21, window_bounds = array<i64: 1, 128>}, {pipeline_mode = #tpu.pipeline_mode<synchronous>, transform_indices = @transform_22, window_bounds = array<i64: 384, 128>}, {pipeline_mode = #tpu.pipeline_mode<synchronous>, transform_indices = @transform_23, window_bounds = array<i64: 384, 128>}, {pipeline_mode = #tpu.pipeline_mode<synchronous>, transform_indices = @transform_24, window_bounds = array<i64: 1, 128>}, {pipeline_mode = #tpu.pipeline_mode<synchronous>, transform_indices = @transform_25, window_bounds = array<i64: 384, 128>}, {pipeline_mode = #tpu.pipeline_mode<synchronous>, transform_indices = @transform_26, window_bounds = array<i64: 1, 128>}, {pipeline_mode = #tpu.pipeline_mode<synchronous>, transform_indices = @transform_27, window_bounds = array<i64: 128, 128>}, {pipeline_mode = #tpu.pipeline_mode<synchronous>, transform_indices = @transform_28, window_bounds = array<i64: 1, 128>}, {transform_indices = @transform_29, window_bounds = array<i64: 1, 16, 128>}]} {
    %cst = arith.constant 0.000000e+00 : f32
    %0 = vector.broadcast %cst : f32 to vector<1x128xf32>
    %c0 = arith.constant 0 : index
    %c0_0 = arith.constant 0 : index
    %1 = vector.load %arg31[%c0, %c0_0] : memref<18x128xf32, #tpu.memory_space<vmem>>, vector<1x128xf32>
    tpu.vector_store %arg31[%c0, %c0_0], %0 {strides = array<i32>} : memref<18x128xf32, #tpu.memory_space<vmem>>, vector<1x128xf32>,
    %c17 = arith.constant 17 : index
    %c0_1 = arith.constant 0 : index
    %2 = vector.load %arg31[%c17, %c0_1] : memref<18x128xf32, #tpu.memory_space<vmem>>, vector<1x128xf32>
    tpu.vector_store %arg31[%c17, %c0_1], %0 {strides = array<i32>} : memref<18x128xf32, #tpu.memory_space<vmem>>, vector<1x128xf32>,
    %cst_2 = arith.constant 0.000000e+00 : f32
    %3 = vector.broadcast %cst_2 : f32 to vector<1x128xf32>
    %c0_3 = arith.constant 0 : index
    %c0_4 = arith.constant 0 : index
    %4 = vector.load %arg32[%c0_3, %c0_4] : memref<18x128xf32, #tpu.memory_space<vmem>>, vector<1x128xf32>
    tpu.vector_store %arg32[%c0_3, %c0_4], %3 {strides = array<i32>} : memref<18x128xf32, #tpu.memory_space<vmem>>, vector<1x128xf32>,
    %c17_5 = arith.constant 17 : index
    %c0_6 = arith.constant 0 : index
    %5 = vector.load %arg32[%c17_5, %c0_6] : memref<18x128xf32, #tpu.memory_space<vmem>>, vector<1x128xf32>
    tpu.vector_store %arg32[%c17_5, %c0_6], %3 {strides = array<i32>} : memref<18x128xf32, #tpu.memory_space<vmem>>, vector<1x128xf32>,
    %cst_7 = arith.constant 0.000000e+00 : f32
    %6 = vector.broadcast %cst_7 : f32 to vector<1x128xf32>
    %c0_8 = arith.constant 0 : index
    %c0_9 = arith.constant 0 : index
    %7 = vector.load %arg33[%c0_8, %c0_9] : memref<18x128xf32, #tpu.memory_space<vmem>>, vector<1x128xf32>
    tpu.vector_store %arg33[%c0_8, %c0_9], %6 {strides = array<i32>} : memref<18x128xf32, #tpu.memory_space<vmem>>, vector<1x128xf32>,
    %c17_10 = arith.constant 17 : index
    %c0_11 = arith.constant 0 : index
    %8 = vector.load %arg33[%c17_10, %c0_11] : memref<18x128xf32, #tpu.memory_space<vmem>>, vector<1x128xf32>
    tpu.vector_store %arg33[%c17_10, %c0_11], %6 {strides = array<i32>} : memref<18x128xf32, #tpu.memory_space<vmem>>, vector<1x128xf32>,
    %cst_12 = arith.constant 0.000000e+00 : f32
    %9 = vector.broadcast %cst_12 : f32 to vector<1x128xf32>
    %c0_13 = arith.constant 0 : index
    %c0_14 = arith.constant 0 : index
    %10 = vector.load %arg34[%c0_13, %c0_14] : memref<10x128xf32, #tpu.memory_space<vmem>>, vector<1x128xf32>
    tpu.vector_store %arg34[%c0_13, %c0_14], %9 {strides = array<i32>} : memref<10x128xf32, #tpu.memory_space<vmem>>, vector<1x128xf32>,
    %c9 = arith.constant 9 : index
    %c0_15 = arith.constant 0 : index
    %11 = vector.load %arg34[%c9, %c0_15] : memref<10x128xf32, #tpu.memory_space<vmem>>, vector<1x128xf32>
    tpu.vector_store %arg34[%c9, %c0_15], %9 {strides = array<i32>} : memref<10x128xf32, #tpu.memory_space<vmem>>, vector<1x128xf32>,
    %cst_16 = arith.constant 0.000000e+00 : f32
    %12 = vector.broadcast %cst_16 : f32 to vector<1x128xf32>
    %c0_17 = arith.constant 0 : index
    %c0_18 = arith.constant 0 : index
    %13 = vector.load %arg35[%c0_17, %c0_18] : memref<10x128xf32, #tpu.memory_space<vmem>>, vector<1x128xf32>
    tpu.vector_store %arg35[%c0_17, %c0_18], %12 {strides = array<i32>} : memref<10x128xf32, #tpu.memory_space<vmem>>, vector<1x128xf32>,
    %c9_19 = arith.constant 9 : index
    %c0_20 = arith.constant 0 : index
    %14 = vector.load %arg35[%c9_19, %c0_20] : memref<10x128xf32, #tpu.memory_space<vmem>>, vector<1x128xf32>
    tpu.vector_store %arg35[%c9_19, %c0_20], %12 {strides = array<i32>} : memref<10x128xf32, #tpu.memory_space<vmem>>, vector<1x128xf32>,
    %cst_21 = arith.constant 0.000000e+00 : f32
    %15 = vector.broadcast %cst_21 : f32 to vector<1x128xf32>
    %c0_22 = arith.constant 0 : index
    %c0_23 = arith.constant 0 : index
    %16 = vector.load %arg36[%c0_22, %c0_23] : memref<10x128xf32, #tpu.memory_space<vmem>>, vector<1x128xf32>
    tpu.vector_store %arg36[%c0_22, %c0_23], %15 {strides = array<i32>} : memref<10x128xf32, #tpu.memory_space<vmem>>, vector<1x128xf32>,
    %c9_24 = arith.constant 9 : index
    %c0_25 = arith.constant 0 : index
    %17 = vector.load %arg36[%c9_24, %c0_25] : memref<10x128xf32, #tpu.memory_space<vmem>>, vector<1x128xf32>
    tpu.vector_store %arg36[%c9_24, %c0_25], %15 {strides = array<i32>} : memref<10x128xf32, #tpu.memory_space<vmem>>, vector<1x128xf32>,
    %cst_26 = arith.constant 0.000000e+00 : f32
    %18 = vector.broadcast %cst_26 : f32 to vector<1x128xf32>
    %c0_27 = arith.constant 0 : index
    %c0_28 = arith.constant 0 : index
    %19 = vector.load %arg37[%c0_27, %c0_28] : memref<6x128xf32, #tpu.memory_space<vmem>>, vector<1x128xf32>
    tpu.vector_store %arg37[%c0_27, %c0_28], %18 {strides = array<i32>} : memref<6x128xf32, #tpu.memory_space<vmem>>, vector<1x128xf32>,
    %c5 = arith.constant 5 : index
    %c0_29 = arith.constant 0 : index
    %20 = vector.load %arg37[%c5, %c0_29] : memref<6x128xf32, #tpu.memory_space<vmem>>, vector<1x128xf32>
    tpu.vector_store %arg37[%c5, %c0_29], %18 {strides = array<i32>} : memref<6x128xf32, #tpu.memory_space<vmem>>, vector<1x128xf32>,
    %c0_30 = arith.constant 0 : index
    %c0_31 = arith.constant 0 : index
    %c0_32 = arith.constant 0 : index
    %21 = vector.load %arg1[%c0_30, %c0_31, %c0_32] : memref<1x18x64xf32, #tpu.memory_space<vmem>>, vector<1x16x64xf32>
    %22 = vector.shape_cast %21 : vector<1x16x64xf32> to vector<16x64xf32>
    %23 = arith.truncf %22 : vector<16x64xf32> to vector<16x64xbf16>
    %c0_33 = arith.constant 0 : index
    %c1 = arith.constant 1 : index
    %c0_34 = arith.constant 0 : index
    %24 = vector.load %arg1[%c0_33, %c1, %c0_34] : memref<1x18x64xf32, #tpu.memory_space<vmem>>, vector<1x16x64xf32>
    %25 = vector.shape_cast %24 : vector<1x16x64xf32> to vector<16x64xf32>
    %26 = arith.truncf %25 : vector<16x64xf32> to vector<16x64xbf16>
    %c0_35 = arith.constant 0 : index
    %c2 = arith.constant 2 : index
    %c0_36 = arith.constant 0 : index
    %27 = vector.load %arg1[%c0_35, %c2, %c0_36] : memref<1x18x64xf32, #tpu.memory_space<vmem>>, vector<1x16x64xf32>
    %28 = vector.shape_cast %27 : vector<1x16x64xf32> to vector<16x64xf32>
    %29 = arith.truncf %28 : vector<16x64xf32> to vector<16x64xbf16>
    %30 = tpu.concatenate %23, %26, %29 in 1 : vector<16x64xbf16>, vector<16x64xbf16>, vector<16x64xbf16> -> vector<16x192xbf16>
    %c0_37 = arith.constant 0 : index
    %c0_38 = arith.constant 0 : index
    %31 = vector.load %arg2[%c0_37, %c0_38] : memref<192x128xbf16, #tpu.memory_space<vmem>>, vector<192x128xbf16>
    %cst_39 = arith.constant dense<0.000000e+00> : vector<16x128xf32>
    %32 = tpu.matmul %30, %31, %cst_39 {dimension_numbers = #tpu.dot_dimension_numbers<[1], [0], [0], [1], [0, 0, 1, 1], [], []>} : vector<16x192xbf16>, vector<192x128xbf16>, vector<16x128xf32> -> vector<16x128xf32>
    %c0_40 = arith.constant 0 : index
    %c0_41 = arith.constant 0 : index
    %33 = vector.load %arg3[%c0_40, %c0_41] : memref<1x128xf32, #tpu.memory_space<vmem>>, vector<1x128xf32>
    %34 = vector.broadcast %33 : vector<1x128xf32> to vector<16x128xf32>
    %35 = arith.addf %32, %34 : vector<16x128xf32>
    %cst_42 = arith.constant 0.000000e+00 : f32
    %36 = vector.broadcast %cst_42 : f32 to vector<16x128xf32>
    %37 = arith.cmpf oge, %35, %36 : vector<16x128xf32>
    %cst_43 = arith.constant 0.00999999977 : f32
    %38 = vector.broadcast %cst_43 : f32 to vector<16x128xf32>
    %39 = arith.mulf %38, %35 : vector<16x128xf32>
    %40 = arith.select %37, %35, %39 : vector<16x128xi1>, vector<16x128xf32>
    %c1_44 = arith.constant 1 : index
    %c0_45 = arith.constant 0 : index
    %41 = vector.load %arg31[%c1_44, %c0_45] : memref<18x128xf32, #tpu.memory_space<vmem>>, vector<16x128xf32>
    tpu.vector_store %arg31[%c1_44, %c0_45], %40 {strides = array<i32>} : memref<18x128xf32, #tpu.memory_space<vmem>>, vector<16x128xf32>,
    %c0_46 = arith.constant 0 : index
    %c0_47 = arith.constant 0 : index
    %42 = vector.load %arg31[%c0_46, %c0_47] : memref<18x128xf32, #tpu.memory_space<vmem>>, vector<16x128xf32>
    %43 = arith.truncf %42 : vector<16x128xf32> to vector<16x128xbf16>
    %c1_48 = arith.constant 1 : index
    %c0_49 = arith.constant 0 : index
    %44 = vector.load %arg31[%c1_48, %c0_49] : memref<18x128xf32, #tpu.memory_space<vmem>>, vector<16x128xf32>
    %45 = arith.truncf %44 : vector<16x128xf32> to vector<16x128xbf16>
    %c2_50 = arith.constant 2 : index
    %c0_51 = arith.constant 0 : index
    %46 = vector.load %arg31[%c2_50, %c0_51] : memref<18x128xf32, #tpu.memory_space<vmem>>, vector<16x128xf32>
    %47 = arith.truncf %46 : vector<16x128xf32> to vector<16x128xbf16>
    %48 = tpu.concatenate %43, %45, %47 in 1 : vector<16x128xbf16>, vector<16x128xbf16>, vector<16x128xbf16> -> vector<16x384xbf16>
    %c0_52 = arith.constant 0 : index
    %c0_53 = arith.constant 0 : index
    %49 = vector.load %arg4[%c0_52, %c0_53] : memref<384x128xbf16, #tpu.memory_space<vmem>>, vector<384x128xbf16>
    %cst_54 = arith.constant dense<0.000000e+00> : vector<16x128xf32>
    %50 = tpu.matmul %48, %49, %cst_54 {dimension_numbers = #tpu.dot_dimension_numbers<[1], [0], [0], [1], [0, 0, 1, 1], [], []>} : vector<16x384xbf16>, vector<384x128xbf16>, vector<16x128xf32> -> vector<16x128xf32>
    %c0_55 = arith.constant 0 : index
    %c0_56 = arith.constant 0 : index
    %51 = vector.load %arg5[%c0_55, %c0_56] : memref<1x128xf32, #tpu.memory_space<vmem>>, vector<1x128xf32>
    %52 = vector.broadcast %51 : vector<1x128xf32> to vector<16x128xf32>
    %53 = arith.addf %50, %52 : vector<16x128xf32>
    %cst_57 = arith.constant 0.000000e+00 : f32
    %54 = vector.broadcast %cst_57 : f32 to vector<16x128xf32>
    %55 = arith.cmpf oge, %53, %54 : vector<16x128xf32>
    %cst_58 = arith.constant 0.00999999977 : f32
    %56 = vector.broadcast %cst_58 : f32 to vector<16x128xf32>
    %57 = arith.mulf %56, %53 : vector<16x128xf32>
    %58 = arith.select %55, %53, %57 : vector<16x128xi1>, vector<16x128xf32>
    %c1_59 = arith.constant 1 : index
    %c0_60 = arith.constant 0 : index
    %59 = vector.load %arg32[%c1_59, %c0_60] : memref<18x128xf32, #tpu.memory_space<vmem>>, vector<16x128xf32>
    tpu.vector_store %arg32[%c1_59, %c0_60], %58 {strides = array<i32>} : memref<18x128xf32, #tpu.memory_space<vmem>>, vector<16x128xf32>,
    %c0_61 = arith.constant 0 : index
    %c0_62 = arith.constant 0 : index
    %60 = vector.load %arg32[%c0_61, %c0_62] : memref<18x128xf32, #tpu.memory_space<vmem>>, vector<16x128xf32>
    %61 = arith.truncf %60 : vector<16x128xf32> to vector<16x128xbf16>
    %c1_63 = arith.constant 1 : index
    %c0_64 = arith.constant 0 : index
    %62 = vector.load %arg32[%c1_63, %c0_64] : memref<18x128xf32, #tpu.memory_space<vmem>>, vector<16x128xf32>
    %63 = arith.truncf %62 : vector<16x128xf32> to vector<16x128xbf16>
    %c2_65 = arith.constant 2 : index
    %c0_66 = arith.constant 0 : index
    %64 = vector.load %arg32[%c2_65, %c0_66] : memref<18x128xf32, #tpu.memory_space<vmem>>, vector<16x128xf32>
    %65 = arith.truncf %64 : vector<16x128xf32> to vector<16x128xbf16>
    %66 = tpu.concatenate %61, %63, %65 in 1 : vector<16x128xbf16>, vector<16x128xbf16>, vector<16x128xbf16> -> vector<16x384xbf16>
    %c0_67 = arith.constant 0 : index
    %c0_68 = arith.constant 0 : index
    %67 = vector.load %arg6[%c0_67, %c0_68] : memref<384x128xbf16, #tpu.memory_space<vmem>>, vector<384x128xbf16>
    %cst_69 = arith.constant dense<0.000000e+00> : vector<16x128xf32>
    %68 = tpu.matmul %66, %67, %cst_69 {dimension_numbers = #tpu.dot_dimension_numbers<[1], [0], [0], [1], [0, 0, 1, 1], [], []>} : vector<16x384xbf16>, vector<384x128xbf16>, vector<16x128xf32> -> vector<16x128xf32>
    %69 = tpu.iota {dimensions = array<i32: 0>} : vector<8x16xi32>
    %70 = tpu.iota {dimensions = array<i32: 1>} : vector<8x16xi32>
    %c2_i32 = arith.constant 2 : i32
    %71 = vector.broadcast %c2_i32 : i32 to vector<8x16xi32>
    %72 = arith.muli %71, %69 : vector<8x16xi32>
    %73 = arith.cmpi eq, %70, %72 : vector<8x16xi32>
    %74 = arith.extui %73 : vector<8x16xi1> to vector<8x16xi32>
    %75 = arith.sitofp %74 : vector<8x16xi32> to vector<8x16xf32>
    %cst_70 = arith.constant dense<0.000000e+00> : vector<8x128xf32>
    %76 = tpu.matmul %75, %68, %cst_70 {dimension_numbers = #tpu.dot_dimension_numbers<[1], [0], [0], [1], [0, 0, 1, 1], [], []>} : vector<8x16xf32>, vector<16x128xf32>, vector<8x128xf32> -> vector<8x128xf32>
    %c0_71 = arith.constant 0 : index
    %c0_72 = arith.constant 0 : index
    %77 = vector.load %arg7[%c0_71, %c0_72] : memref<1x128xf32, #tpu.memory_space<vmem>>, vector<1x128xf32>
    %78 = vector.broadcast %77 : vector<1x128xf32> to vector<8x128xf32>
    %79 = arith.addf %76, %78 : vector<8x128xf32>
    %cst_73 = arith.constant 0.000000e+00 : f32
    %80 = vector.broadcast %cst_73 : f32 to vector<8x128xf32>
    %81 = arith.cmpf oge, %79, %80 : vector<8x128xf32>
    %cst_74 = arith.constant 0.00999999977 : f32
    %82 = vector.broadcast %cst_74 : f32 to vector<8x128xf32>
    %83 = arith.mulf %82, %79 : vector<8x128xf32>
    %84 = arith.select %81, %79, %83 : vector<8x128xi1>, vector<8x128xf32>
    %c1_75 = arith.constant 1 : index
    %c0_76 = arith.constant 0 : index
    %85 = vector.load %arg34[%c1_75, %c0_76] : memref<10x128xf32, #tpu.memory_space<vmem>>, vector<8x128xf32>
    tpu.vector_store %arg34[%c1_75, %c0_76], %84 {strides = array<i32>} : memref<10x128xf32, #tpu.memory_space<vmem>>, vector<8x128xf32>,
    %c0_77 = arith.constant 0 : index
    %c0_78 = arith.constant 0 : index
    %86 = vector.load %arg34[%c0_77, %c0_78] : memref<10x128xf32, #tpu.memory_space<vmem>>, vector<8x128xf32>
    %87 = arith.truncf %86 : vector<8x128xf32> to vector<8x128xbf16>
    %c1_79 = arith.constant 1 : index
    %c0_80 = arith.constant 0 : index
    %88 = vector.load %arg34[%c1_79, %c0_80] : memref<10x128xf32, #tpu.memory_space<vmem>>, vector<8x128xf32>
    %89 = arith.truncf %88 : vector<8x128xf32> to vector<8x128xbf16>
    %c2_81 = arith.constant 2 : index
    %c0_82 = arith.constant 0 : index
    %90 = vector.load %arg34[%c2_81, %c0_82] : memref<10x128xf32, #tpu.memory_space<vmem>>, vector<8x128xf32>
    %91 = arith.truncf %90 : vector<8x128xf32> to vector<8x128xbf16>
    %92 = tpu.concatenate %87, %89, %91 in 1 : vector<8x128xbf16>, vector<8x128xbf16>, vector<8x128xbf16> -> vector<8x384xbf16>
    %c0_83 = arith.constant 0 : index
    %c0_84 = arith.constant 0 : index
    %93 = vector.load %arg8[%c0_83, %c0_84] : memref<384x128xbf16, #tpu.memory_space<vmem>>, vector<384x128xbf16>
    %cst_85 = arith.constant dense<0.000000e+00> : vector<8x128xf32>
    %94 = tpu.matmul %92, %93, %cst_85 {dimension_numbers = #tpu.dot_dimension_numbers<[1], [0], [0], [1], [0, 0, 1, 1], [], []>} : vector<8x384xbf16>, vector<384x128xbf16>, vector<8x128xf32> -> vector<8x128xf32>
    %c0_86 = arith.constant 0 : index
    %c0_87 = arith.constant 0 : index
    %95 = vector.load %arg9[%c0_86, %c0_87] : memref<1x128xf32, #tpu.memory_space<vmem>>, vector<1x128xf32>
    %96 = vector.broadcast %95 : vector<1x128xf32> to vector<8x128xf32>
    %97 = arith.addf %94, %96 : vector<8x128xf32>
    %cst_88 = arith.constant 0.000000e+00 : f32
    %98 = vector.broadcast %cst_88 : f32 to vector<8x128xf32>
    %99 = arith.cmpf oge, %97, %98 : vector<8x128xf32>
    %cst_89 = arith.constant 0.00999999977 : f32
    %100 = vector.broadcast %cst_89 : f32 to vector<8x128xf32>
    %101 = arith.mulf %100, %97 : vector<8x128xf32>
    %102 = arith.select %99, %97, %101 : vector<8x128xi1>, vector<8x128xf32>
    %c1_90 = arith.constant 1 : index
    %c0_91 = arith.constant 0 : index
    %103 = vector.load %arg35[%c1_90, %c0_91] : memref<10x128xf32, #tpu.memory_space<vmem>>, vector<8x128xf32>
    tpu.vector_store %arg35[%c1_90, %c0_91], %102 {strides = array<i32>} : memref<10x128xf32, #tpu.memory_space<vmem>>, vector<8x128xf32>,
    %c0_92 = arith.constant 0 : index
    %c0_93 = arith.constant 0 : index
    %104 = vector.load %arg35[%c0_92, %c0_93] : memref<10x128xf32, #tpu.memory_space<vmem>>, vector<8x128xf32>
    %105 = arith.truncf %104 : vector<8x128xf32> to vector<8x128xbf16>
    %c1_94 = arith.constant 1 : index
    %c0_95 = arith.constant 0 : index
    %106 = vector.load %arg35[%c1_94, %c0_95] : memref<10x128xf32, #tpu.memory_space<vmem>>, vector<8x128xf32>
    %107 = arith.truncf %106 : vector<8x128xf32> to vector<8x128xbf16>
    %c2_96 = arith.constant 2 : index
    %c0_97 = arith.constant 0 : index
    %108 = vector.load %arg35[%c2_96, %c0_97] : memref<10x128xf32, #tpu.memory_space<vmem>>, vector<8x128xf32>
    %109 = arith.truncf %108 : vector<8x128xf32> to vector<8x128xbf16>
    %110 = tpu.concatenate %105, %107, %109 in 1 : vector<8x128xbf16>, vector<8x128xbf16>, vector<8x128xbf16> -> vector<8x384xbf16>
    %c0_98 = arith.constant 0 : index
    %c0_99 = arith.constant 0 : index
    %111 = vector.load %arg10[%c0_98, %c0_99] : memref<384x128xbf16, #tpu.memory_space<vmem>>, vector<384x128xbf16>
    %cst_100 = arith.constant dense<0.000000e+00> : vector<8x128xf32>
    %112 = tpu.matmul %110, %111, %cst_100 {dimension_numbers = #tpu.dot_dimension_numbers<[1], [0], [0], [1], [0, 0, 1, 1], [], []>} : vector<8x384xbf16>, vector<384x128xbf16>, vector<8x128xf32> -> vector<8x128xf32>
    %113 = tpu.iota {dimensions = array<i32: 0>} : vector<4x8xi32>
    %114 = tpu.iota {dimensions = array<i32: 1>} : vector<4x8xi32>
    %c2_i32_101 = arith.constant 2 : i32
    %115 = vector.broadcast %c2_i32_101 : i32 to vector<4x8xi32>
    %116 = arith.muli %115, %113 : vector<4x8xi32>
    %117 = arith.cmpi eq, %114, %116 : vector<4x8xi32>
    %118 = arith.extui %117 : vector<4x8xi1> to vector<4x8xi32>
    %119 = arith.sitofp %118 : vector<4x8xi32> to vector<4x8xf32>
    %cst_102 = arith.constant dense<0.000000e+00> : vector<4x128xf32>
    %120 = tpu.matmul %119, %112, %cst_102 {dimension_numbers = #tpu.dot_dimension_numbers<[1], [0], [0], [1], [0, 0, 1, 1], [], []>} : vector<4x8xf32>, vector<8x128xf32>, vector<4x128xf32> -> vector<4x128xf32>
    %c0_103 = arith.constant 0 : index
    %c0_104 = arith.constant 0 : index
    %121 = vector.load %arg11[%c0_103, %c0_104] : memref<1x128xf32, #tpu.memory_space<vmem>>, vector<1x128xf32>
    %122 = vector.broadcast %121 : vector<1x128xf32> to vector<4x128xf32>
    %123 = arith.addf %120, %122 : vector<4x128xf32>
    %cst_105 = arith.constant 0.000000e+00 : f32
    %124 = vector.broadcast %cst_105 : f32 to vector<4x128xf32>
    %125 = arith.cmpf oge, %123, %124 : vector<4x128xf32>
    %cst_106 = arith.constant 0.00999999977 : f32
    %126 = vector.broadcast %cst_106 : f32 to vector<4x128xf32>
    %127 = arith.mulf %126, %123 : vector<4x128xf32>
    %128 = arith.select %125, %123, %127 : vector<4x128xi1>, vector<4x128xf32>
    %c1_107 = arith.constant 1 : index
    %c0_108 = arith.constant 0 : index
    %129 = vector.load %arg37[%c1_107, %c0_108] : memref<6x128xf32, #tpu.memory_space<vmem>>, vector<4x128xf32>
    tpu.vector_store %arg37[%c1_107, %c0_108], %128 {strides = array<i32>} : memref<6x128xf32, #tpu.memory_space<vmem>>, vector<4x128xf32>,
    %c0_109 = arith.constant 0 : index
    %c0_110 = arith.constant 0 : index
    %130 = vector.load %arg37[%c0_109, %c0_110] : memref<6x128xf32, #tpu.memory_space<vmem>>, vector<4x128xf32>
    %131 = arith.truncf %130 : vector<4x128xf32> to vector<4x128xbf16>
    %c1_111 = arith.constant 1 : index
    %c0_112 = arith.constant 0 : index
    %132 = vector.load %arg37[%c1_111, %c0_112] : memref<6x128xf32, #tpu.memory_space<vmem>>, vector<4x128xf32>
    %133 = arith.truncf %132 : vector<4x128xf32> to vector<4x128xbf16>
    %c2_113 = arith.constant 2 : index
    %c0_114 = arith.constant 0 : index
    %134 = vector.load %arg37[%c2_113, %c0_114] : memref<6x128xf32, #tpu.memory_space<vmem>>, vector<4x128xf32>
    %135 = arith.truncf %134 : vector<4x128xf32> to vector<4x128xbf16>
    %136 = tpu.concatenate %131, %133, %135 in 1 : vector<4x128xbf16>, vector<4x128xbf16>, vector<4x128xbf16> -> vector<4x384xbf16>
    %c0_115 = arith.constant 0 : index
    %c0_116 = arith.constant 0 : index
    %137 = vector.load %arg12[%c0_115, %c0_116] : memref<384x128xbf16, #tpu.memory_space<vmem>>, vector<384x128xbf16>
    %cst_117 = arith.constant dense<0.000000e+00> : vector<4x128xf32>
    %138 = tpu.matmul %136, %137, %cst_117 {dimension_numbers = #tpu.dot_dimension_numbers<[1], [0], [0], [1], [0, 0, 1, 1], [], []>} : vector<4x384xbf16>, vector<384x128xbf16>, vector<4x128xf32> -> vector<4x128xf32>
    %c0_118 = arith.constant 0 : index
    %c0_119 = arith.constant 0 : index
    %139 = vector.load %arg13[%c0_118, %c0_119] : memref<1x128xf32, #tpu.memory_space<vmem>>, vector<1x128xf32>
    %140 = vector.broadcast %139 : vector<1x128xf32> to vector<4x128xf32>
    %141 = arith.addf %138, %140 : vector<4x128xf32>
    %cst_120 = arith.constant 0.000000e+00 : f32
    %142 = vector.broadcast %cst_120 : f32 to vector<4x128xf32>
    %143 = arith.cmpf oge, %141, %142 : vector<4x128xf32>
    %cst_121 = arith.constant 0.00999999977 : f32
    %144 = vector.broadcast %cst_121 : f32 to vector<4x128xf32>
    %145 = arith.mulf %144, %141 : vector<4x128xf32>
    %146 = arith.select %143, %141, %145 : vector<4x128xi1>, vector<4x128xf32>
    %147 = arith.truncf %146 : vector<4x128xf32> to vector<4x128xbf16>
    %c0_122 = arith.constant 0 : index
    %c0_123 = arith.constant 0 : index
    %c0_124 = arith.constant 0 : index
    %148 = vector.load %arg14[%c0_122, %c0_123, %c0_124] : memref<2x128x128xbf16, #tpu.memory_space<vmem>>, vector<1x128x128xbf16>
    %149 = vector.shape_cast %148 : vector<1x128x128xbf16> to vector<128x128xbf16>
    %cst_125 = arith.constant dense<0.000000e+00> : vector<4x128xf32>
    %150 = tpu.matmul %147, %149, %cst_125 {dimension_numbers = #tpu.dot_dimension_numbers<[1], [0], [0], [1], [0, 0, 1, 1], [], []>} : vector<4x128xbf16>, vector<128x128xbf16>, vector<4x128xf32> -> vector<4x128xf32>
    %c1_126 = arith.constant 1 : index
    %c0_127 = arith.constant 0 : index
    %c0_128 = arith.constant 0 : index
    %151 = vector.load %arg14[%c1_126, %c0_127, %c0_128] : memref<2x128x128xbf16, #tpu.memory_space<vmem>>, vector<1x128x128xbf16>
    %152 = vector.shape_cast %151 : vector<1x128x128xbf16> to vector<128x128xbf16>
    %cst_129 = arith.constant dense<0.000000e+00> : vector<4x128xf32>
    %153 = tpu.matmul %147, %152, %cst_129 {dimension_numbers = #tpu.dot_dimension_numbers<[1], [0], [0], [1], [0, 0, 1, 1], [], []>} : vector<4x128xbf16>, vector<128x128xbf16>, vector<4x128xf32> -> vector<4x128xf32>
    %154 = tpu.iota {dimensions = array<i32: 0>} : vector<8x4xi32>
    %155 = tpu.iota {dimensions = array<i32: 1>} : vector<8x4xi32>
    %c2_i32_130 = arith.constant 2 : i32
    %156 = vector.broadcast %c2_i32_130 : i32 to vector<8x4xi32>
    %157 = arith.muli %156, %155 : vector<8x4xi32>
    %158 = arith.cmpi eq, %154, %157 : vector<8x4xi32>
    %159 = arith.extui %158 : vector<8x4xi1> to vector<8x4xi32>
    %160 = arith.sitofp %159 : vector<8x4xi32> to vector<8x4xf32>
    %c2_i32_131 = arith.constant 2 : i32
    %161 = vector.broadcast %c2_i32_131 : i32 to vector<8x4xi32>
    %162 = arith.muli %161, %155 : vector<8x4xi32>
    %c1_i32 = arith.constant 1 : i32
    %163 = vector.broadcast %c1_i32 : i32 to vector<8x4xi32>
    %164 = arith.addi %162, %163 : vector<8x4xi32>
    %165 = arith.cmpi eq, %154, %164 : vector<8x4xi32>
    %166 = arith.extui %165 : vector<8x4xi1> to vector<8x4xi32>
    %167 = arith.sitofp %166 : vector<8x4xi32> to vector<8x4xf32>
    %cst_132 = arith.constant dense<0.000000e+00> : vector<8x128xf32>
    %168 = tpu.matmul %160, %150, %cst_132 {dimension_numbers = #tpu.dot_dimension_numbers<[1], [0], [0], [1], [0, 0, 1, 1], [], []>} : vector<8x4xf32>, vector<4x128xf32>, vector<8x128xf32> -> vector<8x128xf32>
    %cst_133 = arith.constant dense<0.000000e+00> : vector<8x128xf32>
    %169 = tpu.matmul %167, %153, %cst_133 {dimension_numbers = #tpu.dot_dimension_numbers<[1], [0], [0], [1], [0, 0, 1, 1], [], []>} : vector<8x4xf32>, vector<4x128xf32>, vector<8x128xf32> -> vector<8x128xf32>
    %170 = arith.addf %168, %169 : vector<8x128xf32>
    %c0_134 = arith.constant 0 : index
    %c0_135 = arith.constant 0 : index
    %171 = vector.load %arg15[%c0_134, %c0_135] : memref<1x128xf32, #tpu.memory_space<vmem>>, vector<1x128xf32>
    %172 = vector.broadcast %171 : vector<1x128xf32> to vector<8x128xf32>
    %173 = arith.addf %170, %172 : vector<8x128xf32>
    %c1_136 = arith.constant 1 : index
    %c0_137 = arith.constant 0 : index
    %174 = vector.load %arg36[%c1_136, %c0_137] : memref<10x128xf32, #tpu.memory_space<vmem>>, vector<8x128xf32>
    tpu.vector_store %arg36[%c1_136, %c0_137], %173 {strides = array<i32>} : memref<10x128xf32, #tpu.memory_space<vmem>>, vector<8x128xf32>,
    %c0_138 = arith.constant 0 : index
    %c0_139 = arith.constant 0 : index
    %175 = vector.load %arg36[%c0_138, %c0_139] : memref<10x128xf32, #tpu.memory_space<vmem>>, vector<8x128xf32>
    %176 = arith.truncf %175 : vector<8x128xf32> to vector<8x128xbf16>
    %c1_140 = arith.constant 1 : index
    %c0_141 = arith.constant 0 : index
    %177 = vector.load %arg36[%c1_140, %c0_141] : memref<10x128xf32, #tpu.memory_space<vmem>>, vector<8x128xf32>
    %178 = arith.truncf %177 : vector<8x128xf32> to vector<8x128xbf16>
    %c2_142 = arith.constant 2 : index
    %c0_143 = arith.constant 0 : index
    %179 = vector.load %arg36[%c2_142, %c0_143] : memref<10x128xf32, #tpu.memory_space<vmem>>, vector<8x128xf32>
    %180 = arith.truncf %179 : vector<8x128xf32> to vector<8x128xbf16>
    %181 = tpu.concatenate %176, %178, %180 in 1 : vector<8x128xbf16>, vector<8x128xbf16>, vector<8x128xbf16> -> vector<8x384xbf16>
    %c0_144 = arith.constant 0 : index
    %c0_145 = arith.constant 0 : index
    %182 = vector.load %arg16[%c0_144, %c0_145] : memref<384x128xbf16, #tpu.memory_space<vmem>>, vector<384x128xbf16>
    %cst_146 = arith.constant dense<0.000000e+00> : vector<8x128xf32>
    %183 = tpu.matmul %181, %182, %cst_146 {dimension_numbers = #tpu.dot_dimension_numbers<[1], [0], [0], [1], [0, 0, 1, 1], [], []>} : vector<8x384xbf16>, vector<384x128xbf16>, vector<8x128xf32> -> vector<8x128xf32>
    %c0_147 = arith.constant 0 : index
    %c0_148 = arith.constant 0 : index
    %184 = vector.load %arg35[%c0_147, %c0_148] : memref<10x128xf32, #tpu.memory_space<vmem>>, vector<8x128xf32>
    %185 = arith.truncf %184 : vector<8x128xf32> to vector<8x128xbf16>
    %c1_149 = arith.constant 1 : index
    %c0_150 = arith.constant 0 : index
    %186 = vector.load %arg35[%c1_149, %c0_150] : memref<10x128xf32, #tpu.memory_space<vmem>>, vector<8x128xf32>
    %187 = arith.truncf %186 : vector<8x128xf32> to vector<8x128xbf16>
    %c2_151 = arith.constant 2 : index
    %c0_152 = arith.constant 0 : index
    %188 = vector.load %arg35[%c2_151, %c0_152] : memref<10x128xf32, #tpu.memory_space<vmem>>, vector<8x128xf32>
    %189 = arith.truncf %188 : vector<8x128xf32> to vector<8x128xbf16>
    %190 = tpu.concatenate %185, %187, %189 in 1 : vector<8x128xbf16>, vector<8x128xbf16>, vector<8x128xbf16> -> vector<8x384xbf16>
    %c0_153 = arith.constant 0 : index
    %c0_154 = arith.constant 0 : index
    %191 = vector.load %arg17[%c0_153, %c0_154] : memref<384x128xbf16, #tpu.memory_space<vmem>>, vector<384x128xbf16>
    %cst_155 = arith.constant dense<0.000000e+00> : vector<8x128xf32>
    %192 = tpu.matmul %190, %191, %cst_155 {dimension_numbers = #tpu.dot_dimension_numbers<[1], [0], [0], [1], [0, 0, 1, 1], [], []>} : vector<8x384xbf16>, vector<384x128xbf16>, vector<8x128xf32> -> vector<8x128xf32>
    %193 = arith.addf %183, %192 : vector<8x128xf32>
    %c0_156 = arith.constant 0 : index
    %c0_157 = arith.constant 0 : index
    %194 = vector.load %arg18[%c0_156, %c0_157] : memref<1x128xf32, #tpu.memory_space<vmem>>, vector<1x128xf32>
    %195 = vector.broadcast %194 : vector<1x128xf32> to vector<8x128xf32>
    %196 = arith.addf %193, %195 : vector<8x128xf32>
    %cst_158 = arith.constant 0.000000e+00 : f32
    %197 = vector.broadcast %cst_158 : f32 to vector<8x128xf32>
    %198 = arith.cmpf oge, %196, %197 : vector<8x128xf32>
    %cst_159 = arith.constant 0.00999999977 : f32
    %199 = vector.broadcast %cst_159 : f32 to vector<8x128xf32>
    %200 = arith.mulf %199, %196 : vector<8x128xf32>
    %201 = arith.select %198, %196, %200 : vector<8x128xi1>, vector<8x128xf32>
    %c1_160 = arith.constant 1 : index
    %c0_161 = arith.constant 0 : index
    %202 = vector.load %arg34[%c1_160, %c0_161] : memref<10x128xf32, #tpu.memory_space<vmem>>, vector<8x128xf32>
    tpu.vector_store %arg34[%c1_160, %c0_161], %201 {strides = array<i32>} : memref<10x128xf32, #tpu.memory_space<vmem>>, vector<8x128xf32>,
    %c0_162 = arith.constant 0 : index
    %c0_163 = arith.constant 0 : index
    %203 = vector.load %arg34[%c0_162, %c0_163] : memref<10x128xf32, #tpu.memory_space<vmem>>, vector<8x128xf32>
    %204 = arith.truncf %203 : vector<8x128xf32> to vector<8x128xbf16>
    %c1_164 = arith.constant 1 : index
    %c0_165 = arith.constant 0 : index
    %205 = vector.load %arg34[%c1_164, %c0_165] : memref<10x128xf32, #tpu.memory_space<vmem>>, vector<8x128xf32>
    %206 = arith.truncf %205 : vector<8x128xf32> to vector<8x128xbf16>
    %c2_166 = arith.constant 2 : index
    %c0_167 = arith.constant 0 : index
    %207 = vector.load %arg34[%c2_166, %c0_167] : memref<10x128xf32, #tpu.memory_space<vmem>>, vector<8x128xf32>
    %208 = arith.truncf %207 : vector<8x128xf32> to vector<8x128xbf16>
    %209 = tpu.concatenate %204, %206, %208 in 1 : vector<8x128xbf16>, vector<8x128xbf16>, vector<8x128xbf16> -> vector<8x384xbf16>
    %c0_168 = arith.constant 0 : index
    %c0_169 = arith.constant 0 : index
    %210 = vector.load %arg19[%c0_168, %c0_169] : memref<384x128xbf16, #tpu.memory_space<vmem>>, vector<384x128xbf16>
    %cst_170 = arith.constant dense<0.000000e+00> : vector<8x128xf32>
    %211 = tpu.matmul %209, %210, %cst_170 {dimension_numbers = #tpu.dot_dimension_numbers<[1], [0], [0], [1], [0, 0, 1, 1], [], []>} : vector<8x384xbf16>, vector<384x128xbf16>, vector<8x128xf32> -> vector<8x128xf32>
    %c0_171 = arith.constant 0 : index
    %c0_172 = arith.constant 0 : index
    %212 = vector.load %arg20[%c0_171, %c0_172] : memref<1x128xf32, #tpu.memory_space<vmem>>, vector<1x128xf32>
    %213 = vector.broadcast %212 : vector<1x128xf32> to vector<8x128xf32>
    %214 = arith.addf %211, %213 : vector<8x128xf32>
    %cst_173 = arith.constant 0.000000e+00 : f32
    %215 = vector.broadcast %cst_173 : f32 to vector<8x128xf32>
    %216 = arith.cmpf oge, %214, %215 : vector<8x128xf32>
    %cst_174 = arith.constant 0.00999999977 : f32
    %217 = vector.broadcast %cst_174 : f32 to vector<8x128xf32>
    %218 = arith.mulf %217, %214 : vector<8x128xf32>
    %219 = arith.select %216, %214, %218 : vector<8x128xi1>, vector<8x128xf32>
    %220 = arith.truncf %219 : vector<8x128xf32> to vector<8x128xbf16>
    %c0_175 = arith.constant 0 : index
    %c0_176 = arith.constant 0 : index
    %c0_177 = arith.constant 0 : index
    %221 = vector.load %arg21[%c0_175, %c0_176, %c0_177] : memref<2x128x128xbf16, #tpu.memory_space<vmem>>, vector<1x128x128xbf16>
    %222 = vector.shape_cast %221 : vector<1x128x128xbf16> to vector<128x128xbf16>
    %cst_178 = arith.constant dense<0.000000e+00> : vector<8x128xf32>
    %223 = tpu.matmul %220, %222, %cst_178 {dimension_numbers = #tpu.dot_dimension_numbers<[1], [0], [0], [1], [0, 0, 1, 1], [], []>} : vector<8x128xbf16>, vector<128x128xbf16>, vector<8x128xf32> -> vector<8x128xf32>
    %c1_179 = arith.constant 1 : index
    %c0_180 = arith.constant 0 : index
    %c0_181 = arith.constant 0 : index
    %224 = vector.load %arg21[%c1_179, %c0_180, %c0_181] : memref<2x128x128xbf16, #tpu.memory_space<vmem>>, vector<1x128x128xbf16>
    %225 = vector.shape_cast %224 : vector<1x128x128xbf16> to vector<128x128xbf16>
    %cst_182 = arith.constant dense<0.000000e+00> : vector<8x128xf32>
    %226 = tpu.matmul %220, %225, %cst_182 {dimension_numbers = #tpu.dot_dimension_numbers<[1], [0], [0], [1], [0, 0, 1, 1], [], []>} : vector<8x128xbf16>, vector<128x128xbf16>, vector<8x128xf32> -> vector<8x128xf32>
    %227 = tpu.iota {dimensions = array<i32: 0>} : vector<16x8xi32>
    %228 = tpu.iota {dimensions = array<i32: 1>} : vector<16x8xi32>
    %c2_i32_183 = arith.constant 2 : i32
    %229 = vector.broadcast %c2_i32_183 : i32 to vector<16x8xi32>
    %230 = arith.muli %229, %228 : vector<16x8xi32>
    %231 = arith.cmpi eq, %227, %230 : vector<16x8xi32>
    %232 = arith.extui %231 : vector<16x8xi1> to vector<16x8xi32>
    %233 = arith.sitofp %232 : vector<16x8xi32> to vector<16x8xf32>
    %c2_i32_184 = arith.constant 2 : i32
    %234 = vector.broadcast %c2_i32_184 : i32 to vector<16x8xi32>
    %235 = arith.muli %234, %228 : vector<16x8xi32>
    %c1_i32_185 = arith.constant 1 : i32
    %236 = vector.broadcast %c1_i32_185 : i32 to vector<16x8xi32>
    %237 = arith.addi %235, %236 : vector<16x8xi32>
    %238 = arith.cmpi eq, %227, %237 : vector<16x8xi32>
    %239 = arith.extui %238 : vector<16x8xi1> to vector<16x8xi32>
    %240 = arith.sitofp %239 : vector<16x8xi32> to vector<16x8xf32>
    %cst_186 = arith.constant dense<0.000000e+00> : vector<16x128xf32>
    %241 = tpu.matmul %233, %223, %cst_186 {dimension_numbers = #tpu.dot_dimension_numbers<[1], [0], [0], [1], [0, 0, 1, 1], [], []>} : vector<16x8xf32>, vector<8x128xf32>, vector<16x128xf32> -> vector<16x128xf32>
    %cst_187 = arith.constant dense<0.000000e+00> : vector<16x128xf32>
    %242 = tpu.matmul %240, %226, %cst_187 {dimension_numbers = #tpu.dot_dimension_numbers<[1], [0], [0], [1], [0, 0, 1, 1], [], []>} : vector<16x8xf32>, vector<8x128xf32>, vector<16x128xf32> -> vector<16x128xf32>
    %243 = arith.addf %241, %242 : vector<16x128xf32>
    %c0_188 = arith.constant 0 : index
    %c0_189 = arith.constant 0 : index
    %244 = vector.load %arg22[%c0_188, %c0_189] : memref<1x128xf32, #tpu.memory_space<vmem>>, vector<1x128xf32>
    %245 = vector.broadcast %244 : vector<1x128xf32> to vector<16x128xf32>
    %246 = arith.addf %243, %245 : vector<16x128xf32>
    %c1_190 = arith.constant 1 : index
    %c0_191 = arith.constant 0 : index
    %247 = vector.load %arg33[%c1_190, %c0_191] : memref<18x128xf32, #tpu.memory_space<vmem>>, vector<16x128xf32>
    tpu.vector_store %arg33[%c1_190, %c0_191], %246 {strides = array<i32>} : memref<18x128xf32, #tpu.memory_space<vmem>>, vector<16x128xf32>,
    %c0_192 = arith.constant 0 : index
    %c0_193 = arith.constant 0 : index
    %248 = vector.load %arg33[%c0_192, %c0_193] : memref<18x128xf32, #tpu.memory_space<vmem>>, vector<16x128xf32>
    %249 = arith.truncf %248 : vector<16x128xf32> to vector<16x128xbf16>
    %c1_194 = arith.constant 1 : index
    %c0_195 = arith.constant 0 : index
    %250 = vector.load %arg33[%c1_194, %c0_195] : memref<18x128xf32, #tpu.memory_space<vmem>>, vector<16x128xf32>
    %251 = arith.truncf %250 : vector<16x128xf32> to vector<16x128xbf16>
    %c2_196 = arith.constant 2 : index
    %c0_197 = arith.constant 0 : index
    %252 = vector.load %arg33[%c2_196, %c0_197] : memref<18x128xf32, #tpu.memory_space<vmem>>, vector<16x128xf32>
    %253 = arith.truncf %252 : vector<16x128xf32> to vector<16x128xbf16>
    %254 = tpu.concatenate %249, %251, %253 in 1 : vector<16x128xbf16>, vector<16x128xbf16>, vector<16x128xbf16> -> vector<16x384xbf16>
    %c0_198 = arith.constant 0 : index
    %c0_199 = arith.constant 0 : index
    %255 = vector.load %arg23[%c0_198, %c0_199] : memref<384x128xbf16, #tpu.memory_space<vmem>>, vector<384x128xbf16>
    %cst_200 = arith.constant dense<0.000000e+00> : vector<16x128xf32>
    %256 = tpu.matmul %254, %255, %cst_200 {dimension_numbers = #tpu.dot_dimension_numbers<[1], [0], [0], [1], [0, 0, 1, 1], [], []>} : vector<16x384xbf16>, vector<384x128xbf16>, vector<16x128xf32> -> vector<16x128xf32>
    %c0_201 = arith.constant 0 : index
    %c0_202 = arith.constant 0 : index
    %257 = vector.load %arg32[%c0_201, %c0_202] : memref<18x128xf32, #tpu.memory_space<vmem>>, vector<16x128xf32>
    %258 = arith.truncf %257 : vector<16x128xf32> to vector<16x128xbf16>
    %c1_203 = arith.constant 1 : index
    %c0_204 = arith.constant 0 : index
    %259 = vector.load %arg32[%c1_203, %c0_204] : memref<18x128xf32, #tpu.memory_space<vmem>>, vector<16x128xf32>
    %260 = arith.truncf %259 : vector<16x128xf32> to vector<16x128xbf16>
    %c2_205 = arith.constant 2 : index
    %c0_206 = arith.constant 0 : index
    %261 = vector.load %arg32[%c2_205, %c0_206] : memref<18x128xf32, #tpu.memory_space<vmem>>, vector<16x128xf32>
    %262 = arith.truncf %261 : vector<16x128xf32> to vector<16x128xbf16>
    %263 = tpu.concatenate %258, %260, %262 in 1 : vector<16x128xbf16>, vector<16x128xbf16>, vector<16x128xbf16> -> vector<16x384xbf16>
    %c0_207 = arith.constant 0 : index
    %c0_208 = arith.constant 0 : index
    %264 = vector.load %arg24[%c0_207, %c0_208] : memref<384x128xbf16, #tpu.memory_space<vmem>>, vector<384x128xbf16>
    %cst_209 = arith.constant dense<0.000000e+00> : vector<16x128xf32>
    %265 = tpu.matmul %263, %264, %cst_209 {dimension_numbers = #tpu.dot_dimension_numbers<[1], [0], [0], [1], [0, 0, 1, 1], [], []>} : vector<16x384xbf16>, vector<384x128xbf16>, vector<16x128xf32> -> vector<16x128xf32>
    %266 = arith.addf %256, %265 : vector<16x128xf32>
    %c0_210 = arith.constant 0 : index
    %c0_211 = arith.constant 0 : index
    %267 = vector.load %arg25[%c0_210, %c0_211] : memref<1x128xf32, #tpu.memory_space<vmem>>, vector<1x128xf32>
    %268 = vector.broadcast %267 : vector<1x128xf32> to vector<16x128xf32>
    %269 = arith.addf %266, %268 : vector<16x128xf32>
    %cst_212 = arith.constant 0.000000e+00 : f32
    %270 = vector.broadcast %cst_212 : f32 to vector<16x128xf32>
    %271 = arith.cmpf oge, %269, %270 : vector<16x128xf32>
    %cst_213 = arith.constant 0.00999999977 : f32
    %272 = vector.broadcast %cst_213 : f32 to vector<16x128xf32>
    %273 = arith.mulf %272, %269 : vector<16x128xf32>
    %274 = arith.select %271, %269, %273 : vector<16x128xi1>, vector<16x128xf32>
    %c1_214 = arith.constant 1 : index
    %c0_215 = arith.constant 0 : index
    %275 = vector.load %arg31[%c1_214, %c0_215] : memref<18x128xf32, #tpu.memory_space<vmem>>, vector<16x128xf32>
    tpu.vector_store %arg31[%c1_214, %c0_215], %274 {strides = array<i32>} : memref<18x128xf32, #tpu.memory_space<vmem>>, vector<16x128xf32>,
    %c0_216 = arith.constant 0 : index
    %c0_217 = arith.constant 0 : index
    %276 = vector.load %arg31[%c0_216, %c0_217] : memref<18x128xf32, #tpu.memory_space<vmem>>, vector<16x128xf32>
    %277 = arith.truncf %276 : vector<16x128xf32> to vector<16x128xbf16>
    %c1_218 = arith.constant 1 : index
    %c0_219 = arith.constant 0 : index
    %278 = vector.load %arg31[%c1_218, %c0_219] : memref<18x128xf32, #tpu.memory_space<vmem>>, vector<16x128xf32>
    %279 = arith.truncf %278 : vector<16x128xf32> to vector<16x128xbf16>
    %c2_220 = arith.constant 2 : index
    %c0_221 = arith.constant 0 : index
    %280 = vector.load %arg31[%c2_220, %c0_221] : memref<18x128xf32, #tpu.memory_space<vmem>>, vector<16x128xf32>
    %281 = arith.truncf %280 : vector<16x128xf32> to vector<16x128xbf16>
    %282 = tpu.concatenate %277, %279, %281 in 1 : vector<16x128xbf16>, vector<16x128xbf16>, vector<16x128xbf16> -> vector<16x384xbf16>
    %c0_222 = arith.constant 0 : index
    %c0_223 = arith.constant 0 : index
    %283 = vector.load %arg26[%c0_222, %c0_223] : memref<384x128xbf16, #tpu.memory_space<vmem>>, vector<384x128xbf16>
    %cst_224 = arith.constant dense<0.000000e+00> : vector<16x128xf32>
    %284 = tpu.matmul %282, %283, %cst_224 {dimension_numbers = #tpu.dot_dimension_numbers<[1], [0], [0], [1], [0, 0, 1, 1], [], []>} : vector<16x384xbf16>, vector<384x128xbf16>, vector<16x128xf32> -> vector<16x128xf32>
    %c0_225 = arith.constant 0 : index
    %c0_226 = arith.constant 0 : index
    %285 = vector.load %arg27[%c0_225, %c0_226] : memref<1x128xf32, #tpu.memory_space<vmem>>, vector<1x128xf32>
    %286 = vector.broadcast %285 : vector<1x128xf32> to vector<16x128xf32>
    %287 = arith.addf %284, %286 : vector<16x128xf32>
    %cst_227 = arith.constant 0.000000e+00 : f32
    %288 = vector.broadcast %cst_227 : f32 to vector<16x128xf32>
    %289 = arith.cmpf oge, %287, %288 : vector<16x128xf32>
    %cst_228 = arith.constant 0.00999999977 : f32
    %290 = vector.broadcast %cst_228 : f32 to vector<16x128xf32>
    %291 = arith.mulf %290, %287 : vector<16x128xf32>
    %292 = arith.select %289, %287, %291 : vector<16x128xi1>, vector<16x128xf32>
    %293 = arith.truncf %292 : vector<16x128xf32> to vector<16x128xbf16>
    %c0_229 = arith.constant 0 : index
    %c0_230 = arith.constant 0 : index
    %294 = vector.load %arg28[%c0_229, %c0_230] : memref<128x128xbf16, #tpu.memory_space<vmem>>, vector<128x128xbf16>
    %cst_231 = arith.constant dense<0.000000e+00> : vector<16x128xf32>
    %295 = tpu.matmul %293, %294, %cst_231 {dimension_numbers = #tpu.dot_dimension_numbers<[1], [0], [0], [1], [0, 0, 1, 1], [], []>} : vector<16x128xbf16>, vector<128x128xbf16>, vector<16x128xf32> -> vector<16x128xf32>
    %c0_232 = arith.constant 0 : index
    %c0_233 = arith.constant 0 : index
    %296 = vector.load %arg29[%c0_232, %c0_233] : memref<1x128xf32, #tpu.memory_space<vmem>>, vector<1x128xf32>
    %297 = vector.broadcast %296 : vector<1x128xf32> to vector<16x128xf32>
    %298 = arith.addf %295, %297 : vector<16x128xf32>
    %c0_234 = arith.constant 0 : index
    %c0_235 = arith.constant 0 : index
    %c0_236 = arith.constant 0 : index
    %299 = vector.load %arg30[%c0_234, %c0_235, %c0_236] : memref<1x16x128xf32, #tpu.memory_space<vmem>>, vector<1x16x128xf32>
    %300 = vector.shape_cast %299 : vector<1x16x128xf32> to vector<16x128xf32>
    %301 = vector.shape_cast %298 : vector<16x128xf32> to vector<1x16x128xf32>
    tpu.vector_store %arg30[%c0_234, %c0_235, %c0_236], %301 {strides = array<i32>} : memref<1x16x128xf32, #tpu.memory_space<vmem>>, vector<1x16x128xf32>,
    return
  }
  func.func @transform_0(%arg0: i32) -> (i32, i32, i32) {
    %c0_i32 = arith.constant 0 : i32
    %c0_i32_0 = arith.constant 0 : i32
    %c0_i32_1 = arith.constant 0 : i32
    return %arg0, %c0_i32, %c0_i32_0 : i32, i32, i32
  }
  func.func @transform_1(%arg0: i32) -> (i32, i32) {
    %c0_i32 = arith.constant 0 : i32
    %c0_i32_0 = arith.constant 0 : i32
    %c0_i32_1 = arith.constant 0 : i32
    return %c0_i32, %c0_i32_0 : i32, i32
  }
  func.func @transform_2(%arg0: i32) -> (i32, i32) {
    %c0_i32 = arith.constant 0 : i32
    %c0_i32_0 = arith.constant 0 : i32
    %c0_i32_1 = arith.constant 0 : i32
    return %c0_i32, %c0_i32_0 : i32, i32
  }
  func.func @transform_3(%arg0: i32) -> (i32, i32) {
    %c0_i32 = arith.constant 0 : i32
    %c0_i32_0 = arith.constant 0 : i32
    %c0_i32_1 = arith.constant 0 : i32
    return %c0_i32, %c0_i32_0 : i32, i32
  }
  func.func @transform_4(%arg0: i32) -> (i32, i32) {
    %c0_i32 = arith.constant 0 : i32
    %c0_i32_0 = arith.constant 0 : i32
    %c0_i32_1 = arith.constant 0 : i32
    return %c0_i32, %c0_i32_0 : i32, i32
  }
  func.func @transform_5(%arg0: i32) -> (i32, i32) {
    %c0_i32 = arith.constant 0 : i32
    %c0_i32_0 = arith.constant 0 : i32
    %c0_i32_1 = arith.constant 0 : i32
    return %c0_i32, %c0_i32_0 : i32, i32
  }
  func.func @transform_6(%arg0: i32) -> (i32, i32) {
    %c0_i32 = arith.constant 0 : i32
    %c0_i32_0 = arith.constant 0 : i32
    %c0_i32_1 = arith.constant 0 : i32
    return %c0_i32, %c0_i32_0 : i32, i32
  }
  func.func @transform_7(%arg0: i32) -> (i32, i32) {
    %c0_i32 = arith.constant 0 : i32
    %c0_i32_0 = arith.constant 0 : i32
    %c0_i32_1 = arith.constant 0 : i32
    return %c0_i32, %c0_i32_0 : i32, i32
  }
  func.func @transform_8(%arg0: i32) -> (i32, i32) {
    %c0_i32 = arith.constant 0 : i32
    %c0_i32_0 = arith.constant 0 : i32
    %c0_i32_1 = arith.constant 0 : i32
    return %c0_i32, %c0_i32_0 : i32, i32
  }
  func.func @transform_9(%arg0: i32) -> (i32, i32) {
    %c0_i32 = arith.constant 0 : i32
    %c0_i32_0 = arith.constant 0 : i32
    %c0_i32_1 = arith.constant 0 : i32
    return %c0_i32, %c0_i32_0 : i32, i32
  }
  func.func @transform_10(%arg0: i32) -> (i32, i32) {
    %c0_i32 = arith.constant 0 : i32
    %c0_i32_0 = arith.constant 0 : i32
    %c0_i32_1 = arith.constant 0 : i32
    return %c0_i32, %c0_i32_0 : i32, i32
  }
  func.func @transform_11(%arg0: i32) -> (i32, i32) {
    %c0_i32 = arith.constant 0 : i32
    %c0_i32_0 = arith.constant 0 : i32
    %c0_i32_1 = arith.constant 0 : i32
    return %c0_i32, %c0_i32_0 : i32, i32
  }
  func.func @transform_12(%arg0: i32) -> (i32, i32) {
    %c0_i32 = arith.constant 0 : i32
    %c0_i32_0 = arith.constant 0 : i32
    %c0_i32_1 = arith.constant 0 : i32
    return %c0_i32, %c0_i32_0 : i32, i32
  }
  func.func @transform_13(%arg0: i32) -> (i32, i32, i32) {
    %c0_i32 = arith.constant 0 : i32
    %c0_i32_0 = arith.constant 0 : i32
    %c0_i32_1 = arith.constant 0 : i32
    %c0_i32_2 = arith.constant 0 : i32
    return %c0_i32, %c0_i32_0, %c0_i32_1 : i32, i32, i32
  }
  func.func @transform_14(%arg0: i32) -> (i32, i32) {
    %c0_i32 = arith.constant 0 : i32
    %c0_i32_0 = arith.constant 0 : i32
    %c0_i32_1 = arith.constant 0 : i32
    return %c0_i32, %c0_i32_0 : i32, i32
  }
  func.func @transform_15(%arg0: i32) -> (i32, i32) {
    %c0_i32 = arith.constant 0 : i32
    %c0_i32_0 = arith.constant 0 : i32
    %c0_i32_1 = arith.constant 0 : i32
    return %c0_i32, %c0_i32_0 : i32, i32
  }
  func.func @transform_16(%arg0: i32) -> (i32, i32) {
    %c0_i32 = arith.constant 0 : i32
    %c0_i32_0 = arith.constant 0 : i32
    %c0_i32_1 = arith.constant 0 : i32
    return %c0_i32, %c0_i32_0 : i32, i32
  }
  func.func @transform_17(%arg0: i32) -> (i32, i32) {
    %c0_i32 = arith.constant 0 : i32
    %c0_i32_0 = arith.constant 0 : i32
    %c0_i32_1 = arith.constant 0 : i32
    return %c0_i32, %c0_i32_0 : i32, i32
  }
  func.func @transform_18(%arg0: i32) -> (i32, i32) {
    %c0_i32 = arith.constant 0 : i32
    %c0_i32_0 = arith.constant 0 : i32
    %c0_i32_1 = arith.constant 0 : i32
    return %c0_i32, %c0_i32_0 : i32, i32
  }
  func.func @transform_19(%arg0: i32) -> (i32, i32) {
    %c0_i32 = arith.constant 0 : i32
    %c0_i32_0 = arith.constant 0 : i32
    %c0_i32_1 = arith.constant 0 : i32
    return %c0_i32, %c0_i32_0 : i32, i32
  }
  func.func @transform_20(%arg0: i32) -> (i32, i32, i32) {
    %c0_i32 = arith.constant 0 : i32
    %c0_i32_0 = arith.constant 0 : i32
    %c0_i32_1 = arith.constant 0 : i32
    %c0_i32_2 = arith.constant 0 : i32
    return %c0_i32, %c0_i32_0, %c0_i32_1 : i32, i32, i32
  }
  func.func @transform_21(%arg0: i32) -> (i32, i32) {
    %c0_i32 = arith.constant 0 : i32
    %c0_i32_0 = arith.constant 0 : i32
    %c0_i32_1 = arith.constant 0 : i32
    return %c0_i32, %c0_i32_0 : i32, i32
  }
  func.func @transform_22(%arg0: i32) -> (i32, i32) {
    %c0_i32 = arith.constant 0 : i32
    %c0_i32_0 = arith.constant 0 : i32
    %c0_i32_1 = arith.constant 0 : i32
    return %c0_i32, %c0_i32_0 : i32, i32
  }
  func.func @transform_23(%arg0: i32) -> (i32, i32) {
    %c0_i32 = arith.constant 0 : i32
    %c0_i32_0 = arith.constant 0 : i32
    %c0_i32_1 = arith.constant 0 : i32
    return %c0_i32, %c0_i32_0 : i32, i32
  }
  func.func @transform_24(%arg0: i32) -> (i32, i32) {
    %c0_i32 = arith.constant 0 : i32
    %c0_i32_0 = arith.constant 0 : i32
    %c0_i32_1 = arith.constant 0 : i32
    return %c0_i32, %c0_i32_0 : i32, i32
  }
  func.func @transform_25(%arg0: i32) -> (i32, i32) {
    %c0_i32 = arith.constant 0 : i32
    %c0_i32_0 = arith.constant 0 : i32
    %c0_i32_1 = arith.constant 0 : i32
    return %c0_i32, %c0_i32_0 : i32, i32
  }
  func.func @transform_26(%arg0: i32) -> (i32, i32) {
    %c0_i32 = arith.constant 0 : i32
    %c0_i32_0 = arith.constant 0 : i32
    %c0_i32_1 = arith.constant 0 : i32
    return %c0_i32, %c0_i32_0 : i32, i32
  }
  func.func @transform_27(%arg0: i32) -> (i32, i32) {
    %c0_i32 = arith.constant 0 : i32
    %c0_i32_0 = arith.constant 0 : i32
    %c0_i32_1 = arith.constant 0 : i32
    return %c0_i32, %c0_i32_0 : i32, i32
  }
  func.func @transform_28(%arg0: i32) -> (i32, i32) {
    %c0_i32 = arith.constant 0 : i32
    %c0_i32_0 = arith.constant 0 : i32
    %c0_i32_1 = arith.constant 0 : i32
    return %c0_i32, %c0_i32_0 : i32, i32
  }
  func.func @transform_29(%arg0: i32) -> (i32, i32, i32) {
    %c0_i32 = arith.constant 0 : i32
    %c0_i32_0 = arith.constant 0 : i32
    %c0_i32_1 = arith.constant 0 : i32
    return %arg0, %c0_i32, %c0_i32_0 : i32, i32, i32
  }
}

</mosaic_0001>

<bundles_post_ra>
// kernel: unet_forward.1
= control target key start
LH: loop header
LB: loop body
LE: loop exit
PB: predicated region body
PF: predicated region fallthrough
CT: control target
= control target key end

     0   :  { %s8074_s6 = smov 1   ;;  %s8075_s10 = smov 2   ;;  %s8959_s0 = inlined_call_operand.smem [shape: u32[30], index: -1, kind: input, shape index: {}] }
   0x1   :  { %s8136_s5 = sld [smem:[%s8959_s0]]   ;;  %s8076_s14 = smov 3  }
   0x2   :  { %s8141_s9 = sld [smem:[%s8959_s0 + %s8074_s6]]   ;;  %s8077_s18 = smov 4  }
   0x3   :  { %s8146_s13 = sld [smem:[%s8959_s0 + %s8075_s10]]   ;;  %s8078_s22 = smov 5  }
   0x4   :  { %s8151_s17 = sld [smem:[%s8959_s0 + %s8076_s14]]   ;;  %s8079_s26 = smov 6  }
   0x5   :  { %s8156_s21 = sld [smem:[%s8959_s0 + %s8077_s18]]   ;;  %s8080_s30 = smov 7  }
   0x6   :  { %s8161_s25 = sld [smem:[%s8959_s0 + %s8078_s22]]   ;;  %s8081_s4 = smov 8  }
   0x7   :  { %8976 = sst [smem:[#allocation47_spill]] %s8136_s5  ;;  %s8082_s10 = smov 9  }
   0x8   :  { %s8166_s29 = sld [smem:[%s8959_s0 + %s8079_s26]]   ;;  %s8083_s15 = smov 10  }
   0x9   :  { %8977 = sst [smem:[#allocation48_spill]] %s8146_s13  ;;  %s8084_s20 = smov 11  }
   0xa   :  { %8978 = sst [smem:[#allocation49_spill]] %s8151_s17  ;;  %s8085_s26 = smov 12  }
   0xb   :  { %8979 = sst [smem:[#allocation50_spill]] %s8156_s21  ;;  %s8086_s1 = smov 13  }
   0xc   :  { %8980 = sst [smem:[#allocation51_spill]] %s8161_s25  ;;  %s8087_s7 = smov 14  }
   0xd   :  { %s8171_s3 = sld [smem:[%s8959_s0 + %s8080_s30]]   ;;  %s8089_s22 = smov 16  }
   0xe   :  { %8981 = sst [smem:[#allocation52_spill]] %s8166_s29  ;;  %s8090_s28 = smov 17  }
   0xf   :  { %s8176_s8 = sld [smem:[%s8959_s0 + %s8081_s4]]  }
  0x10   :  { %s8181_s14 = sld [smem:[%s8959_s0 + %s8082_s10]]  }
  0x11   :  { %s8186_s19 = sld [smem:[%s8959_s0 + %s8083_s15]]   ;;  %s8088_s15 = smov 15  }
  0x12   :  { %s8191_s24 = sld [smem:[%s8959_s0 + %s8084_s20]]  }
  0x13   :  { %8982 = sst [smem:[#allocation53_spill]] %s8171_s3 }
  0x14   :  { %s8196_s30 = sld [smem:[%s8959_s0 + %s8085_s26]]  }
  0x15   :  { %8983 = sst [smem:[#allocation54_spill]] %s8176_s8 }
  0x16   :  { %s8201_s6 = sld [smem:[%s8959_s0 + %s8086_s1]]  }
  0x17   :  { %s8206_s12 = sld [smem:[%s8959_s0 + %s8087_s7]]   ;;  %s8091_s7 = smov 18  }
  0x18   :  { %s8211_s20 = sld [smem:[%s8959_s0 + %s8088_s15]]   ;;  %s8092_s15 = smov 19  }
  0x19   :  { %s8216_s27 = sld [smem:[%s8959_s0 + %s8089_s22]]   ;;  %s8093_s22 = smov 20  }
  0x1a   :  { %s8221_s4 = sld [smem:[%s8959_s0 + %s8090_s28]]   ;;  %s8094_s28 = smov 21  }
  0x1b   :  { %s8226_s8 = sld [smem:[%s8959_s0 + %s8091_s7]]   ;;  %s8095_s7 = smov 22  }
  0x1c   :  { %8984 = sst [smem:[#allocation55_spill]] %s8201_s6 }
  0x1d   :  { %s8231_s29 = sld [smem:[%s8959_s0 + %s8092_s15]]   ;;  %s8096_s15 = smov 23  }
  0x1e   :  { %s8236_s21 = sld [smem:[%s8959_s0 + %s8093_s22]]   ;;  %s8097_s22 = smov 24  }
  0x1f   :  { %s8241_s25 = sld [smem:[%s8959_s0 + %s8094_s28]]   ;;  %s8098_s28 = smov 25  }
  0x20   :  { %8985 = sst [smem:[#allocation56_spill]] %s8221_s4 }
  0x21   :  { %s8246_s13 = sld [smem:[%s8959_s0 + %s8095_s7]]   ;;  %s8099_s7 = smov 26  }
  0x22   :  { %s8251_s17 = sld [smem:[%s8959_s0 + %s8096_s15]]   ;;  %s8100_s15 = smov 27  }
  0x23   :  { %8986 = sst [smem:[#allocation57_spill]] %s8231_s29 }
  0x24   :  { %s8256_s5 = sld [smem:[%s8959_s0 + %s8097_s22]]   ;;  %s8101_s22 = smov 28  }
  0x25   :  { %8987 = sst [smem:[#allocation58_spill]] %s8241_s25 }
  0x26   :  { %s8261_s25 = sld [smem:[%s8959_s0 + %s8098_s28]]   ;;  %s8102_s28 = smov 29  }
  0x27   :  { %8988 = sst [smem:[#allocation59_spill]] %s8246_s13 }
  0x28   :  { %s8266_s13 = sld [smem:[%s8959_s0 + %s8099_s7]]  }
  0x29   :  { %s8271_s29 = sld [smem:[%s8959_s0 + %s8100_s15]]  }
  0x2a   :  { %8989 = sst [smem:[#allocation60_spill]] %s8256_s5 }
  0x2b   :  { %s8276_s5 = sld [smem:[%s8959_s0 + %s8101_s22]]  }
  0x2c   :  { %8990 = sst [smem:[#allocation61_spill]] %s8261_s25 }
  0x2d   :  { %s8281_s25 = sld [smem:[%s8959_s0 + %s8102_s28]]  }
  0x2e   :  { %64 = vsyncpa [#allocation10], 0 }
  0x2f   :  { %65 = vsyncpa [#allocation12], 0 }
  0x30   :  { %66 = vsyncpa [#allocation15], 0 }
  0x31   :  { %67 = vsyncpa [#allocation18], 0 }
  0x32   :  { %68 = vsyncpa [#allocation21], 0 }
  0x33   :  { %69 = vsyncpa [#allocation24], 0 }
  0x34   :  { %70 = vsyncpa [#allocation27], 0 }
  0x35   :  { %71 = vsyncpa [#allocation30], 0 }
  0x36   :  { %72 = vsyncpa [#allocation33], 0 }
  0x37   :  { %73 = vsyncpa [#allocation36], 0  ;;  %s8283_s7 = smov 0  }
  0x38 LB: > { %s8991_s6 = sld [smem:[#allocation55_spill]]  ;;  %s8992_s4 = sld [smem:[#allocation56_spill]]  ;;  %s8072_s7 = sphi %s8283_s7, %s79_s7  }
  0x39   : > { %s8993_s3 = sld [smem:[#allocation53_spill]]  ;;  %8994 = sst [smem:[#allocation62_spill]] %s8072_s7 }
  0x3a   : > { %s8289_s0 = sadd.s32 4294967295, %s8072_s7   ;;  %p5832_p0 = scmp.ge.s32.totalorder %s8072_s7, 1 }
  0x3b   : > { %p724_p1 = scmp.lt.s32.totalorder %s8072_s7, 3  ;;  %p8966_p2 = scmp.eq.s32.totalorder %s8289_s0, 0 }
  0x3c   : > { %s8103_s11 = smov [#allocation11]   ;;  %s8104_s16 = smov [#allocation14]  }
  0x3d   : > { %p8294_p3 = pnand %p5832_p0, %p724_p1  ;;  %s764_s15 = sshll.u32 %s8103_s11, 4  ;;  %s8298_s15 = int_to_ptr.vmem [resolvable:$true] %s764_s15 }
  0x3e   : > { %s794_s18 = sshll.u32 %s8104_s16, 4  ;;  %s8105_s23 = smov [#allocation17]   ;;  %s8302_s18 = int_to_ptr.vmem [resolvable:$true] %s794_s18 }
  0x3f   : > { %s8995_s10 = scalar_select %p8294_p3, 1, 0 }
  0x40   : > { %p7053_p4 = pneg %p8294_p3  ;;  %s818_s26 = sshll.u32 %s8105_s23, 4  ;;  %s8310_s26 = int_to_ptr.vmem [resolvable:$true] %s818_s26 }
  0x41   : > { %s8106_s28 = smov [#allocation20]   ;;  %s7522_s2 = scalar_lea.hbm %s8993_s3, 3072 }
  0x42   : > { %p8306_p5 = pnand %p8966_p2, %p7053_p4  ;;  %s8312_s1 = sshll.u32 %s8106_s28, 4  ;;  %s843_s1 = int_to_ptr.vmem [resolvable:$true] %s8312_s1 }
  0x43   : > { %p7523_p6 = scmp.ne.s32.totalorder %s8993_s3, %s7522_s2  ;;  %p7529_p10 = scmp.lt.u32.totalorder %s7522_s2, %s8993_s3 }
  0x44   : > { %p8318_p7 = pneg %p8306_p5 }
  0x46   : > { %p7525_p8 = pnand %p8318_p7, %p7523_p6 }
  0x48   : > { %p7526_p9 = pneg %p7525_p8 }
  0x4a   : > { %p7531_p11 = pnand %p7529_p10, %p7526_p9 }
  0x4c   : > { %7534 = shalt.err (!%p7531_p11)
}
  0x4d   : > { %s7535_s16 = scalar_lea.vmem %s8298_s15, 3072  ;;  %p7543_p1 = scmp.lt.s32.totalorder %s8298_s15, %s8298_s15 }
  0x4e   : > { %p7536_p12 = scmp.ne.s32.totalorder %s8298_s15, %s7535_s16  ;;  %p7544_p4 = scmp.lt.s32.totalorder %s7535_s16, %s7535_s16 }
  0x50   : > { %p7538_p13 = pnand %p7536_p12, %p8318_p7  ;;  %p7545_p2 = por %p7544_p4, %p7543_p1 }
  0x52   : > { %p7539_p0 = pneg %p7538_p13 }
  0x54   : > { %p7546_p3 = pnand %p7545_p2, %p7539_p0 }
  0x56   : > { %7549 = shalt.err (!%p7546_p3)
}
  0x57   : > { %s8969_s23 = smov 64   ;;  %s8971_s28 = smov 4  }
  0x58   : > { %7059 = dma.hbm_to_vmem [thread:$0]  (!%p8306_p5), %s8993_s3, 3072, %s8298_s15, [#allocation12], %s8969_s23, %s8969_s23, %s8971_s28  }
  0x59   : > { %s7550_s2 = scalar_lea.hbm %s8186_s19, 16 }
  0x5a   : > { %p7551_p6 = scmp.ne.s32.totalorder %s8186_s19, %s7550_s2  ;;  %p7557_p3 = scmp.lt.u32.totalorder %s7550_s2, %s8186_s19 }
  0x5c   : > { %p7553_p8 = pnand %p7551_p6, %p8318_p7 }
  0x5e   : > { %p7554_p2 = pneg %p7553_p8 }
  0x60   : > { %p7559_p9 = pnand %p7557_p3, %p7554_p2 }
  0x62   : > { %7562 = shalt.err (!%p7559_p9)
}
  0x63   : > { %s7563_s16 = scalar_lea.vmem %s8302_s18, 16  ;;  %s7570_s7 = scalar_lea.vmem %s8302_s18, 32 }
  0x64   : > { %p7564_p10 = scmp.ne.s32.totalorder %s8302_s18, %s7563_s16  ;;  %p7571_p13 = scmp.lt.s32.totalorder %s8302_s18, %s8302_s18 }
  0x65   : > { %p7572_p0 = scmp.lt.s32.totalorder %s7570_s7, %s7563_s16 }
  0x66   : > { %p7566_p11 = pnand %p7564_p10, %p8318_p7 }
  0x67   : > { %p7573_p1 = por %p7572_p0, %p7571_p13 }
  0x68   : > { %p7567_p12 = pneg %p7566_p11 }
  0x6a   : > { %p7574_p4 = pnand %p7573_p1, %p7567_p12 }
  0x6c   : > { %7577 = shalt.err (!%p7574_p4)
}
  0x6d   : > { %7065 = dma.hbm_to_vmem [thread:$0]  (!%p8306_p5), %s8186_s19, 16, %s8302_s18, [#allocation15]  }
  0x6e   : > { %s7578_s15 = scalar_lea.hbm %s8196_s30, 16 }
  0x6f   : > { %p7579_p6 = scmp.ne.s32.totalorder %s8196_s30, %s7578_s15  ;;  %p7585_p3 = scmp.lt.u32.totalorder %s7578_s15, %s8196_s30 }
  0x71   : > { %p7581_p8 = pnand %p7579_p6, %p8318_p7 }
  0x73   : > { %p7582_p2 = pneg %p7581_p8 }
  0x75   : > { %p7587_p9 = pnand %p7585_p3, %p7582_p2 }
  0x77   : > { %7590 = shalt.err (!%p7587_p9)
}
  0x78   : > { %s7591_s7 = scalar_lea.vmem %s8310_s26, 16  ;;  %s7598_s2 = scalar_lea.vmem %s8310_s26, 32 }
  0x79   : > { %p7592_p10 = scmp.ne.s32.totalorder %s8310_s26, %s7591_s7  ;;  %p7599_p13 = scmp.lt.s32.totalorder %s8310_s26, %s8310_s26 }
  0x7a   : > { %p7600_p0 = scmp.lt.s32.totalorder %s7598_s2, %s7591_s7 }
  0x7b   : > { %p7594_p11 = pnand %p7592_p10, %p8318_p7 }
  0x7c   : > { %p7601_p1 = por %p7600_p0, %p7599_p13 }
  0x7d   : > { %p7595_p12 = pneg %p7594_p11 }
  0x7f   : > { %p7602_p4 = pnand %p7601_p1, %p7595_p12 }
  0x81   : > { %7605 = shalt.err (!%p7602_p4)
}
  0x82   : > { %7071 = dma.hbm_to_vmem [thread:$0]  (!%p8306_p5), %s8196_s30, 16, %s8310_s26, [#allocation18]  }
  0x83   : > { %s7606_s18 = scalar_lea.hbm %s8206_s12, 16 }
  0x84   : > { %p7607_p6 = scmp.ne.s32.totalorder %s8206_s12, %s7606_s18  ;;  %p7613_p3 = scmp.lt.u32.totalorder %s7606_s18, %s8206_s12 }
  0x86   : > { %p7609_p8 = pnand %p7607_p6, %p8318_p7 }
  0x88   : > { %p7610_p2 = pneg %p7609_p8 }
  0x8a   : > { %p7615_p9 = pnand %p7613_p3, %p7610_p2 }
  0x8c   : > { %7618 = shalt.err (!%p7615_p9)
}
  0x8d   : > { %s7619_s16 = scalar_lea.vmem %s843_s1, 16  ;;  %s7626_s15 = scalar_lea.vmem %s843_s1, 32 }
  0x8e   : > { %p7620_p10 = scmp.ne.s32.totalorder %s843_s1, %s7619_s16  ;;  %p7627_p13 = scmp.lt.s32.totalorder %s843_s1, %s843_s1 }
  0x8f   : > { %p7628_p0 = scmp.lt.s32.totalorder %s7626_s15, %s7619_s16 }
  0x90   : > { %p7622_p11 = pnand %p7620_p10, %p8318_p7 }
  0x91   : > { %p7629_p1 = por %p7628_p0, %p7627_p13 }
  0x92   : > { %p7623_p12 = pneg %p7622_p11 }
  0x94   : > { %p7630_p4 = pnand %p7629_p1, %p7623_p12 }
  0x96   : > { %7633 = shalt.err (!%p7630_p4)
}
  0x97   : > { %7077 = dma.hbm_to_vmem [thread:$0]  (!%p8306_p5), %s8206_s12, 16, %s843_s1, [#allocation21]  }
  0x98   : > { %s8109_s26 = smov [#allocation23]   ;;  %s8110_s2 = smov [#allocation26]  }
  0x99   : > { %s865_s7 = sshll.u32 %s8109_s26, 4  ;;  %s889_s18 = sshll.u32 %s8110_s2, 4  ;;  %s866_s7 = int_to_ptr.vmem [resolvable:$true] %s865_s7  ;;  %s890_s18 = int_to_ptr.vmem [resolvable:$true] %s889_s18 }
  0x9a   : > { %s7634_s23 = scalar_lea.hbm %s8216_s27, 3072 }
  0x9b   : > { %p7635_p6 = scmp.ne.s32.totalorder %s8216_s27, %s7634_s23  ;;  %p7641_p3 = scmp.lt.u32.totalorder %s7634_s23, %s8216_s27 }
  0x9d   : > { %p7637_p8 = pnand %p7635_p6, %p8318_p7 }
  0x9f   : > { %p7638_p2 = pneg %p7637_p8 }
  0xa1   : > { %p7643_p9 = pnand %p7641_p3, %p7638_p2 }
  0xa3   : > { %7646 = shalt.err (!%p7643_p9)
}
  0xa4   : > { %s7647_s16 = scalar_lea.vmem %s866_s7, 3072  ;;  %p7655_p13 = scmp.lt.s32.totalorder %s866_s7, %s866_s7 }
  0xa5   : > { %p7648_p10 = scmp.ne.s32.totalorder %s866_s7, %s7647_s16  ;;  %p7656_p0 = scmp.lt.s32.totalorder %s7647_s16, %s7647_s16 }
  0xa7   : > { %p7650_p11 = pnand %p7648_p10, %p8318_p7  ;;  %p7657_p1 = por %p7656_p0, %p7655_p13 }
  0xa9   : > { %p7651_p12 = pneg %p7650_p11 }
  0xab   : > { %p7658_p4 = pnand %p7657_p1, %p7651_p12 }
  0xad   : > { %7661 = shalt.err (!%p7658_p4)
}
  0xae   : > { %s8998_s1 = smov 64   ;;  %s7662_s23 = scalar_lea.hbm %s8226_s8, 3072 }
  0xaf   : > { %7083 = dma.hbm_to_vmem [thread:$0]  (!%p8306_p5), %s8216_s27, 3072, %s866_s7, [#allocation24], %s8998_s1, %s8998_s1, %s8971_s28  }
  0xb0   : > { %p7663_p6 = scmp.ne.s32.totalorder %s8226_s8, %s7662_s23  ;;  %p7669_p3 = scmp.lt.u32.totalorder %s7662_s23, %s8226_s8 }
  0xb2   : > { %p7665_p8 = pnand %p7663_p6, %p8318_p7 }
  0xb4   : > { %p7666_p2 = pneg %p7665_p8 }
  0xb6   : > { %p7671_p9 = pnand %p7669_p3, %p7666_p2 }
  0xb8   : > { %7674 = shalt.err (!%p7671_p9)
}
  0xb9   : > { %s7675_s15 = scalar_lea.vmem %s890_s18, 3072  ;;  %p7683_p13 = scmp.lt.s32.totalorder %s890_s18, %s890_s18 }
  0xba   : > { %p7676_p10 = scmp.ne.s32.totalorder %s890_s18, %s7675_s15  ;;  %p7684_p0 = scmp.lt.s32.totalorder %s7675_s15, %s7675_s15 }
  0xbc   : > { %p7678_p11 = pnand %p7676_p10, %p8318_p7  ;;  %p7685_p1 = por %p7684_p0, %p7683_p13 }
  0xbe   : > { %p7679_p12 = pneg %p7678_p11 }
  0xc0   : > { %p7686_p4 = pnand %p7685_p1, %p7679_p12 }
  0xc2   : > { %7689 = shalt.err (!%p7686_p4)
}
  0xc3   : > { %7089 = dma.hbm_to_vmem [thread:$0]  (!%p8306_p5), %s8226_s8, 3072, %s890_s18, [#allocation27], %s8998_s1, %s8998_s1, %s8971_s28  }
  0xc4   : > { %s8111_s26 = smov [#allocation29]   ;;  %s8112_s2 = smov [#allocation32]  }
  0xc5   : > { %s913_s7 = sshll.u32 %s8111_s26, 4  ;;  %s940_s16 = sshll.u32 %s8112_s2, 4  ;;  %s914_s7 = int_to_ptr.vmem [resolvable:$true] %s913_s7  ;;  %s941_s16 = int_to_ptr.vmem [resolvable:$true] %s940_s16 }
  0xc6   : > { %s7690_s23 = scalar_lea.hbm %s8236_s21, 2048 }
  0xc7   : > { %p7691_p6 = scmp.ne.s32.totalorder %s8236_s21, %s7690_s23  ;;  %p7697_p3 = scmp.lt.u32.totalorder %s7690_s23, %s8236_s21 }
  0xc9   : > { %p7693_p8 = pnand %p7691_p6, %p8318_p7 }
  0xcb   : > { %p7694_p2 = pneg %p7693_p8 }
  0xcd   : > { %p7699_p9 = pnand %p7697_p3, %p7694_p2 }
  0xcf   : > { %7702 = shalt.err (!%p7699_p9)
}
  0xd0   : > { %s7703_s15 = scalar_lea.vmem %s914_s7, 2048  ;;  %p7711_p13 = scmp.lt.s32.totalorder %s914_s7, %s914_s7 }
  0xd1   : > { %p7704_p10 = scmp.ne.s32.totalorder %s914_s7, %s7703_s15  ;;  %p7712_p0 = scmp.lt.s32.totalorder %s7703_s15, %s7703_s15 }
  0xd3   : > { %p7706_p11 = pnand %p7704_p10, %p8318_p7  ;;  %p7713_p1 = por %p7712_p0, %p7711_p13 }
  0xd5   : > { %p7707_p12 = pneg %p7706_p11 }
  0xd7   : > { %p7714_p4 = pnand %p7713_p1, %p7707_p12 }
  0xd9   : > { %7717 = shalt.err (!%p7714_p4)
}
  0xda   : > { %7095 = dma.hbm_to_vmem [thread:$0]  (!%p8306_p5), %s8236_s21, 2048, %s914_s7, [#allocation30], %s8998_s1, %s8998_s1, %s8971_s28  }
  0xdb   : > { %s7718_s18 = scalar_lea.hbm %s8251_s17, 3072 }
  0xdc   : > { %p7719_p6 = scmp.ne.s32.totalorder %s8251_s17, %s7718_s18  ;;  %p7725_p3 = scmp.lt.u32.totalorder %s7718_s18, %s8251_s17 }
  0xde   : > { %p7721_p8 = pnand %p7719_p6, %p8318_p7 }
  0xe0   : > { %p7722_p2 = pneg %p7721_p8 }
  0xe2   : > { %p7727_p9 = pnand %p7725_p3, %p7722_p2 }
  0xe4   : > { %7730 = shalt.err (!%p7727_p9)
}
  0xe5   : > { %s7731_s26 = scalar_lea.vmem %s941_s16, 3072  ;;  %p7739_p13 = scmp.lt.s32.totalorder %s941_s16, %s941_s16 }
  0xe6   : > { %p7732_p10 = scmp.ne.s32.totalorder %s941_s16, %s7731_s26  ;;  %p7740_p0 = scmp.lt.s32.totalorder %s7731_s26, %s7731_s26 }
  0xe8   : > { %p7734_p11 = pnand %p7732_p10, %p8318_p7  ;;  %p7741_p1 = por %p7740_p0, %p7739_p13 }
  0xea   : > { %p7735_p12 = pneg %p7734_p11 }
  0xec   : > { %p7742_p4 = pnand %p7741_p1, %p7735_p12 }
  0xee   : > { %7745 = shalt.err (!%p7742_p4)
}
  0xef   : > { %7101 = dma.hbm_to_vmem [thread:$0]  (!%p8306_p5), %s8251_s17, 3072, %s941_s16, [#allocation33], %s8998_s1, %s8998_s1, %s8971_s28  }
  0xf0   : > { %s8113_s7 = smov [#allocation9]   ;;  %s8114_s23 = smov [#allocation13]  }
  0xf1   : > { %s736_s2 = sshll.u32 %s8113_s7, 4  ;;  %s780_s15 = sshll.u32 %s8114_s23, 4  ;;  %s737_s2 = int_to_ptr.vmem [resolvable:$true] %s736_s2  ;;  %s781_s15 = int_to_ptr.vmem [resolvable:$true] %s780_s15 }
  0xf2   : > { %s7746_s18 = scalar_lea.hbm %s8141_s9, 1536 }
  0xf3   : > { %p7747_p6 = scmp.ne.s32.totalorder %s8141_s9, %s7746_s18  ;;  %p7753_p3 = scmp.lt.u32.totalorder %s7746_s18, %s8141_s9 }
  0xf5   : > { %p7749_p8 = pnand %p7747_p6, %p8318_p7 }
  0xf7   : > { %p7750_p2 = pneg %p7749_p8 }
  0xf9   : > { %p7755_p9 = pnand %p7753_p3, %p7750_p2 }
  0xfb   : > { %7758 = shalt.err (!%p7755_p9)
}
  0xfc   : > { %s7759_s26 = scalar_lea.vmem %s737_s2, 1536  ;;  %p7767_p13 = scmp.lt.s32.totalorder %s737_s2, %s737_s2 }
  0xfd   : > { %p7760_p10 = scmp.ne.s32.totalorder %s737_s2, %s7759_s26  ;;  %p7768_p0 = scmp.lt.s32.totalorder %s7759_s26, %s7759_s26 }
  0xff   : > { %p7762_p11 = pnand %p7760_p10, %p8318_p7  ;;  %p7769_p1 = por %p7768_p0, %p7767_p13 }
 0x101   : > { %p7763_p12 = pneg %p7762_p11 }
 0x103   : > { %p7770_p4 = pnand %p7769_p1, %p7763_p12 }
 0x105   : > { %7773 = shalt.err (!%p7770_p4)
}
 0x106   : > { %7056 = dma.hbm_to_vmem [thread:$0]  (!%p8306_p5), %s8141_s9, 1536, %s737_s2, [#allocation10], %s8998_s1, %s8998_s1, %s8971_s28  }
 0x107   : > { %s7774_s16 = scalar_lea.hbm %s8181_s14, 3072 }
 0x108   : > { %p7775_p6 = scmp.ne.s32.totalorder %s8181_s14, %s7774_s16  ;;  %p7781_p3 = scmp.lt.u32.totalorder %s7774_s16, %s8181_s14 }
 0x10a   : > { %p7777_p8 = pnand %p7775_p6, %p8318_p7 }
 0x10c   : > { %p7778_p2 = pneg %p7777_p8 }
 0x10e   : > { %p7783_p9 = pnand %p7781_p3, %p7778_p2 }
 0x110   : > { %7786 = shalt.err (!%p7783_p9)
}
 0x111   : > { %s7787_s7 = scalar_lea.vmem %s781_s15, 3072  ;;  %p7795_p13 = scmp.lt.s32.totalorder %s781_s15, %s781_s15 }
 0x112   : > { %p7788_p10 = scmp.ne.s32.totalorder %s781_s15, %s7787_s7  ;;  %p7796_p0 = scmp.lt.s32.totalorder %s7787_s7, %s7787_s7 }
 0x114   : > { %p7790_p11 = pnand %p7788_p10, %p8318_p7  ;;  %p7797_p1 = por %p7796_p0, %p7795_p13 }
 0x116   : > { %p7791_p12 = pneg %p7790_p11 }
 0x118   : > { %p7798_p4 = pnand %p7797_p1, %p7791_p12 }
 0x11a   : > { %7801 = shalt.err (!%p7798_p4)
}
 0x11b   : > { %7062 = dma.hbm_to_vmem [thread:$0]  (!%p8306_p5), %s8181_s14, 3072, %s781_s15, [#allocation12], %s8998_s1, %s8998_s1, %s8971_s28  }
 0x11c   : > { %s8115_s2 = smov [#allocation16]   ;;  %s8116_s18 = smov [#allocation19]  }
 0x11d   : > { %s804_s23 = sshll.u32 %s8115_s2, 4  ;;  %s828_s26 = sshll.u32 %s8116_s18, 4  ;;  %s805_s23 = int_to_ptr.vmem [resolvable:$true] %s804_s23  ;;  %s829_s26 = int_to_ptr.vmem [resolvable:$true] %s828_s26 }
 0x11e   : > { %s7802_s16 = scalar_lea.hbm %s8191_s24, 3072 }
 0x11f   : > { %p7803_p6 = scmp.ne.s32.totalorder %s8191_s24, %s7802_s16  ;;  %p7809_p3 = scmp.lt.u32.totalorder %s7802_s16, %s8191_s24 }
 0x121   : > { %p7805_p8 = pnand %p7803_p6, %p8318_p7 }
 0x123   : > { %p7806_p2 = pneg %p7805_p8 }
 0x125   : > { %p7811_p9 = pnand %p7809_p3, %p7806_p2 }
 0x127   : > { %7814 = shalt.err (!%p7811_p9)
}
 0x128   : > { %s7815_s7 = scalar_lea.vmem %s805_s23, 3072  ;;  %p7823_p13 = scmp.lt.s32.totalorder %s805_s23, %s805_s23 }
 0x129   : > { %p7816_p10 = scmp.ne.s32.totalorder %s805_s23, %s7815_s7  ;;  %p7824_p0 = scmp.lt.s32.totalorder %s7815_s7, %s7815_s7 }
 0x12b   : > { %p7818_p11 = pnand %p7816_p10, %p8318_p7  ;;  %p7825_p1 = por %p7824_p0, %p7823_p13 }
 0x12d   : > { %p7819_p12 = pneg %p7818_p11 }
 0x12f   : > { %p7826_p4 = pnand %p7825_p1, %p7819_p12 }
 0x131   : > { %7829 = shalt.err (!%p7826_p4)
}
 0x132   : > { %7068 = dma.hbm_to_vmem [thread:$0]  (!%p8306_p5), %s8191_s24, 3072, %s805_s23, [#allocation15], %s8998_s1, %s8998_s1, %s8971_s28  }
 0x133   : > { %s7830_s15 = scalar_lea.hbm %s8991_s6, 2048 }
 0x134   : > { %p7831_p6 = scmp.ne.s32.totalorder %s8991_s6, %s7830_s15  ;;  %p7837_p3 = scmp.lt.u32.totalorder %s7830_s15, %s8991_s6 }
 0x136   : > { %p7833_p8 = pnand %p7831_p6, %p8318_p7 }
 0x138   : > { %p7834_p2 = pneg %p7833_p8 }
 0x13a   : > { %p7839_p9 = pnand %p7837_p3, %p7834_p2 }
 0x13c   : > { %7842 = shalt.err (!%p7839_p9)
}
 0x13d   : > { %s7843_s2 = scalar_lea.vmem %s829_s26, 2048  ;;  %p7851_p13 = scmp.lt.s32.totalorder %s829_s26, %s829_s26 }
 0x13e   : > { %p7844_p10 = scmp.ne.s32.totalorder %s829_s26, %s7843_s2  ;;  %p7852_p0 = scmp.lt.s32.totalorder %s7843_s2, %s7843_s2 }
 0x140   : > { %p7846_p11 = pnand %p7844_p10, %p8318_p7  ;;  %p7853_p1 = por %p7852_p0, %p7851_p13 }
 0x142   : > { %p7847_p12 = pneg %p7846_p11 }
 0x144   : > { %p7854_p4 = pnand %p7853_p1, %p7847_p12 }
 0x146   : > { %7857 = shalt.err (!%p7854_p4)
}
 0x147   : > { %7074 = dma.hbm_to_vmem [thread:$0]  (!%p8306_p5), %s8991_s6, 2048, %s829_s26, [#allocation18], %s8998_s1, %s8998_s1, %s8971_s28  }
 0x148   : > { %s8117_s23 = smov [#allocation22]   ;;  %s8118_s16 = smov [#allocation25]  }
 0x149   : > { %s852_s18 = sshll.u32 %s8117_s23, 4  ;;  %s879_s7 = sshll.u32 %s8118_s16, 4  ;;  %s853_s18 = int_to_ptr.vmem [resolvable:$true] %s852_s18  ;;  %s880_s7 = int_to_ptr.vmem [resolvable:$true] %s879_s7 }
 0x14a   : > { %s7858_s15 = scalar_lea.hbm %s8211_s20, 3072 }
 0x14b   : > { %p7859_p6 = scmp.ne.s32.totalorder %s8211_s20, %s7858_s15  ;;  %p7865_p3 = scmp.lt.u32.totalorder %s7858_s15, %s8211_s20 }
 0x14d   : > { %p7861_p8 = pnand %p7859_p6, %p8318_p7 }
 0x14f   : > { %p7862_p2 = pneg %p7861_p8 }
 0x151   : > { %p7867_p9 = pnand %p7865_p3, %p7862_p2 }
 0x153   : > { %7870 = shalt.err (!%p7867_p9)
}
 0x154   : > { %s7871_s2 = scalar_lea.vmem %s853_s18, 3072  ;;  %p7879_p13 = scmp.lt.s32.totalorder %s853_s18, %s853_s18 }
 0x155   : > { %p7872_p10 = scmp.ne.s32.totalorder %s853_s18, %s7871_s2  ;;  %p7880_p0 = scmp.lt.s32.totalorder %s7871_s2, %s7871_s2 }
 0x157   : > { %p7874_p11 = pnand %p7872_p10, %p8318_p7  ;;  %p7881_p1 = por %p7880_p0, %p7879_p13 }
 0x159   : > { %p7875_p12 = pneg %p7874_p11 }
 0x15b   : > { %p7882_p4 = pnand %p7881_p1, %p7875_p12 }
 0x15d   : > { %7885 = shalt.err (!%p7882_p4)
}
 0x15e   : > { %7080 = dma.hbm_to_vmem [thread:$0]  (!%p8306_p5), %s8211_s20, 3072, %s853_s18, [#allocation21], %s8998_s1, %s8998_s1, %s8971_s28  }
 0x15f   : > { %s7886_s26 = scalar_lea.hbm %s8992_s4, 16 }
 0x160   : > { %p7887_p6 = scmp.ne.s32.totalorder %s8992_s4, %s7886_s26  ;;  %p7893_p3 = scmp.lt.u32.totalorder %s7886_s26, %s8992_s4 }
 0x162   : > { %p7889_p8 = pnand %p7887_p6, %p8318_p7 }
 0x164   : > { %p7890_p2 = pneg %p7889_p8 }
 0x166   : > { %p7895_p9 = pnand %p7893_p3, %p7890_p2 }
 0x168   : > { %7898 = shalt.err (!%p7895_p9)
}
 0x169   : > { %s7899_s23 = scalar_lea.vmem %s880_s7, 16  ;;  %s7906_s16 = scalar_lea.vmem %s880_s7, 32 }
 0x16a   : > { %p7900_p10 = scmp.ne.s32.totalorder %s880_s7, %s7899_s23  ;;  %p7907_p13 = scmp.lt.s32.totalorder %s880_s7, %s880_s7 }
 0x16b   : > { %p7908_p0 = scmp.lt.s32.totalorder %s7906_s16, %s7899_s23 }
 0x16c   : > { %p7902_p11 = pnand %p7900_p10, %p8318_p7 }
 0x16d   : > { %p7909_p1 = por %p7908_p0, %p7907_p13 }
 0x16e   : > { %p7903_p12 = pneg %p7902_p11 }
 0x170   : > { %p7910_p4 = pnand %p7909_p1, %p7903_p12 }
 0x172   : > { %7913 = shalt.err (!%p7910_p4)
}
 0x173   : > { %s8999_s18 = sld [smem:[#allocation57_spill]]  ;;  %s8119_s15 = smov [#allocation28]  }
 0x174   : > { %7086 = dma.hbm_to_vmem [thread:$0]  (!%p8306_p5), %s8992_s4, 16, %s880_s7, [#allocation24]  }
 0x175   : > { %s903_s2 = sshll.u32 %s8119_s15, 4  ;;  %s8120_s26 = smov [#allocation31]   ;;  %s904_s2 = int_to_ptr.vmem [resolvable:$true] %s903_s2 }
 0x176   : > { %s927_s28 = sshll.u32 %s8120_s26, 4  ;;  %s928_s28 = int_to_ptr.vmem [resolvable:$true] %s927_s28 }
 0x179   : > { %s7914_s3 = scalar_lea.hbm %s8999_s18, 16 }
 0x17a   : > { %p7915_p6 = scmp.ne.s32.totalorder %s8999_s18, %s7914_s3  ;;  %p7921_p3 = scmp.lt.u32.totalorder %s7914_s3, %s8999_s18 }
 0x17c   : > { %p7917_p8 = pnand %p7915_p6, %p8318_p7 }
 0x17e   : > { %p7918_p2 = pneg %p7917_p8 }
 0x180   : > { %p7923_p9 = pnand %p7921_p3, %p7918_p2 }
 0x182   : > { %7926 = shalt.err (!%p7923_p9)
}
 0x183   : > { %s7927_s23 = scalar_lea.vmem %s904_s2, 16  ;;  %s7934_s7 = scalar_lea.vmem %s904_s2, 32 }
 0x184   : > { %p7928_p10 = scmp.ne.s32.totalorder %s904_s2, %s7927_s23  ;;  %p7935_p13 = scmp.lt.s32.totalorder %s904_s2, %s904_s2 }
 0x185   : > { %p7936_p0 = scmp.lt.s32.totalorder %s7934_s7, %s7927_s23 }
 0x186   : > { %p7930_p11 = pnand %p7928_p10, %p8318_p7 }
 0x187   : > { %p7937_p1 = por %p7936_p0, %p7935_p13 }
 0x188   : > { %p7931_p12 = pneg %p7930_p11 }
 0x18a   : > { %p7938_p4 = pnand %p7937_p1, %p7931_p12 }
 0x18c   : > { %7941 = shalt.err (!%p7938_p4)
}
 0x18d   : > { %s9000_s16 = sld [smem:[#allocation58_spill]] }
 0x18e   : > { %7092 = dma.hbm_to_vmem [thread:$0]  (!%p8306_p5), %s8999_s18, 16, %s904_s2, [#allocation27]  }
 0x193   : > { %s7942_s3 = scalar_lea.hbm %s9000_s16, 16 }
 0x194   : > { %p7943_p6 = scmp.ne.s32.totalorder %s9000_s16, %s7942_s3  ;;  %p7949_p3 = scmp.lt.u32.totalorder %s7942_s3, %s9000_s16 }
 0x196   : > { %p7945_p8 = pnand %p7943_p6, %p8318_p7 }
 0x198   : > { %p7946_p2 = pneg %p7945_p8 }
 0x19a   : > { %p7951_p9 = pnand %p7949_p3, %p7946_p2 }
 0x19c   : > { %7954 = shalt.err (!%p7951_p9)
}
 0x19d   : > { %s7955_s15 = scalar_lea.vmem %s928_s28, 16  ;;  %s7962_s26 = scalar_lea.vmem %s928_s28, 32 }
 0x19e   : > { %p7956_p10 = scmp.ne.s32.totalorder %s928_s28, %s7955_s15  ;;  %p7963_p13 = scmp.lt.s32.totalorder %s928_s28, %s928_s28 }
 0x19f   : > { %p7964_p0 = scmp.lt.s32.totalorder %s7962_s26, %s7955_s15 }
 0x1a0   : > { %p7958_p11 = pnand %p7956_p10, %p8318_p7 }
 0x1a1   : > { %p7965_p1 = por %p7964_p0, %p7963_p13 }
 0x1a2   : > { %p7959_p12 = pneg %p7958_p11 }
 0x1a4   : > { %p7966_p4 = pnand %p7965_p1, %p7959_p12 }
 0x1a6   : > { %7969 = shalt.err (!%p7966_p4)
}
 0x1a7   : > { %s9001_s2 = sld [smem:[#allocation61_spill]]  ;;  %s8121_s23 = smov [#allocation34]  }
 0x1a8   : > { %7098 = dma.hbm_to_vmem [thread:$0]  (!%p8306_p5), %s9000_s16, 16, %s928_s28, [#allocation30]  }
 0x1a9   : > { %s956_s7 = sshll.u32 %s8121_s23, 4  ;;  %s8122_s3 = smov [#allocation35]   ;;  %s957_s7 = int_to_ptr.vmem [resolvable:$true] %s956_s7 }
 0x1aa   : > { %s972_s4 = sshll.u32 %s8122_s3, 4  ;;  %s973_s4 = int_to_ptr.vmem [resolvable:$true] %s972_s4 }
 0x1ad   : > { %s7970_s6 = scalar_lea.hbm %s9001_s2, 3072 }
 0x1ae   : > { %p7971_p6 = scmp.ne.s32.totalorder %s9001_s2, %s7970_s6  ;;  %p7977_p3 = scmp.lt.u32.totalorder %s7970_s6, %s9001_s2 }
 0x1b0   : > { %p7973_p8 = pnand %p7971_p6, %p8318_p7 }
 0x1b2   : > { %p7974_p2 = pneg %p7973_p8 }
 0x1b4   : > { %p7979_p9 = pnand %p7977_p3, %p7974_p2 }
 0x1b6   : > { %7982 = shalt.err (!%p7979_p9)
}
 0x1b7   : > { %s7983_s15 = scalar_lea.vmem %s957_s7, 3072  ;;  %p7991_p13 = scmp.lt.s32.totalorder %s957_s7, %s957_s7 }
 0x1b8   : > { %p7984_p10 = scmp.ne.s32.totalorder %s957_s7, %s7983_s15  ;;  %p7992_p0 = scmp.lt.s32.totalorder %s7983_s15, %s7983_s15 }
 0x1ba   : > { %p7986_p11 = pnand %p7984_p10, %p8318_p7  ;;  %p7993_p1 = por %p7992_p0, %p7991_p13 }
 0x1bc   : > { %p7987_p12 = pneg %p7986_p11 }
 0x1be   : > { %p7994_p4 = pnand %p7993_p1, %p7987_p12 }
 0x1c0   : > { %7997 = shalt.err (!%p7994_p4)
}
 0x1c1   : > { %s9002_s28 = smov 4   ;;  %s7998_s6 = scalar_lea.hbm %s8271_s29, 1024 }
 0x1c2   : > { %7104 = dma.hbm_to_vmem [thread:$0]  (!%p8306_p5), %s9001_s2, 3072, %s957_s7, [#allocation33], %s8998_s1, %s8998_s1, %s9002_s28  }
 0x1c3   : > { %p7999_p6 = scmp.ne.s32.totalorder %s8271_s29, %s7998_s6  ;;  %p8005_p3 = scmp.lt.u32.totalorder %s7998_s6, %s8271_s29 }
 0x1c5   : > { %p8001_p8 = pnand %p7999_p6, %p8318_p7 }
 0x1c7   : > { %p8002_p2 = pneg %p8001_p8 }
 0x1c9   : > { %p8007_p9 = pnand %p8005_p3, %p8002_p2 }
 0x1cb   : > { %8010 = shalt.err (!%p8007_p9)
}
 0x1cc   : > { %s8011_s26 = scalar_lea.vmem %s973_s4, 1024  ;;  %p8019_p13 = scmp.lt.s32.totalorder %s973_s4, %s973_s4 }
 0x1cd   : > { %p8012_p10 = scmp.ne.s32.totalorder %s973_s4, %s8011_s26  ;;  %p8020_p0 = scmp.lt.s32.totalorder %s8011_s26, %s8011_s26 }
 0x1cf   : > { %p8014_p11 = pnand %p8012_p10, %p8318_p7  ;;  %p8021_p1 = por %p8020_p0, %p8019_p13 }
 0x1d1   : > { %p8015_p12 = pneg %p8014_p11 }
 0x1d3   : > { %p8022_p4 = pnand %p8021_p1, %p8015_p12 }
 0x1d5   : > { %8025 = shalt.err (!%p8022_p4)
}
 0x1d6   : > { %7107 = dma.hbm_to_vmem [thread:$0]  (!%p8306_p5), %s8271_s29, 1024, %s973_s4, [#allocation36], %s8998_s1, %s8998_s1, %s9002_s28  }
 0x1d7   : > { %p9003_p6 = scmp.ne.s32.totalorder %s8995_s10, 0 }
 0x1d8   : > { %p9004_p8 = scmp.eq.s32.totalorder (!%p9003_p6), %s8289_s0, 0 }
 0x1d9   : > { %999 = sbr.rel (%p9003_p6) target bundleno = 4513 (0x11a1), region = 136 }
 0x1e0   : > { %8031 = dma.done.wait (%p9004_p8), [#allocation10], 1536   ;;  %p9005_p7 = pmov %p9004_p8 }
 0x1e2   : > { %8033 = vsyncadd (%p9005_p7), [#allocation10], 4294965760  ;;  %p9006_p2 = pmov %p9005_p7 }
 0x1e4   : > { %8035 = dma.done.wait (%p9006_p2), [#allocation12], 6144   ;;  %p9007_p3 = pmov %p9006_p2 }
 0x1e5   : > { %p9008_p9 = pmov %p9006_p2 }
 0x1e6   : > { %8037 = vsyncadd (%p9007_p3), [#allocation12], 4294961152 }
 0x1e7   : > { %8039 = dma.done.wait (%p9008_p9), [#allocation15], 3088   ;;  %p9009_p5 = pmov %p9006_p2 }
 0x1e8   : > { %p9010_p10 = pmov %p9006_p2 }
 0x1e9   : > { %8041 = vsyncadd (%p9009_p5), [#allocation15], 4294964208 }
 0x1ea   : > { %8043 = dma.done.wait (%p9010_p10), [#allocation18], 2064   ;;  %p9011_p11 = pmov %p9006_p2 }
 0x1eb   : > { %p9012_p12 = pmov %p9006_p2 }
 0x1ec   : > { %8045 = vsyncadd (%p9011_p11), [#allocation18], 4294965232 }
 0x1ed   : > { %8047 = dma.done.wait (%p9012_p12), [#allocation21], 3088   ;;  %p9013_p13 = pmov %p9006_p2 }
 0x1ee   : > { %p9014_p0 = pmov %p9006_p2 }
 0x1ef   : > { %8049 = vsyncadd (%p9013_p13), [#allocation21], 4294964208 }
 0x1f0   : > { %8051 = dma.done.wait (%p9014_p0), [#allocation24], 3088   ;;  %p9015_p1 = pmov %p9014_p0 }
 0x1f1   : > { %p9016_p4 = pmov %p9014_p0 }
 0x1f2   : > { %8053 = vsyncadd (%p9015_p1), [#allocation24], 4294964208 }
 0x1f3   : > { %8055 = dma.done.wait (%p9016_p4), [#allocation27], 3088   ;;  %p9017_p6 = pmov %p9014_p0 }
 0x1f4   : > { %p9018_p8 = pmov %p9014_p0 }
 0x1f5   : > { %8057 = vsyncadd (%p9017_p6), [#allocation27], 4294964208 }
 0x1f6   : > { %8059 = dma.done.wait (%p9018_p8), [#allocation30], 2064   ;;  %p9019_p7 = pmov %p9014_p0 }
 0x1f7   : > { %p9020_p2 = pmov %p9014_p0 }
 0x1f8   : > { %8061 = vsyncadd (%p9019_p7), [#allocation30], 4294965232 }
 0x1f9   : > { %8063 = dma.done.wait (%p9020_p2), [#allocation33], 6144   ;;  %p9021_p3 = pmov %p9014_p0 }
 0x1fa   : > { %p9022_p9 = pmov %p9014_p0 }
 0x1fb   : > { %8065 = vsyncadd (%p9021_p3), [#allocation33], 4294961152 }
 0x1fc   : > { %8067 = dma.done.wait (%p9022_p9), [#allocation36], 1024   ;;  %p9023_p5 = pmov %p9014_p0 }
 0x1fd   : > { %s9024_s4 = sld [smem:[#allocation47_spill]]  ;;  %p1143_p10 = scmp.lt.s32.totalorder %s8289_s0, 1  ;;  %v8123_v0 = vmov 0   ;;  %v7206_v4 = vld [vmem:[#allocation9] sm:$0xff]   ;;  %v7207_v5 = vld [vmem:[#allocation9 + $0x8] sm:$0xff]   ;;  %v7208_v6 = vld [vmem:[#allocation9 + $0x10] sm:$0xff]  }
 0x1fe   : > { %8069 = vsyncadd (%p9023_p5), [#allocation36], 4294966272  ;;  %1291 = vmatprep.subr.bf16.mxu0 %v8123_v0  ;;  %s8124_s11 = smov 64   ;;  %s9025_s1 = sld [smem:[#allocation49_spill]]  ;;  %v7209_v7 = vld [vmem:[#allocation9 + $0x18] sm:$0xff]   ;;  %v7210_v9 = vld [vmem:[#allocation9 + $0x20] sm:$0xff]  }
 0x1ff   : > { %s9036_s0 = smov (!%p1143_p10, %s8289_s0), 1  ;;  %1292 = vmatpush1.bf16.msra.mxu0 %v7206_v4  ;;  %vm1180_vm0 = vcmask 523264   ;;  %v7211_v15 = vld [vmem:[#allocation9 + $0x28] sm:$0xff]   ;;  %v7212_v18 = vld [vmem:[#allocation9 + $0x30] sm:$0xff]   ;;  %v7213_v22 = vld [vmem:[#allocation9 + $0x38] sm:$0xff]   ;;  %v8125_v36 = vmov 0.0  }
 0x200   : > { %s6980_s10 = smul.u32 24, %s9036_s0  ;;  %1293 = vmatprep.subr.bf16.mxu0 %v8123_v0  ;;  %v7214_v23 = vld [vmem:[#allocation9 + $0x40] sm:$0xff]   ;;  %v7215_v24 = vld [vmem:[#allocation9 + $0x48] sm:$0xff]   ;;  %v7216_v25 = vld [vmem:[#allocation9 + $0x50] sm:$0xff]   ;;  %1154 = vst [vmem:[#allocation2] sm:$0x1] %v8125_v36 }
 0x201   : > { %v7217_v26 = vld [vmem:[#allocation9 + $0x58] sm:$0xff]   ;;  %1155 = vst [vmem:[#allocation2 + $0x11] sm:$0x1] %v8125_v36  ;;  %1156 = vst [vmem:[#allocation3] sm:$0x1] %v8125_v36  ;;  %s9026_s23 = sld [smem:[#allocation48_spill]] }
 0x202   : > { %1157 = vst [vmem:[#allocation3 + $0x11] sm:$0x1] %v8125_v36  ;;  %1158 = vst [vmem:[#allocation4] sm:$0x1] %v8125_v36  ;;  %vm8126_vm3 = vmmov 0   ;;  %s9027_s7 = sld [smem:[#allocation51_spill]] }
 0x203   : > { %s8603_s22 = scalar_lea.vmem %s9024_s4, %s6980_s10  ;;  %1294 = vmatpush1.bf16.msra.mxu0 %v7207_v5  ;;  %1159 = vst [vmem:[#allocation4 + $0x11] sm:$0x1] %v8125_v36  ;;  %1160 = vst [vmem:[#allocation5] sm:$0x1] %v8125_v36  ;;  %s9029_s15 = sld [smem:[#allocation50_spill]]  ;;  %vm1936_vm7 = vcmask 130048  }
 0x204   : > { %v1171_v1 = vld [vmem:[%s8603_s22 + $0x1] sm:$0xff]  ;;  %v1172_v2 = vld [vmem:[%s8603_s22 + $0x9] sm:$0xff]  ;;  %1295 = vmatprep.subr.bf16.mxu0 %v8123_v0  ;;  %v7224_v20 = vld [vmem:[%s9025_s1 + $0x58] sm:$0xff]   ;;  %1161 = vst [vmem:[#allocation5 + $0x9] sm:$0x1] %v8125_v36  ;;  %s9030_s28 = sld [smem:[#allocation52_spill]] }
 0x205   : > { %v1173_v3 = vpack.c.bf16 %v1172_v2, %v1171_v1  ;;  %v1174_v8 = vld [vmem:[%s8603_s22 + $0x2] sm:$0xff]  ;;  %v1175_v10 = vld [vmem:[%s8603_s22 + $0xa] sm:$0xff]  ;;  %v7225_v21 = vld [vmem:[%s9025_s1 + $0x18] sm:$0xff]   ;;  %1162 = vst [vmem:[#allocation6] sm:$0x1] %v8125_v36  ;;  %s9031_s6 = sld [smem:[#allocation54_spill]] }
 0x206   : > { %v1176_v11 = vpack.c.bf16 %v1175_v10, %v1174_v8  ;;  %v7218_v12 = vld [vmem:[%s9025_s1 + $0x40] sm:$0xff]   ;;  %v7220_v14 = vld [vmem:[%s9025_s1 + $0x48] sm:$0xff]   ;;  %v7222_v17 = vld [vmem:[%s9025_s1 + $0x50] sm:$0xff]   ;;  %1163 = vst [vmem:[#allocation6 + $0x9] sm:$0x1] %v8125_v36  ;;  %vm2588_vm10 = vcmask 64512  }
 0x207   : > { %1178 = vrot.lane.b32.xlu0 %v1173_v3, %s8124_s11  ;;  %1296 = vmatpush1.bf16.msra.mxu0 %v7208_v6  ;;  %v7219_v13 = vld [vmem:[%s9025_s1] sm:$0xff]   ;;  %v7221_v16 = vld [vmem:[%s9025_s1 + $0x8] sm:$0xff]   ;;  %v7223_v19 = vld [vmem:[%s9025_s1 + $0x10] sm:$0xff]   ;;  %1164 = vst [vmem:[#allocation7] sm:$0x1] %v8125_v36  ;;  %vm3175_vm14 = vcmask 1043456  }
 0x208   : > { %1297 = vmatprep.subr.bf16.mxu0 %v8123_v0  ;;  %5887 = vmatprep.mubr.msk.bf16.mxu0 %vm1180_vm0, %v1176_v11  ;;  %v1168_v27 = vld [vmem:[%s8603_s22] sm:$0xff]  ;;  %v1169_v28 = vld [vmem:[%s8603_s22 + $0x8] sm:$0xff]  ;;  %1165 = vst [vmem:[#allocation7 + $0x9] sm:$0x1] %v8125_v36  ;;  %1166 = vst [vmem:[#allocation8] sm:$0x1] %v8125_v36  ;;  %s9028_s3 = smov %s9027_s7 }
 0x209   : > { %6222 = vmatprep.subr.bf16.mxu1 %v7218_v12  ;;  %v1170_v29 = vpack.c.bf16 %v1169_v28, %v1168_v27  ;;  %v7226_v32 = vld [vmem:[%s9025_s1 + $0x60] sm:$0xff]   ;;  %v7228_v34 = vld [vmem:[%s9025_s1 + $0x68] sm:$0xff]   ;;  %1167 = vst [vmem:[#allocation8 + $0x5] sm:$0x1] %v8125_v36  ;;  %v7230_v37 = vld [vmem:[%s9025_s1 + $0x70] sm:$0xff]   ;;  %vm3171_vm15 = vcmask 31744  }
 0x20a   : > { %6223 = vmatpush3.bf16.msra.mxu1 %v7219_v13  ;;  %v7227_v33 = vld [vmem:[%s9025_s1 + $0x20] sm:$0xff]   ;;  %v7229_v35 = vld [vmem:[%s9025_s1 + $0x28] sm:$0xff]   ;;  %v7231_v38 = vld [vmem:[%s9025_s1 + $0x30] sm:$0xff]   ;;  %s9032_s26 = sld [smem:[#allocation59_spill]]  ;;  %s9033_s4 = sld [smem:[#allocation60_spill]] }
 0x20b   : > { %1298 = vmatpush1.bf16.msra.mxu0 %v7209_v7  ;;  %6224 = vmatprep.subr.bf16.mxu1 %v7220_v14  ;;  %v7232_v39 = vld [vmem:[%s9025_s1 + $0x78] sm:$0xff]   ;;  %v5874_v41 = vld [vmem:[%s9026_s23] ss:$0 sm:$0xff]  ;;  %v7235_v57 = vld [vmem:[%s9025_s1 + $0x88] sm:$0xff]   ;;  %s6221_s10 = sshll.u32 %s9036_s0, 4 }
 0x20c   : > { %1299 = vmatprep.subr.bf16.mxu0 %v8123_v0  ;;  %v7233_v40 = vld [vmem:[%s9025_s1 + $0x38] sm:$0xff]   ;;  %v7234_v55 = vld [vmem:[%s9025_s1 + $0x80] sm:$0xff]   ;;  %v7236_v58 = vld [vmem:[%s9025_s1 + $0x90] sm:$0xff]   ;;  %s1152_s22 = scalar_lea.vmem %s8281_s25, %s6221_s10 }
 0x20d   : > { %v7237_v59 = vld [vmem:[%s9025_s1 + $0x98] sm:$0xff]   ;;  %v7238_v60 = vld [vmem:[%s9025_s1 + $0xa0] sm:$0xff]   ;;  %v7239_v61 = vld [vmem:[%s9025_s1 + $0xa8] sm:$0xff]  }
 0x20e   : > { %6225 = vmatpush3.bf16.msra.mxu1 %v7221_v16  ;;  %v7240_v62 = vld [vmem:[%s9025_s1 + $0xb0] sm:$0xff]   ;;  %v7241_v63 = vld [vmem:[%s9025_s1 + $0xb8] sm:$0xff]   ;;  %v7242_v3 = vld [vmem:[%s9027_s7 + $0x40] sm:$0xff]  }
 0x20f   : > { %1300 = vmatpush1.bf16.msra.mxu0 %v7210_v9  ;;  %6226 = vmatprep.subr.bf16.mxu1 %v7222_v17  ;;  %v7243_v4 = vld [vmem:[%s9028_s3 + $0x80] sm:$0xff]   ;;  %v7245_v6 = vld [vmem:[%s9028_s3 + $0x48] sm:$0xff]   ;;  %v7248_v9 = vld [vmem:[%s9028_s3 + $0x50] sm:$0xff]  }
 0x210   : > { %1301 = vmatprep.subr.bf16.mxu0 %v8123_v0  ;;  %v7244_v5 = vld [vmem:[%s9028_s3] sm:$0xff]   ;;  %v7246_v7 = vld [vmem:[%s9028_s3 + $0x88] sm:$0xff]   ;;  %v7249_v10 = vld [vmem:[%s9028_s3 + $0x90] sm:$0xff]  }
 0x211   : > { %v7247_v8 = vld [vmem:[%s9028_s3 + $0x8] sm:$0xff]   ;;  %v7250_v11 = vld [vmem:[%s9028_s3 + $0x10] sm:$0xff]   ;;  %v7251_v12 = vld [vmem:[%s9028_s3 + $0x58] sm:$0xff]  }
 0x212   : > { %6227 = vmatpush3.bf16.msra.mxu1 %v7223_v19  ;;  %v7252_v13 = vld [vmem:[%s9028_s3 + $0x98] sm:$0xff]   ;;  %v7255_v16 = vld [vmem:[%s9028_s3 + $0xa0] sm:$0xff]   ;;  %v7258_v19 = vld [vmem:[%s9028_s3 + $0xa8] sm:$0xff]  }
 0x213   : > { %1302 = vmatpush1.bf16.msra.mxu0 %v7211_v15  ;;  %6228 = vmatprep.subr.bf16.mxu1 %v7224_v20  ;;  %v7253_v14 = vld [vmem:[%s9028_s3 + $0x18] sm:$0xff]   ;;  %v7254_v15 = vld [vmem:[%s9028_s3 + $0x60] sm:$0xff]   ;;  %v7259_v20 = vld [vmem:[%s9028_s3 + $0x28] sm:$0xff]  }
 0x214   : > { %1303 = vmatprep.subr.bf16.mxu0 %v8123_v0  ;;  %v7256_v17 = vld [vmem:[%s9028_s3 + $0x20] sm:$0xff]  }
 0x216   : > { %6229 = vmatpush3.bf16.msra.mxu1 %v7225_v21  ;;  %v7260_v21 = vld [vmem:[%s9028_s3 + $0x70] sm:$0xff]  }
 0x217   : > { %1304 = vmatpush1.bf16.msra.mxu0 %v7212_v18  ;;  %6230 = vmatprep.subr.bf16.mxu1 %v7226_v32  ;;  %v7257_v18 = vld [vmem:[%s9028_s3 + $0x68] sm:$0xff]  }
 0x218   : > { %1305 = vmatprep.subr.bf16.mxu0 %v8123_v0 }
 0x21a   : > { %6231 = vmatpush3.bf16.msra.mxu1 %v7227_v33  ;;  %v5888_v33 = vld [vmem:[%s9029_s15] ss:$0 sm:$0xff] }
 0x21b   : > { %1306 = vmatpush1.bf16.msra.mxu0 %v7213_v22  ;;  %6232 = vmatprep.subr.bf16.mxu1 %v7228_v34  ;;  %v7261_v22 = vld [vmem:[%s9028_s3 + $0xb0] sm:$0xff]  }
 0x21c   : > { %1307 = vmatprep.subr.bf16.mxu0 %v8123_v0 }
 0x21e   : > { %6233 = vmatpush3.bf16.msra.mxu1 %v7229_v35 }
 0x21f   : > { %1308 = vmatpush1.bf16.msra.mxu0 %v7214_v23  ;;  %6234 = vmatprep.subr.bf16.mxu1 %v7230_v37  ;;  %v7262_v23 = vld [vmem:[%s9028_s3 + $0x30] sm:$0xff]  }
 0x220   : > { %1309 = vmatprep.subr.bf16.mxu0 %v8123_v0 }
 0x222   : > { %6235 = vmatpush3.bf16.msra.mxu1 %v7231_v38 }
 0x223   : > { %1310 = vmatpush1.bf16.msra.mxu0 %v7215_v24  ;;  %6236 = vmatprep.subr.bf16.mxu1 %v7232_v39  ;;  %v7263_v24 = vld [vmem:[%s9028_s3 + $0x78] sm:$0xff]  }
 0x224   : > { %1311 = vmatprep.subr.bf16.mxu0 %v8123_v0 }
 0x226   : > { %6237 = vmatpush3.bf16.msra.mxu1 %v7233_v40 }
 0x227   : > { %1312 = vmatpush1.bf16.msra.mxu0 %v7216_v25  ;;  %6623 = vmatprep.subr.bf16.mxu1 %v8125_v36  ;;  %v7264_v25 = vld [vmem:[%s9028_s3 + $0xb8] sm:$0xff]  }
 0x228   : > { %1313 = vmatprep.subr.bf16.mxu0 %v8123_v0 }
 0x22b   : > { %1314 = vmatpush1.bf16.msra.mxu0 %v7217_v26  ;;  %v7265_v26 = vld [vmem:[%s9028_s3 + $0x38] sm:$0xff]  }
 0x22c   : > { %6253 = vmatprep.subr.bf16.mxu0 %v7242_v3 }
 0x279   : > { %v1179_v30 = vpop.permute.xlu0 %1178 }
 0x27a   : > { %v1183_v31 = vsel %vm1180_vm0, %v1170_v29, %v1179_v30 }
 0x27b   : > { %1324 = vmatmul.mubr.bf16.vlgmr.msra.gmra.mrb[0].mxu0 %v1183_v31 }
 0x27c   : > { %6254 = vmatpush3.bf16.msra.mxu0 %v7244_v5 }
 0x27d   : > { %6255 = vmatprep.subr.bf16.mxu0 %v7245_v6 }
 0x280   : > { %6256 = vmatpush3.bf16.msra.mxu0 %v7247_v8 }
 0x281   : > { %6257 = vmatprep.subr.bf16.mxu0 %v7248_v9 }
 0x284   : > { %6258 = vmatpush3.bf16.msra.mxu0 %v7250_v11  ;;  %v7266_v11 = vld [vmem:[#allocation11 + $0x40] sm:$0xff]  }
 0x285   : > { %6259 = vmatprep.subr.bf16.mxu0 %v7251_v12 }
 0x288   : > { %6260 = vmatpush3.bf16.msra.mxu0 %v7253_v14  ;;  %v7268_v14 = vld [vmem:[#allocation11] sm:$0xff]  }
 0x289   : > { %6261 = vmatprep.subr.bf16.mxu0 %v7254_v15  ;;  %v7269_v15 = vld [vmem:[#allocation11 + $0x48] sm:$0xff]  }
 0x28c   : > { %6262 = vmatpush3.bf16.msra.mxu0 %v7256_v17  ;;  %v7272_v17 = vld [vmem:[#allocation11 + $0x50] sm:$0xff]  }
 0x28d   : > { %6263 = vmatprep.subr.bf16.mxu0 %v7257_v18  ;;  %v7274_v18 = vld [vmem:[#allocation11 + $0x10] sm:$0xff]  }
 0x290   : > { %6264 = vmatpush3.bf16.msra.mxu0 %v7259_v20  ;;  %v7277_v20 = vld [vmem:[#allocation11 + $0x18] sm:$0xff]  }
 0x291   : > { %6265 = vmatprep.subr.bf16.mxu0 %v7260_v21  ;;  %v7278_v21 = vld [vmem:[#allocation11 + $0x60] sm:$0xff]  }
 0x294   : > { %6266 = vmatpush3.bf16.msra.mxu0 %v7262_v23  ;;  %v7280_v23 = vld [vmem:[#allocation11 + $0x20] sm:$0xff]  }
 0x295   : > { %6267 = vmatprep.subr.bf16.mxu0 %v7263_v24  ;;  %v7281_v24 = vld [vmem:[#allocation11 + $0x68] sm:$0xff]  }
 0x298   : > { %6268 = vmatpush3.bf16.msra.mxu0 %v7265_v26  ;;  %v7283_v26 = vld [vmem:[#allocation11 + $0x28] sm:$0xff]  }
 0x34e   : > { %v1325_v42 = vpop.f32.mrb[0].mxu0 }
 0x34f   : > { %v1326_v43 = vadd.f32 %v5874_v41, %v1325_v42  ;;  %v1327_v44 = vpop.f32.mrb[1].mxu0 }
 0x350   : > { %v1328_v45 = vpop.f32.mrb[2].mxu0 }
 0x351   : > { %vm1332_vm1 = vcmp.ge.f32.partialorder %v1326_v43, 0.0  ;;  %v1334_v46 = vmul.f32 0.01, %v1326_v43  ;;  %v1329_v47 = vadd.f32 %v5874_v41, %v1328_v45  ;;  %v1330_v48 = vpop.f32.mrb[3].mxu0 }
 0x353   : > { %v1336_v49 = vsel %vm1332_vm1, %v1326_v43, %v1334_v46  ;;  %vm1333_vm2 = vcmp.ge.f32.partialorder %v1329_v47, 0.0  ;;  %v1335_v50 = vmul.f32 0.01, %v1329_v47 }
 0x354   : > { %1338 = vst [vmem:[#allocation2 + $0x1] sm:$0xff] %v1336_v49 }
 0x355   : > { %v1337_v51 = vsel %vm1333_vm2, %v1329_v47, %v1335_v50 }
 0x356   : > { %1339 = vst [vmem:[#allocation2 + $0x9] sm:$0xff] %v1337_v51  ;;  %v1345_v52 = vpack.c.bf16 %v1337_v51, %v1336_v49 }
 0x358   : > { %1580 = vmatprep.mubr.bf16.mxu1 %v1345_v52 }
 0x35b   : > { %v1340_v53 = vld [vmem:[#allocation2] sm:$0xff] }
 0x35d   : > { %v1341_v54 = vld [vmem:[#allocation2 + $0x8] sm:$0xff] }
 0x35e   : > { %v1342_v56 = vpack.c.bf16 %v1341_v54, %v1340_v53  ;;  %v1346_v0 = vld [vmem:[#allocation2 + $0x2] sm:$0xff]  ;;  %v1347_v1 = vld [vmem:[#allocation2 + $0xa] sm:$0xff]  ;;  %v8127_v54 = vmov 0.0|0.0  }
 0x35f   : > { %v1348_v2 = vpack.c.bf16 %v1347_v1, %v1346_v0  ;;  %6975 = vmatprep.subr.bf16.mxu0 %v8127_v54  ;;  %v7299_v54 = vld [vmem:[#allocation13 + $0x58] sm:$0xff]  }
 0x360   : > { %1581 = vmatmul.mubr.bf16.vlgmr.msra.gmra.mrb[0].mxu1 %v1342_v56  ;;  %v7270_v56 = vld [vmem:[#allocation11 + $0x88] sm:$0xff]  }
 0x361   : > { %6624 = vmatpush3.bf16.msra.mxu1 %v7234_v55  ;;  %6639 = vmatprep.mubr.msk.bf16.mxu1 %vm8126_vm3, %v8125_v36  ;;  %v7267_v55 = vld [vmem:[#allocation11 + $0x80] sm:$0xff]  }
 0x362   : > { %6625 = vmatprep.subr.bf16.mxu1 %v8125_v36 }
 0x365   : > { %6626 = vmatpush3.bf16.msra.mxu1 %v7235_v57  ;;  %v7273_v57 = vld [vmem:[#allocation11 + $0x90] sm:$0xff]  }
 0x366   : > { %6627 = vmatprep.subr.bf16.mxu1 %v8125_v36 }
 0x369   : > { %6628 = vmatpush3.bf16.msra.mxu1 %v7236_v58  ;;  %v7276_v58 = vld [vmem:[#allocation11 + $0x98] sm:$0xff]  }
 0x36a   : > { %6629 = vmatprep.subr.bf16.mxu1 %v8125_v36 }
 0x36d   : > { %6630 = vmatpush3.bf16.msra.mxu1 %v7237_v59  ;;  %v1921_v59 = vlaneseq }
 0x36e   : > { %6631 = vmatprep.subr.bf16.mxu1 %v8125_v36 }
 0x36f   : > { %v8719_v6 = vand.u32 127, %v1921_v59 }
 0x371   : > { %6632 = vmatpush3.bf16.msra.mxu1 %v7238_v60  ;;  %v8717_v60 = vshrl.u32 %v1921_v59, 7  ;;  %v7304_v59 = vld [vmem:[#allocation13 + $0x20] sm:$0xff]  }
 0x372   : > { %6633 = vmatprep.subr.bf16.mxu1 %v8125_v36 }
 0x375   : > { %6634 = vmatpush3.bf16.msra.mxu1 %v7239_v61 }
 0x376   : > { %6635 = vmatprep.subr.bf16.mxu1 %v8125_v36 }
 0x379   : > { %6636 = vmatpush3.bf16.msra.mxu1 %v7240_v62 }
 0x37a   : > { %6637 = vmatprep.subr.bf16.mxu1 %v8125_v36 }
 0x37d   : > { %6638 = vmatpush3.bf16.msra.mxu1 %v7241_v63 }
 0x37e   : > { %6643 = vmatprep.subr.bf16.mxu1 %v8125_v36 }
 0x380   : > { %6640 = vmatmul.mubr.bf16.vlgmr.msra.gmra.mrb[4].mxu1 %v1348_v2 }
 0x381   : > { %6659 = vmatprep.mubr.msk.bf16.mxu1 %vm8126_vm3, %v8125_v36  ;;  %6644 = vmatpush3.bf16.msra.mxu1 %v7243_v4 }
 0x382   : > { %6645 = vmatprep.subr.bf16.mxu1 %v8125_v36 }
 0x385   : > { %6646 = vmatpush3.bf16.msra.mxu1 %v7246_v7  ;;  %v1925_v7 = vmul.u32 2, %v8717_v60 }
 0x386   : > { %6647 = vmatprep.subr.bf16.mxu1 %v8125_v36 }
 0x387   : > { %vm1926_vm6 = vcmp.eq.s32.totalorder %v8719_v6, %v1925_v7 }
 0x389   : > { %6648 = vmatpush3.bf16.msra.mxu1 %v7249_v10 }
 0x38a   : > { %6649 = vmatprep.subr.bf16.mxu1 %v8125_v36 }
 0x38d   : > { %6650 = vmatpush3.bf16.msra.mxu1 %v7252_v13  ;;  %v8724_v13 = vsel %vm1926_vm6, 1.0, %v8125_v36 }
 0x38e   : > { %6651 = vmatprep.subr.bf16.mxu1 %v8125_v36 }
 0x391   : > { %6652 = vmatpush3.bf16.msra.mxu1 %v7255_v16  ;;  %v7271_v16 = vld [vmem:[#allocation11 + $0x8] sm:$0xff]  }
 0x392   : > { %6653 = vmatprep.subr.bf16.mxu1 %v8125_v36 }
 0x395   : > { %6654 = vmatpush3.bf16.msra.mxu1 %v7258_v19  ;;  %v7275_v19 = vld [vmem:[#allocation11 + $0x58] sm:$0xff]  }
 0x396   : > { %6655 = vmatprep.subr.bf16.mxu1 %v8125_v36 }
 0x399   : > { %6656 = vmatpush3.bf16.msra.mxu1 %v7261_v22  ;;  %v7279_v22 = vld [vmem:[#allocation11 + $0xa0] sm:$0xff]  }
 0x39a   : > { %6657 = vmatprep.subr.bf16.mxu1 %v8125_v36 }
 0x39d   : > { %6658 = vmatpush3.bf16.msra.mxu1 %v7264_v25  ;;  %v7282_v25 = vld [vmem:[#allocation11 + $0xa8] sm:$0xff]  }
 0x39e   : > { %6670 = vmatprep.subr.bf16.mxu1 %v8125_v36 }
 0x433   : > { %v6238_v27 = vpop.f32.mrb[0].mxu1 }
 0x434   : > { %v6239_v28 = vpop.f32.mrb[1].mxu1 }
 0x435   : > { %v6240_v29 = vadd.f32 %v6239_v28, %v6238_v27  ;;  %v6241_v30 = vpop.f32.mrb[2].mxu1  ;;  %v7284_v27 = vld [vmem:[#allocation11 + $0x70] sm:$0xff]  }
 0x436   : > { %v6242_v31 = vpop.f32.mrb[3].mxu1  ;;  %v7285_v28 = vld [vmem:[#allocation11 + $0xb0] sm:$0xff]  }
 0x437   : > { %v6243_v32 = vadd.f32 %v6242_v31, %v6241_v30  ;;  %v1583_v34 = vadd.f32 %v6240_v29, %v5888_v33  ;;  %v7286_v29 = vld [vmem:[#allocation11 + $0x30] sm:$0xff]   ;;  %v7287_v30 = vld [vmem:[#allocation11 + $0x78] sm:$0xff]  }
 0x438   : > { %v7288_v31 = vld [vmem:[#allocation11 + $0xb8] sm:$0xff]  }
 0x439   : > { %v1586_v39 = vadd.f32 %v6243_v32, %v5888_v33  ;;  %v7289_v32 = vld [vmem:[#allocation11 + $0x38] sm:$0xff]   ;;  %v7290_v33 = vld [vmem:[#allocation13 + $0x40] sm:$0xff]  }
 0x453   : > { %v1623_v35 = vpop.f32.mrb[4].mxu1 }
 0x454   : > { %v1624_v37 = vadd.f32 %v1623_v35, %v1583_v34  ;;  %v6641_v38 = vpop.f32.mrb[5].mxu1  ;;  %v5938_v34 = vld [vmem:[%s9030_s28] ss:$0 sm:$0xff] }
 0x455   : > { %v1626_v40 = vpop.f32.mrb[6].mxu1 }
 0x456   : > { %vm1630_vm4 = vcmp.ge.f32.partialorder %v1624_v37, 0.0  ;;  %v1632_v41 = vmul.f32 0.01, %v1624_v37  ;;  %v1627_v42 = vadd.f32 %v1626_v40, %v1586_v39  ;;  %v6642_v43 = vpop.f32.mrb[7].mxu1 }
 0x458   : > { %v1634_v44 = vsel %vm1630_vm4, %v1624_v37, %v1632_v41  ;;  %vm1631_vm5 = vcmp.ge.f32.partialorder %v1627_v42, 0.0  ;;  %v1633_v45 = vmul.f32 0.01, %v1627_v42 }
 0x459   : > { %1636 = vst [vmem:[#allocation3 + $0x1] sm:$0xff] %v1634_v44 }
 0x45a   : > { %v1635_v46 = vsel %vm1631_vm5, %v1627_v42, %v1633_v45  ;;  %v7291_v42 = vld [vmem:[#allocation13 + $0x80] sm:$0xff]  }
 0x45b   : > { %1637 = vst [vmem:[#allocation3 + $0x9] sm:$0xff] %v1635_v46  ;;  %v1643_v47 = vpack.c.bf16 %v1635_v46, %v1634_v44  ;;  %v7292_v45 = vld [vmem:[#allocation13] sm:$0xff]  }
 0x45d   : > { %1871 = vmatprep.mubr.bf16.mxu0 %v1643_v47 }
 0x460   : > { %v1638_v48 = vld [vmem:[#allocation3] sm:$0xff] }
 0x462   : > { %v1644_v49 = vld [vmem:[#allocation3 + $0x2] sm:$0xff]  ;;  %v1645_v50 = vld [vmem:[#allocation3 + $0xa] sm:$0xff] }
 0x463   : > { %v1639_v51 = vld [vmem:[#allocation3 + $0x8] sm:$0xff]  ;;  %v1646_v52 = vpack.c.bf16 %v1645_v50, %v1644_v49  ;;  %v7294_v49 = vld [vmem:[#allocation13 + $0x88] sm:$0xff]  }
 0x464   : > { %v1640_v53 = vpack.c.bf16 %v1639_v51, %v1638_v48  ;;  %v7293_v48 = vld [vmem:[#allocation13 + $0x48] sm:$0xff]   ;;  %v7296_v51 = vld [vmem:[#allocation13 + $0x50] sm:$0xff]  }
 0x465   : > { %6660 = vmatmul.mubr.bf16.vlgmr.msra.gmra.mrb[8].mxu1 %v1646_v52  ;;  %v7295_v50 = vld [vmem:[#allocation13 + $0x8] sm:$0xff]   ;;  %v7297_v52 = vld [vmem:[#allocation13 + $0x90] sm:$0xff]  }
 0x466   : > { %1872 = vmatmul.mubr.bf16.vlgmr.msra.gmra.mrb[4].mxu0 %v1640_v53  ;;  %6686 = vmatprep.mubr.msk.bf16.mxu1 %vm8126_vm3, %v8125_v36  ;;  %v7298_v53 = vld [vmem:[#allocation13 + $0x10] sm:$0xff]  }
 0x467   : > { %6667 = vmatprep.mubr.msk.f32.mxu0 %vm8126_vm3, %v8125_v36  ;;  %6671 = vmatpush3.bf16.msra.mxu1 %v7267_v55  ;;  %v7300_v55 = vld [vmem:[#allocation13 + $0x98] sm:$0xff]  }
 0x468   : > { %6672 = vmatprep.subr.bf16.mxu1 %v8125_v36 }
 0x46b   : > { %6673 = vmatpush3.bf16.msra.mxu1 %v7270_v56  ;;  %v7301_v56 = vld [vmem:[#allocation13 + $0x18] sm:$0xff]  }
 0x46c   : > { %6674 = vmatprep.subr.bf16.mxu1 %v8125_v36 }
 0x46f   : > { %6675 = vmatpush3.bf16.msra.mxu1 %v7273_v57  ;;  %v7302_v57 = vld [vmem:[#allocation13 + $0x60] sm:$0xff]  }
 0x470   : > { %6676 = vmatprep.subr.bf16.mxu1 %v8125_v36 }
 0x473   : > { %6677 = vmatpush3.bf16.msra.mxu1 %v7276_v58  ;;  %v7303_v58 = vld [vmem:[#allocation13 + $0xa0] sm:$0xff]  }
 0x474   : > { %6678 = vmatprep.subr.bf16.mxu1 %v8125_v36 }
 0x477   : > { %6679 = vmatpush3.bf16.msra.mxu1 %v7279_v22 }
 0x478   : > { %6680 = vmatprep.subr.bf16.mxu1 %v8125_v36 }
 0x47b   : > { %6681 = vmatpush3.bf16.msra.mxu1 %v7282_v25 }
 0x47c   : > { %6682 = vmatprep.subr.bf16.mxu1 %v8125_v36 }
 0x47f   : > { %6683 = vmatpush3.bf16.msra.mxu1 %v7285_v28  ;;  %v7318_v28 = vld [vmem:[#allocation16 + $0x88] sm:$0xff]  }
 0x480   : > { %6684 = vmatprep.subr.bf16.mxu1 %v8125_v36 }
 0x483   : > { %6685 = vmatpush3.bf16.msra.mxu1 %v7288_v31 }
 0x484   : > { %6690 = vmatprep.subr.bf16.mxu1 %v8125_v36 }
 0x538   : > { %v1914_v61 = vpop.f32.mrb[8].mxu1 }
 0x539   : > { %v6269_v62 = vpop.f32.mrb[4].mxu0  ;;  %v6661_v63 = vpop.f32.mrb[9].mxu1 }
 0x53a   : > { %v6270_v0 = vpop.f32.mrb[5].mxu0  ;;  %v1917_v2 = vpop.f32.mrb[10].mxu1  ;;  %v7307_v63 = vld [vmem:[#allocation13 + $0x28] sm:$0xff]  }
 0x53b   : > { %v6271_v1 = vadd.f32 %v6270_v0, %v6269_v62  ;;  %v6272_v3 = vpop.f32.mrb[6].mxu0  ;;  %v6662_v4 = vpop.f32.mrb[11].mxu1  ;;  %v7306_v62 = vld [vmem:[#allocation13 + $0xa8] sm:$0xff]   ;;  %v7308_v0 = vld [vmem:[#allocation13 + $0x70] sm:$0xff]  }
 0x53c   : > { %v6273_v5 = vpop.f32.mrb[7].mxu0  ;;  %v7312_v4 = vld [vmem:[#allocation13 + $0xb8] sm:$0xff]  }
 0x53d   : > { %v1915_v8 = vadd.f32 %v6271_v1, %v1914_v61  ;;  %v6274_v9 = vadd.f32 %v6273_v5, %v6272_v3  ;;  %v7305_v61 = vld [vmem:[#allocation13 + $0x68] sm:$0xff]   ;;  %v7309_v1 = vld [vmem:[#allocation13 + $0xb0] sm:$0xff]   ;;  %v7311_v3 = vld [vmem:[#allocation13 + $0x78] sm:$0xff]  }
 0x53e   : > { %v7313_v5 = vld [vmem:[#allocation13 + $0x38] sm:$0xff]  }
 0x53f   : > { %v1918_v10 = vadd.f32 %v6274_v9, %v1917_v2  ;;  %v7310_v2 = vld [vmem:[#allocation13 + $0x30] sm:$0xff]  }
 0x541   : > { %v6976_v12 = vpack.c.bf16 %v1918_v10, %v1915_v8  ;;  %v5940_v10 = vld [vmem:[%s9031_s6] ss:$0 sm:$0xff] }
 0x543   : > { %6977 = vmatpush3.bf16.msra.mxu0 %v6976_v12 }
 0x544   : > { %6287 = vmatprep.subr.bf16.mxu0 %v7266_v11 }
 0x546   : > { %6668 = vmatmul.mubr.msk.f32.vlgmr.msra.gmra.mrb[8].mxu0 %vm1936_vm7, %v8724_v13 }
 0x547   : > { %6288 = vmatpush3.bf16.msra.mxu0 %v7268_v14 }
 0x548   : > { %6289 = vmatprep.subr.bf16.mxu0 %v7269_v15 }
 0x54b   : > { %6290 = vmatpush3.bf16.msra.mxu0 %v7271_v16 }
 0x54c   : > { %6291 = vmatprep.subr.bf16.mxu0 %v7272_v17 }
 0x54f   : > { %6292 = vmatpush3.bf16.msra.mxu0 %v7274_v18 }
 0x550   : > { %6293 = vmatprep.subr.bf16.mxu0 %v7275_v19 }
 0x553   : > { %6294 = vmatpush3.bf16.msra.mxu0 %v7277_v20 }
 0x554   : > { %6295 = vmatprep.subr.bf16.mxu0 %v7278_v21 }
 0x557   : > { %6296 = vmatpush3.bf16.msra.mxu0 %v7280_v23 }
 0x558   : > { %6297 = vmatprep.subr.bf16.mxu0 %v7281_v24 }
 0x55b   : > { %6298 = vmatpush3.bf16.msra.mxu0 %v7283_v26 }
 0x55c   : > { %6299 = vmatprep.subr.bf16.mxu0 %v7284_v27  ;;  %v7315_v27 = vld [vmem:[#allocation16 + $0x80] sm:$0xff]  }
 0x55f   : > { %6300 = vmatpush3.bf16.msra.mxu0 %v7286_v29  ;;  %v7321_v29 = vld [vmem:[#allocation16 + $0x90] sm:$0xff]  }
 0x560   : > { %6301 = vmatprep.subr.bf16.mxu0 %v7287_v30  ;;  %v7324_v30 = vld [vmem:[#allocation16 + $0x98] sm:$0xff]  }
 0x563   : > { %6302 = vmatpush3.bf16.msra.mxu0 %v7289_v32 }
 0x564   : > { %6318 = vmatprep.subr.bf16.mxu0 %v7290_v33 }
 0x619   : > { %v2006_v35 = vpop.f32.mrb[8].mxu0 }
 0x61a   : > { %v2007_v37 = vadd.f32 %v5938_v34, %v2006_v35  ;;  %v6669_v38 = vpop.f32.mrb[9].mxu0 }
 0x61c   : > { %vm2010_vm8 = vcmp.ge.f32.partialorder %v2007_v37, 0.0  ;;  %v2011_v39 = vmul.f32 0.01, %v2007_v37 }
 0x61e   : > { %v2012_v40 = vsel %vm2010_vm8, %v2007_v37, %v2011_v39 }
 0x61f   : > { %2013 = vst [vmem:[#allocation5 + $0x1] sm:$0xff] %v2012_v40  ;;  %v2017_v41 = vpack.c.bf16 %v2012_v40, %v2012_v40 }
 0x621   : > { %2251 = vmatprep.mubr.bf16.mxu0 %v2017_v41  ;;  %v7314_v41 = vld [vmem:[#allocation16 + $0x40] sm:$0xff]  }
 0x626   : > { %v2018_v43 = vld [vmem:[#allocation5 + $0x2] sm:$0xff] }
 0x627   : > { %v2014_v44 = vld [vmem:[#allocation5] sm:$0xff]  ;;  %v2019_v46 = vpack.c.bf16 %v2018_v43, %v2018_v43 }
 0x628   : > { %v2015_v47 = vpack.c.bf16 %v2014_v44, %v2014_v44  ;;  %v7316_v43 = vld [vmem:[#allocation16] sm:$0xff]   ;;  %v7317_v44 = vld [vmem:[#allocation16 + $0x48] sm:$0xff]  }
 0x629   : > { %6687 = vmatmul.mubr.bf16.vlgmr.msra.gmra.mrb[12].mxu1 %v2019_v46  ;;  %v7320_v46 = vld [vmem:[#allocation16 + $0x50] sm:$0xff]  }
 0x62a   : > { %2252 = vmatmul.mubr.bf16.vlgmr.msra.gmra.mrb[12].mxu0 %v2015_v47  ;;  %6691 = vmatpush3.bf16.msra.mxu1 %v7291_v42  ;;  %v7322_v47 = vld [vmem:[#allocation16 + $0x10] sm:$0xff]  }
 0x62b   : > { %6319 = vmatpush3.bf16.msra.mxu0 %v7292_v45  ;;  %6692 = vmatprep.subr.bf16.mxu1 %v8125_v36  ;;  %v7319_v45 = vld [vmem:[#allocation16 + $0x8] sm:$0xff]  }
 0x62c   : > { %6320 = vmatprep.subr.bf16.mxu0 %v7293_v48  ;;  %6706 = vmatprep.mubr.msk.bf16.mxu1 %vm8126_vm3, %v8125_v36  ;;  %v7323_v48 = vld [vmem:[#allocation16 + $0x58] sm:$0xff]  }
 0x62e   : > { %6693 = vmatpush3.bf16.msra.mxu1 %v7294_v49  ;;  %v7325_v49 = vld [vmem:[#allocation16 + $0x18] sm:$0xff]  }
 0x62f   : > { %6321 = vmatpush3.bf16.msra.mxu0 %v7295_v50  ;;  %6694 = vmatprep.subr.bf16.mxu1 %v8125_v36  ;;  %v7326_v50 = vld [vmem:[#allocation16 + $0x60] sm:$0xff]  }
 0x630   : > { %6322 = vmatprep.subr.bf16.mxu0 %v7296_v51  ;;  %v7327_v51 = vld [vmem:[#allocation16 + $0xa0] sm:$0xff]  }
 0x632   : > { %6695 = vmatpush3.bf16.msra.mxu1 %v7297_v52  ;;  %v7328_v52 = vld [vmem:[#allocation16 + $0x20] sm:$0xff]  }
 0x633   : > { %6696 = vmatprep.subr.bf16.mxu1 %v8125_v36  ;;  %6323 = vmatpush3.bf16.msra.mxu0 %v7298_v53  ;;  %v7330_v53 = vld [vmem:[#allocation16 + $0xa8] sm:$0xff]  }
 0x634   : > { %6324 = vmatprep.subr.bf16.mxu0 %v7299_v54  ;;  %v7331_v54 = vld [vmem:[#allocation16 + $0x28] sm:$0xff]  }
 0x636   : > { %6697 = vmatpush3.bf16.msra.mxu1 %v7300_v55  ;;  %v7332_v55 = vld [vmem:[#allocation16 + $0x70] sm:$0xff]  }
 0x637   : > { %6325 = vmatpush3.bf16.msra.mxu0 %v7301_v56  ;;  %6698 = vmatprep.subr.bf16.mxu1 %v8125_v36  ;;  %v7333_v56 = vld [vmem:[#allocation16 + $0xb0] sm:$0xff]  }
 0x638   : > { %6326 = vmatprep.subr.bf16.mxu0 %v7302_v57  ;;  %v7334_v57 = vld [vmem:[#allocation16 + $0x30] sm:$0xff]  }
 0x63a   : > { %6699 = vmatpush3.bf16.msra.mxu1 %v7303_v58  ;;  %v7335_v58 = vld [vmem:[#allocation16 + $0x78] sm:$0xff]  }
 0x63b   : > { %6327 = vmatpush3.bf16.msra.mxu0 %v7304_v59  ;;  %6700 = vmatprep.subr.bf16.mxu1 %v8125_v36  ;;  %v7336_v59 = vld [vmem:[#allocation16 + $0xb8] sm:$0xff]  }
 0x63c   : > { %6328 = vmatprep.subr.bf16.mxu0 %v7305_v61  ;;  %v7337_v61 = vld [vmem:[#allocation16 + $0x38] sm:$0xff]  }
 0x63e   : > { %6701 = vmatpush3.bf16.msra.mxu1 %v7306_v62  ;;  %v5989_v62 = vld [vmem:[#allocation14] ss:$0 sm:$0xff] }
 0x63f   : > { %6329 = vmatpush3.bf16.msra.mxu0 %v7307_v63  ;;  %6702 = vmatprep.subr.bf16.mxu1 %v8125_v36 }
 0x640   : > { %6330 = vmatprep.subr.bf16.mxu0 %v7308_v0 }
 0x642   : > { %6703 = vmatpush3.bf16.msra.mxu1 %v7309_v1 }
 0x643   : > { %6331 = vmatpush3.bf16.msra.mxu0 %v7310_v2  ;;  %6704 = vmatprep.subr.bf16.mxu1 %v8125_v36 }
 0x644   : > { %6332 = vmatprep.subr.bf16.mxu0 %v7311_v3 }
 0x646   : > { %6705 = vmatpush3.bf16.msra.mxu1 %v7312_v4  ;;  %v7338_v4 = vld [vmem:[#allocation19 + $0x40] sm:$0xff]  }
 0x647   : > { %6333 = vmatpush3.bf16.msra.mxu0 %v7313_v5  ;;  %6715 = vmatprep.subr.bf16.mxu1 %v8125_v36 }
 0x648   : > { %6710 = vmatprep.subr.mxu0 %v8125_v36 }
 0x6fc   : > { %v2293_v7 = vpop.f32.mrb[12].mxu1 }
 0x6fd   : > { %v6303_v8 = vpop.f32.mrb[12].mxu0  ;;  %v6688_v9 = vpop.f32.mrb[13].mxu1 }
 0x6fe   : > { %v6304_v11 = vpop.f32.mrb[13].mxu0  ;;  %v2296_v14 = vpop.f32.mrb[14].mxu1 }
 0x6ff   : > { %v6305_v12 = vadd.f32 %v6304_v11, %v6303_v8  ;;  %v6306_v15 = vpop.f32.mrb[14].mxu0  ;;  %v6689_v16 = vpop.f32.mrb[15].mxu1  ;;  %v7340_v14 = vld [vmem:[#allocation19 + $0x48] sm:$0xff]  }
 0x700   : > { %v6307_v17 = vpop.f32.mrb[15].mxu0  ;;  %v7341_v15 = vld [vmem:[#allocation19 + $0x8] sm:$0xff]   ;;  %v7342_v16 = vld [vmem:[#allocation19 + $0x50] sm:$0xff]  }
 0x701   : > { %v2254_v18 = vadd.f32 %v6305_v12, %v5940_v10  ;;  %v7339_v12 = vld [vmem:[#allocation19] sm:$0xff]   ;;  %v7343_v17 = vld [vmem:[#allocation19 + $0x10] sm:$0xff]  }
 0x703   : > { %v2294_v19 = vadd.f32 %v2293_v7, %v2254_v18  ;;  %v7344_v18 = vld [vmem:[#allocation19 + $0x58] sm:$0xff]  }
 0x705   : > { %vm2299_vm9 = vcmp.ge.f32.partialorder %v2294_v19, 0.0  ;;  %v2300_v20 = vmul.f32 0.01, %v2294_v19 }
 0x707   : > { %v2301_v21 = vsel %vm2299_vm9, %v2294_v19, %v2300_v20  ;;  %v7345_v19 = vld [vmem:[#allocation19 + $0x18] sm:$0xff]   ;;  %v7346_v20 = vld [vmem:[#allocation19 + $0x60] sm:$0xff]  }
 0x708   : > { %2302 = vst [vmem:[#allocation6 + $0x1] sm:$0xff] %v2301_v21  ;;  %v8744_v22 = vpack.c.bf16 %v2301_v21, %v2301_v21  ;;  %v7347_v21 = vld [vmem:[#allocation19 + $0x20] sm:$0xff]  }
 0x70a   : > { %2533 = vmatprep.mubr.bf16.mxu0 %v8744_v22 }
 0x70f   : > { %v2307_v23 = vld [vmem:[#allocation6 + $0x2] sm:$0xff] }
 0x710   : > { %v2303_v24 = vld [vmem:[#allocation6] sm:$0xff]  ;;  %v8747_v25 = vpack.c.bf16 %v2307_v23, %v2307_v23  ;;  %v7348_v23 = vld [vmem:[#allocation19 + $0x68] sm:$0xff]  }
 0x711   : > { %v8749_v26 = vpack.c.bf16 %v2303_v24, %v2303_v24  ;;  %v7349_v24 = vld [vmem:[#allocation19 + $0x28] sm:$0xff]  }
 0x712   : > { %6707 = vmatmul.mubr.bf16.vlgmr.msra.gmra.mrb[16].mxu1 %v8747_v25 }
 0x713   : > { %2534 = vmatmul.mubr.bf16.vlgmr.msra.gmra.mrb[16].mxu0 %v8749_v26  ;;  %6731 = vmatprep.mubr.msk.bf16.mxu1 %vm8126_vm3, %v8125_v36 }
 0x714   : > { %6712 = vmatprep.mubr.msk.f32.mxu0 %vm8126_vm3, %v8125_v36  ;;  %6716 = vmatpush3.bf16.msra.mxu1 %v7315_v27  ;;  %v7350_v27 = vld [vmem:[#allocation19 + $0x70] sm:$0xff]  }
 0x715   : > { %6717 = vmatprep.subr.bf16.mxu1 %v8125_v36 }
 0x718   : > { %6718 = vmatpush3.bf16.msra.mxu1 %v7318_v28  ;;  %v7351_v28 = vld [vmem:[#allocation19 + $0x30] sm:$0xff]  }
 0x719   : > { %6719 = vmatprep.subr.bf16.mxu1 %v8125_v36 }
 0x71c   : > { %6720 = vmatpush3.bf16.msra.mxu1 %v7321_v29  ;;  %v7352_v29 = vld [vmem:[#allocation19 + $0x78] sm:$0xff]  }
 0x71d   : > { %6721 = vmatprep.subr.bf16.mxu1 %v8125_v36 }
 0x720   : > { %6722 = vmatpush3.bf16.msra.mxu1 %v7324_v30  ;;  %v7353_v30 = vld [vmem:[#allocation19 + $0x38] sm:$0xff]  }
 0x721   : > { %6723 = vmatprep.subr.bf16.mxu1 %v8125_v36 }
 0x724   : > { %6724 = vmatpush3.bf16.msra.mxu1 %v7327_v51  ;;  %v7358_v51 = vld [vmem:[#allocation23 + $0xa0] sm:$0xff]  }
 0x725   : > { %6725 = vmatprep.subr.bf16.mxu1 %v8125_v36 }
 0x728   : > { %6726 = vmatpush3.bf16.msra.mxu1 %v7330_v53  ;;  %v7361_v53 = vld [vmem:[#allocation23 + $0xb8] sm:$0xff]  }
 0x729   : > { %6727 = vmatprep.subr.bf16.mxu1 %v8125_v36 }
 0x72c   : > { %6728 = vmatpush3.bf16.msra.mxu1 %v7333_v56  ;;  %v7385_v56 = vld [vmem:[#allocation22 + $0x90] sm:$0xff]  }
 0x72d   : > { %6729 = vmatprep.subr.bf16.mxu1 %v8125_v36 }
 0x730   : > { %6730 = vmatpush3.bf16.msra.mxu1 %v7336_v59 }
 0x731   : > { %6755 = vmatprep.subr.bf16.mxu1 %v8125_v36 }
 0x7e5   : > { %v2575_v31 = vpop.f32.mrb[16].mxu1 }
 0x7e6   : > { %v6334_v32 = vpop.f32.mrb[16].mxu0  ;;  %v6708_v33 = vpop.f32.mrb[17].mxu1 }
 0x7e7   : > { %v6335_v34 = vpop.f32.mrb[17].mxu0  ;;  %v2578_v37 = vpop.f32.mrb[18].mxu1 }
 0x7e8   : > { %v6336_v35 = vadd.f32 %v6335_v34, %v6334_v32  ;;  %v6337_v38 = vpop.f32.mrb[18].mxu0  ;;  %v6709_v39 = vpop.f32.mrb[19].mxu1  ;;  %v5991_v34 = vld [vmem:[#allocation17] ss:$0 sm:$0xff] }
 0x7e9   : > { %v6338_v40 = vpop.f32.mrb[19].mxu0 }
 0x7ea   : > { %v2576_v42 = vadd.f32 %v6336_v35, %v2575_v31 }
 0x7ec   : > { %6711 = vmatpush3.msra.mxu0 %v2576_v42 }
 0x7ed   : > { %6713 = vmatmul.mubr.msk.f32.vlgmr.msra.gmra.mrb[10].mxu0 %vm2588_vm10, %v8724_v13  ;;  %6351 = vmatprep.subr.bf16.mxu0 %v7314_v41  ;;  %v7329_v13 = vld [vmem:[#allocation16 + $0x68] sm:$0xff]  }
 0x7ee   : > { %6352 = vmatpush3.bf16.msra.mxu0 %v7316_v43 }
 0x7ef   : > { %6353 = vmatprep.subr.bf16.mxu0 %v7317_v44 }
 0x7f2   : > { %6354 = vmatpush3.bf16.msra.mxu0 %v7319_v45 }
 0x7f3   : > { %6355 = vmatprep.subr.bf16.mxu0 %v7320_v46  ;;  %v7354_v46 = vld [vmem:[#allocation23 + $0x80] sm:$0xff]  }
 0x7f6   : > { %6356 = vmatpush3.bf16.msra.mxu0 %v7322_v47 }
 0x7f7   : > { %6357 = vmatprep.subr.bf16.mxu0 %v7323_v48  ;;  %v7355_v48 = vld [vmem:[#allocation23 + $0x88] sm:$0xff]  }
 0x7fa   : > { %6358 = vmatpush3.bf16.msra.mxu0 %v7325_v49  ;;  %v7356_v49 = vld [vmem:[#allocation23 + $0x90] sm:$0xff]  }
 0x7fb   : > { %6359 = vmatprep.subr.bf16.mxu0 %v7326_v50  ;;  %v7357_v50 = vld [vmem:[#allocation23 + $0x98] sm:$0xff]  }
 0x7fe   : > { %6360 = vmatpush3.bf16.msra.mxu0 %v7328_v52  ;;  %v7359_v52 = vld [vmem:[#allocation23 + $0xa8] sm:$0xff]  }
 0x7ff   : > { %6361 = vmatprep.subr.bf16.mxu0 %v7329_v13  ;;  %v7360_v13 = vld [vmem:[#allocation23 + $0xb0] sm:$0xff]  }
 0x802   : > { %6362 = vmatpush3.bf16.msra.mxu0 %v7331_v54  ;;  %v7379_v54 = vld [vmem:[#allocation22 + $0x80] sm:$0xff]  }
 0x803   : > { %6363 = vmatprep.subr.bf16.mxu0 %v7332_v55  ;;  %v7382_v55 = vld [vmem:[#allocation22 + $0x88] sm:$0xff]  }
 0x806   : > { %6364 = vmatpush3.bf16.msra.mxu0 %v7334_v57  ;;  %v8807_v57 = vmul.u32 2, %v8719_v6 }
 0x807   : > { %6365 = vmatprep.subr.bf16.mxu0 %v7335_v58 }
 0x808   : > { %vm3164_vm0 = vcmp.eq.s32.totalorder %v8717_v60, %v8807_v57 }
 0x80a   : > { %6366 = vmatpush3.bf16.msra.mxu0 %v7337_v61 }
 0x80b   : > { %6735 = vmatprep.subr.bf16.mxu0 %v8125_v36 }
 0x8c0   : > { %v2657_v63 = vpop.f32.mrb[10].mxu0 }
 0x8c1   : > { %v2658_v0 = vadd.f32 %v5989_v62, %v2657_v63  ;;  %v6714_v1 = vpop.f32.mrb[11].mxu0  ;;  %v7362_v62 = vld [vmem:[#allocation23 + $0x40] sm:$0xff]  }
 0x8c3   : > { %vm2661_vm11 = vcmp.ge.f32.partialorder %v2658_v0, 0.0  ;;  %v2662_v2 = vmul.f32 0.01, %v2658_v0 }
 0x8c5   : > { %v2663_v3 = vsel %vm2661_vm11, %v2658_v0, %v2662_v2 }
 0x8c6   : > { %2664 = vst [vmem:[#allocation8 + $0x1] sm:$0xf] %v2663_v3 }
 0x8cd   : > { %v2667_v5 = vld [vmem:[#allocation8 + $0x1] sm:$0xf] }
 0x8ce   : > { %v2669_v7 = vld [vmem:[#allocation8 + $0x2] sm:$0xf]  ;;  %v2668_v9 = vpack.c.bf16 %v2667_v5, %v2667_v5  ;;  %v7363_v5 = vld [vmem:[#allocation23] sm:$0xff]  }
 0x8cf   : > { %v2665_v8 = vld [vmem:[#allocation8] sm:$0xf]  ;;  %v2670_v10 = vpack.c.bf16 %v2669_v7, %v2669_v7  ;;  %v7364_v7 = vld [vmem:[#allocation23 + $0x48] sm:$0xff]  }
 0x8d0   : > { %v2666_v11 = vpack.c.bf16 %v2665_v8, %v2665_v8  ;;  %2902 = vmatprep.mubr.bf16.mxu0 %v2668_v9  ;;  %v7365_v8 = vld [vmem:[#allocation23 + $0x8] sm:$0xff]   ;;  %v7366_v9 = vld [vmem:[#allocation23 + $0x50] sm:$0xff]  }
 0x8d1   : > { %6732 = vmatmul.mubr.bf16.vlgmr.msra.gmra.mrb[20].mxu1 %v2670_v10  ;;  %v7367_v10 = vld [vmem:[#allocation23 + $0x10] sm:$0xff]  }
 0x8d2   : > { %2903 = vmatmul.mubr.bf16.vlgmr.msra.gmra.mrb[20].mxu0 %v2666_v11  ;;  %6756 = vmatpush3.bf16.msra.mxu1 %v7338_v4  ;;  %v8827_v4 = vsel %vm3164_vm0, 1.0, %v8125_v36  ;;  %v7368_v11 = vld [vmem:[#allocation23 + $0x58] sm:$0xff]  }
 0x8d3   : > { %6736 = vmatpush3.bf16.msra.mxu0 %v7339_v12  ;;  %6757 = vmatprep.subr.bf16.mxu1 %v8125_v36  ;;  %v7369_v12 = vld [vmem:[#allocation23 + $0x18] sm:$0xff]  }
 0x8d4   : > { %6737 = vmatprep.subr.bf16.mxu0 %v8125_v36  ;;  %6751 = vmatprep.mubr.msk.bf16.mxu0 %vm8126_vm3, %v8125_v36 }
 0x8d5   : > { %6771 = vmatprep.mubr.msk.bf16.mxu1 %vm8126_vm3, %v8125_v36 }
 0x8d6   : > { %6758 = vmatpush3.bf16.msra.mxu1 %v7340_v14  ;;  %v7370_v14 = vld [vmem:[#allocation23 + $0x60] sm:$0xff]  }
 0x8d7   : > { %6738 = vmatpush3.bf16.msra.mxu0 %v7341_v15  ;;  %6759 = vmatprep.subr.bf16.mxu1 %v8125_v36  ;;  %v7371_v15 = vld [vmem:[#allocation23 + $0x20] sm:$0xff]  }
 0x8d8   : > { %6739 = vmatprep.subr.bf16.mxu0 %v8125_v36 }
 0x8da   : > { %6760 = vmatpush3.bf16.msra.mxu1 %v7342_v16  ;;  %v7372_v16 = vld [vmem:[#allocation23 + $0x68] sm:$0xff]  }
 0x8db   : > { %6740 = vmatpush3.bf16.msra.mxu0 %v7343_v17  ;;  %6761 = vmatprep.subr.bf16.mxu1 %v8125_v36  ;;  %v7373_v17 = vld [vmem:[#allocation23 + $0x28] sm:$0xff]  }
 0x8dc   : > { %6741 = vmatprep.subr.bf16.mxu0 %v8125_v36 }
 0x8de   : > { %6762 = vmatpush3.bf16.msra.mxu1 %v7344_v18  ;;  %v7374_v18 = vld [vmem:[#allocation23 + $0x70] sm:$0xff]  }
 0x8df   : > { %6742 = vmatpush3.bf16.msra.mxu0 %v7345_v19  ;;  %6763 = vmatprep.subr.bf16.mxu1 %v8125_v36  ;;  %v7376_v19 = vld [vmem:[#allocation23 + $0x78] sm:$0xff]  }
 0x8e0   : > { %6743 = vmatprep.subr.bf16.mxu0 %v8125_v36 }
 0x8e2   : > { %6764 = vmatpush3.bf16.msra.mxu1 %v7346_v20  ;;  %v7377_v20 = vld [vmem:[#allocation23 + $0x38] sm:$0xff]  }
 0x8e3   : > { %6744 = vmatpush3.bf16.msra.mxu0 %v7347_v21  ;;  %6765 = vmatprep.subr.bf16.mxu1 %v8125_v36 }
 0x8e4   : > { %6745 = vmatprep.subr.bf16.mxu0 %v8125_v36 }
 0x8e6   : > { %6766 = vmatpush3.bf16.msra.mxu1 %v7348_v23  ;;  %v7378_v23 = vld [vmem:[#allocation22 + $0x40] sm:$0xff]  }
 0x8e7   : > { %6746 = vmatpush3.bf16.msra.mxu0 %v7349_v24  ;;  %6767 = vmatprep.subr.bf16.mxu1 %v8125_v36 }
 0x8e8   : > { %6747 = vmatprep.subr.bf16.mxu0 %v8125_v36 }
 0x8ea   : > { %6768 = vmatpush3.bf16.msra.mxu1 %v7350_v27 }
 0x8eb   : > { %6748 = vmatpush3.bf16.msra.mxu0 %v7351_v28  ;;  %6769 = vmatprep.subr.bf16.mxu1 %v8125_v36 }
 0x8ec   : > { %6749 = vmatprep.subr.bf16.mxu0 %v8125_v36 }
 0x8ee   : > { %6770 = vmatpush3.bf16.msra.mxu1 %v7352_v29  ;;  %v7380_v29 = vld [vmem:[#allocation22] sm:$0xff]  }
 0x8ef   : > { %6750 = vmatpush3.bf16.msra.mxu0 %v7353_v30  ;;  %6785 = vmatprep.subr.bf16.mxu1 %v8125_v36  ;;  %v7381_v30 = vld [vmem:[#allocation22 + $0x48] sm:$0xff]  }
 0x8f0   : > { %6775 = vmatprep.subr.mxu0 %v8125_v36 }
 0x9a4   : > { %v2944_v31 = vpop.f32.mrb[20].mxu1 }
 0x9a5   : > { %v6367_v32 = vpop.f32.mrb[20].mxu0  ;;  %v6733_v33 = vpop.f32.mrb[21].mxu1 }
 0x9a6   : > { %v6368_v35 = vpop.f32.mrb[21].mxu0  ;;  %v2947_v37 = vpop.f32.mrb[22].mxu1  ;;  %v7386_v33 = vld [vmem:[#allocation22 + $0x10] sm:$0xff]  }
 0x9a7   : > { %v6369_v38 = vadd.f32 %v6368_v35, %v6367_v32  ;;  %v6370_v39 = vpop.f32.mrb[22].mxu0  ;;  %v6734_v40 = vpop.f32.mrb[23].mxu1  ;;  %v7384_v32 = vld [vmem:[#allocation22 + $0x50] sm:$0xff]   ;;  %v7388_v35 = vld [vmem:[#allocation22 + $0x98] sm:$0xff]  }
 0x9a8   : > { %v6371_v41 = vpop.f32.mrb[23].mxu0  ;;  %v7389_v37 = vld [vmem:[#allocation22 + $0x18] sm:$0xff]   ;;  %v7391_v39 = vld [vmem:[#allocation22 + $0xa0] sm:$0xff]  }
 0x9a9   : > { %v2905_v42 = vadd.f32 %v6369_v38, %v5991_v34  ;;  %v7387_v34 = vld [vmem:[#allocation22 + $0x58] sm:$0xff]   ;;  %v7390_v38 = vld [vmem:[#allocation22 + $0x60] sm:$0xff]   ;;  %v7394_v41 = vld [vmem:[#allocation22 + $0xa8] sm:$0xff]  }
 0x9aa   : > { %v7392_v40 = vld [vmem:[#allocation22 + $0x20] sm:$0xff]  }
 0x9ab   : > { %v2945_v43 = vadd.f32 %v2944_v31, %v2905_v42  ;;  %v7383_v31 = vld [vmem:[#allocation22 + $0x8] sm:$0xff]  }
 0x9ac   : > { %v7395_v42 = vld [vmem:[#allocation22 + $0x28] sm:$0xff]  }
 0x9ad   : > { %vm2950_vm12 = vcmp.ge.f32.partialorder %v2945_v43, 0.0  ;;  %v2951_v44 = vmul.f32 0.01, %v2945_v43 }
 0x9af   : > { %v2952_v45 = vsel %vm2950_vm12, %v2945_v43, %v2951_v44  ;;  %v7396_v43 = vld [vmem:[#allocation22 + $0x70] sm:$0xff]  }
 0x9b0   : > { %v2953_v47 = vpack.c.bf16 %v2952_v45, %v2952_v45  ;;  %v7397_v44 = vld [vmem:[#allocation22 + $0xb0] sm:$0xff]  }
 0x9b1   : > { %v7398_v45 = vld [vmem:[#allocation22 + $0x30] sm:$0xff]  }
 0x9b2   : > { %6752 = vmatmul.mubr.bf16.vlgmr.msra.gmra.mrb[24].mxu0 %v2953_v47  ;;  %6772 = vmatmul.mubr.bf16.vlgmr.msra.gmra.mrb[24].mxu1 %v2953_v47  ;;  %v7400_v47 = vld [vmem:[#allocation22 + $0xb8] sm:$0xff]  }
 0x9b3   : > { %6786 = vmatpush3.bf16.msra.mxu1 %v7354_v46  ;;  %6801 = vmatprep.mubr.msk.bf16.mxu1 %vm8126_vm3, %v8125_v36  ;;  %v7399_v46 = vld [vmem:[#allocation22 + $0x78] sm:$0xff]  }
 0x9b4   : > { %6787 = vmatprep.subr.bf16.mxu1 %v8125_v36  ;;  %6777 = vmatprep.mubr.msk.f32.mxu0 %vm8126_vm3, %v8125_v36 }
 0x9b7   : > { %6788 = vmatpush3.bf16.msra.mxu1 %v7355_v48  ;;  %v7401_v48 = vld [vmem:[#allocation22 + $0x38] sm:$0xff]  }
 0x9b8   : > { %6789 = vmatprep.subr.bf16.mxu1 %v8125_v36 }
 0x9bb   : > { %6790 = vmatpush3.bf16.msra.mxu1 %v7356_v49  ;;  %v7402_v49 = vld [vmem:[#allocation26 + $0x40] sm:$0xff]  }
 0x9bc   : > { %6791 = vmatprep.subr.bf16.mxu1 %v8125_v36 }
 0x9bf   : > { %6792 = vmatpush3.bf16.msra.mxu1 %v7357_v50 }
 0x9c0   : > { %6793 = vmatprep.subr.bf16.mxu1 %v8125_v36 }
 0x9c3   : > { %6794 = vmatpush3.bf16.msra.mxu1 %v7358_v51 }
 0x9c4   : > { %6795 = vmatprep.subr.bf16.mxu1 %v8125_v36 }
 0x9c7   : > { %6796 = vmatpush3.bf16.msra.mxu1 %v7359_v52 }
 0x9c8   : > { %6797 = vmatprep.subr.bf16.mxu1 %v8125_v36 }
 0x9cb   : > { %6798 = vmatpush3.bf16.msra.mxu1 %v7360_v13  ;;  %v6038_v13 = vld [vmem:[#allocation20] ss:$0 sm:$0xff] }
 0x9cc   : > { %6799 = vmatprep.subr.bf16.mxu1 %v8125_v36 }
 0x9cf   : > { %6800 = vmatpush3.bf16.msra.mxu1 %v7361_v53 }
 0x9d0   : > { %6805 = vmatprep.subr.bf16.mxu1 %v8125_v36 }
 0x9d2   : > { %6802 = vmatmul.mubr.bf16.vlgmr.msra.gmra.mrb[28].mxu1 %v8747_v25  ;;  %v8810_v25 = vadd.s32 1, %v8807_v57 }
 0x9d3   : > { %6821 = vmatprep.mubr.msk.bf16.mxu1 %vm8126_vm3, %v8125_v36  ;;  %6806 = vmatpush3.bf16.msra.mxu1 %v7379_v54 }
 0x9d4   : > { %6807 = vmatprep.subr.bf16.mxu1 %v8125_v36  ;;  %vm3168_vm13 = vcmp.eq.s32.totalorder %v8717_v60, %v8810_v25 }
 0x9d5   : > { %v8815_v58 = vsel %vm3168_vm13, 1.0, %v8125_v36 }
 0x9d7   : > { %6808 = vmatpush3.bf16.msra.mxu1 %v7382_v55 }
 0x9d8   : > { %6809 = vmatprep.subr.bf16.mxu1 %v8125_v36 }
 0x9db   : > { %6810 = vmatpush3.bf16.msra.mxu1 %v7385_v56 }
 0x9dc   : > { %6811 = vmatprep.subr.bf16.mxu1 %v8125_v36 }
 0x9df   : > { %6812 = vmatpush3.bf16.msra.mxu1 %v7388_v35 }
 0x9e0   : > { %6813 = vmatprep.subr.bf16.mxu1 %v8125_v36 }
 0x9e3   : > { %6814 = vmatpush3.bf16.msra.mxu1 %v7391_v39 }
 0x9e4   : > { %6815 = vmatprep.subr.bf16.mxu1 %v8125_v36 }
 0x9e7   : > { %6816 = vmatpush3.bf16.msra.mxu1 %v7394_v41 }
 0x9e8   : > { %6817 = vmatprep.subr.bf16.mxu1 %v8125_v36 }
 0x9eb   : > { %6818 = vmatpush3.bf16.msra.mxu1 %v7397_v44 }
 0x9ec   : > { %6819 = vmatprep.subr.bf16.mxu1 %v8125_v36 }
 0x9ef   : > { %6820 = vmatpush3.bf16.msra.mxu1 %v7400_v47 }
 0x9f0   : > { %6825 = vmatprep.subr.bf16.mxu1 %v8125_v36 }
 0xa85   : > { %v3052_v59 = vpop.f32.mrb[24].mxu0  ;;  %v3157_v61 = vpop.f32.mrb[24].mxu1 }
 0xa86   : > { %v6753_v63 = vpop.f32.mrb[25].mxu0  ;;  %v6773_v6 = vpop.f32.mrb[25].mxu1  ;;  %6776 = vmatpush3.msk.msra.mxu0 %vm3175_vm14, %v3157_v61 }
 0xa87   : > { %v3055_v0 = vpop.f32.mrb[26].mxu0  ;;  %v3160_v1 = vpop.f32.mrb[26].mxu1  ;;  %6778 = vmatmul.mubr.msk.f32.vlgmr.msra.gmra.mrb[28].mxu0 %vm3171_vm15, %v8815_v58  ;;  %6780 = vmatprep.subr.mxu0 %v8125_v36  ;;  %v7404_v63 = vld [vmem:[#allocation26] sm:$0xff]  }
 0xa88   : > { %v6754_v2 = vpop.f32.mrb[27].mxu0  ;;  %v6774_v3 = vpop.f32.mrb[27].mxu1  ;;  %6781 = vmatpush3.msk.msra.mxu0 %vm3175_vm14, %v3052_v59  ;;  %6782 = vmatprep.mubr.msk.f32.mxu0 %vm8126_vm3, %v8125_v36  ;;  %v7403_v59 = vld [vmem:[#allocation26 + $0x80] sm:$0xff]   ;;  %v7405_v1 = vld [vmem:[#allocation26 + $0x48] sm:$0xff]  }
 0xa89   : > { %6404 = vmatprep.subr.bf16.mxu0 %v7362_v62  ;;  %v7406_v2 = vld [vmem:[#allocation26 + $0x88] sm:$0xff]  }
 0xa8a   : > { %v7407_v3 = vld [vmem:[#allocation26 + $0x8] sm:$0xff]  }
 0xa8b   : > { %6783 = vmatmul.mubr.msk.f32.vlgmr.msra.gmra.mrb[30].mxu0 %vm3171_vm15, %v8827_v4 }
 0xa8c   : > { %6405 = vmatpush3.bf16.msra.mxu0 %v7363_v5  ;;  %3618 = vmatprep.mubr.bf16.mxu0 %v8744_v22  ;;  %v7375_v22 = vld [vmem:[#allocation23 + $0x30] sm:$0xff]  }
 0xa8d   : > { %6406 = vmatprep.subr.bf16.mxu0 %v7364_v7 }
 0xa90   : > { %6407 = vmatpush3.bf16.msra.mxu0 %v7365_v8 }
 0xa91   : > { %6408 = vmatprep.subr.bf16.mxu0 %v7366_v9 }
 0xa94   : > { %6409 = vmatpush3.bf16.msra.mxu0 %v7367_v10 }
 0xa95   : > { %6410 = vmatprep.subr.bf16.mxu0 %v7368_v11 }
 0xa98   : > { %6411 = vmatpush3.bf16.msra.mxu0 %v7369_v12  ;;  %v7408_v12 = vld [vmem:[#allocation26 + $0x50] sm:$0xff]  }
 0xa99   : > { %6412 = vmatprep.subr.bf16.mxu0 %v7370_v14  ;;  %v7409_v14 = vld [vmem:[#allocation26 + $0x90] sm:$0xff]  }
 0xa9c   : > { %6413 = vmatpush3.bf16.msra.mxu0 %v7371_v15  ;;  %v7410_v15 = vld [vmem:[#allocation26 + $0x10] sm:$0xff]  }
 0xa9d   : > { %6414 = vmatprep.subr.bf16.mxu0 %v7372_v16  ;;  %v7411_v16 = vld [vmem:[#allocation26 + $0x58] sm:$0xff]  }
 0xaa0   : > { %6415 = vmatpush3.bf16.msra.mxu0 %v7373_v17  ;;  %v7412_v17 = vld [vmem:[#allocation26 + $0x98] sm:$0xff]  }
 0xaa1   : > { %6416 = vmatprep.subr.bf16.mxu0 %v7374_v18  ;;  %v7413_v18 = vld [vmem:[#allocation26 + $0x18] sm:$0xff]  }
 0xaa4   : > { %6417 = vmatpush3.bf16.msra.mxu0 %v7375_v22  ;;  %v7414_v22 = vld [vmem:[#allocation26 + $0x60] sm:$0xff]  }
 0xaa5   : > { %v8832_v21 = vpop.f32.mrb[28].mxu1  ;;  %6418 = vmatprep.subr.bf16.mxu0 %v7376_v19  ;;  %v7415_v19 = vld [vmem:[#allocation26 + $0xa0] sm:$0xff]  }
 0xaa6   : > { %v6803_v24 = vpop.f32.mrb[29].mxu1 }
 0xaa7   : > { %v3663_v27 = vpop.f32.mrb[30].mxu1  ;;  %v7419_v24 = vld [vmem:[#allocation26 + $0x28] sm:$0xff]  }
 0xaa8   : > { %6419 = vmatpush3.bf16.msra.mxu0 %v7377_v20  ;;  %v6804_v28 = vpop.f32.mrb[31].mxu1  ;;  %v7416_v20 = vld [vmem:[#allocation26 + $0x20] sm:$0xff]   ;;  %v7420_v27 = vld [vmem:[#allocation26 + $0x70] sm:$0xff]  }
 0xaa9   : > { %6435 = vmatprep.subr.bf16.mxu0 %v7378_v23  ;;  %v7418_v23 = vld [vmem:[#allocation26 + $0xa8] sm:$0xff]   ;;  %v7421_v28 = vld [vmem:[#allocation26 + $0xb0] sm:$0xff]  }
 0xaab   : > { %3619 = vmatmul.mubr.bf16.vlgmr.msra.gmra.mrb[32].mxu0 %v8749_v26  ;;  %v7393_v26 = vld [vmem:[#allocation22 + $0x68] sm:$0xff]  }
 0xaac   : > { %6436 = vmatpush3.bf16.msra.mxu0 %v7380_v29  ;;  %v7422_v29 = vld [vmem:[#allocation26 + $0x30] sm:$0xff]  }
 0xaad   : > { %6437 = vmatprep.subr.bf16.mxu0 %v7381_v30  ;;  %v7423_v30 = vld [vmem:[#allocation26 + $0x78] sm:$0xff]  }
 0xab0   : > { %6438 = vmatpush3.bf16.msra.mxu0 %v7383_v31  ;;  %v7424_v31 = vld [vmem:[#allocation26 + $0xb8] sm:$0xff]  }
 0xab1   : > { %6439 = vmatprep.subr.bf16.mxu0 %v7384_v32  ;;  %v7425_v32 = vld [vmem:[#allocation26 + $0x38] sm:$0xff]  }
 0xab4   : > { %6440 = vmatpush3.bf16.msra.mxu0 %v7386_v33 }
 0xab5   : > { %6441 = vmatprep.subr.bf16.mxu0 %v7387_v34 }
 0xab8   : > { %6442 = vmatpush3.bf16.msra.mxu0 %v7389_v37 }
 0xab9   : > { %6443 = vmatprep.subr.bf16.mxu0 %v7390_v38 }
 0xabc   : > { %6444 = vmatpush3.bf16.msra.mxu0 %v7392_v40 }
 0xabd   : > { %6445 = vmatprep.subr.bf16.mxu0 %v7393_v26 }
 0xac0   : > { %6446 = vmatpush3.bf16.msra.mxu0 %v7395_v42 }
 0xac1   : > { %6447 = vmatprep.subr.bf16.mxu0 %v7396_v43  ;;  %v6087_v43 = vld [vmem:[#allocation25] ss:$0 sm:$0xff] }
 0xac4   : > { %6448 = vmatpush3.bf16.msra.mxu0 %v7398_v45 }
 0xac5   : > { %6449 = vmatprep.subr.bf16.mxu0 %v7399_v46 }
 0xac8   : > { %6450 = vmatpush3.bf16.msra.mxu0 %v7401_v48 }
 0xac9   : > { %6466 = vmatprep.subr.bf16.mxu0 %v7402_v49  ;;  %v7426_v49 = vld [vmem:[#allocation29 + $0x40] sm:$0xff]  }
 0xb5a   : > { %v3245_v50 = vpop.f32.mrb[28].mxu0 }
 0xb5b   : > { %v6779_v51 = vpop.f32.mrb[29].mxu0 }
 0xb5e   : > { %v3321_v52 = vpop.f32.mrb[30].mxu0 }
 0xb5f   : > { %v3322_v53 = vadd.f32 %v3321_v52, %v3245_v50  ;;  %v6784_v54 = vpop.f32.mrb[31].mxu0  ;;  %v7427_v52 = vld [vmem:[#allocation29] sm:$0xff]  }
 0xb60   : > { %v7428_v54 = vld [vmem:[#allocation29 + $0x48] sm:$0xff]  }
 0xb61   : > { %v3332_v55 = vadd.f32 %v6038_v13, %v3322_v53 }
 0xb63   : > { %3333 = vst [vmem:[#allocation7 + $0x1] sm:$0xff] %v3332_v55  ;;  %v3337_v56 = vpack.c.bf16 %v3332_v55, %v3332_v55  ;;  %v7429_v55 = vld [vmem:[#allocation29 + $0x8] sm:$0xff]  }
 0xb65   : > { %3842 = vmatprep.mubr.bf16.mxu0 %v3337_v56  ;;  %v7430_v56 = vld [vmem:[#allocation29 + $0x50] sm:$0xff]  }
 0xb6a   : > { %v3338_v61 = vld [vmem:[#allocation7 + $0x2] sm:$0xff] }
 0xb6b   : > { %v3334_v62 = vld [vmem:[#allocation7] sm:$0xff]  ;;  %v3339_v6 = vpack.c.bf16 %v3338_v61, %v3338_v61 }
 0xb6c   : > { %v3335_v0 = vpack.c.bf16 %v3334_v62, %v3334_v62  ;;  %v7432_v61 = vld [vmem:[#allocation29 + $0x58] sm:$0xff]  }
 0xb6d   : > { %6822 = vmatmul.mubr.bf16.vlgmr.msra.gmra.mrb[32].mxu1 %v3339_v6  ;;  %v7433_v62 = vld [vmem:[#allocation29 + $0x18] sm:$0xff]   ;;  %v7435_v6 = vld [vmem:[#allocation29 + $0x20] sm:$0xff]  }
 0xb6e   : > { %3843 = vmatmul.mubr.bf16.vlgmr.msra.gmra.mrb[36].mxu0 %v3335_v0  ;;  %6826 = vmatpush3.bf16.msra.mxu1 %v7403_v59  ;;  %v7431_v59 = vld [vmem:[#allocation29 + $0x10] sm:$0xff]   ;;  %v7436_v0 = vld [vmem:[#allocation29 + $0x68] sm:$0xff]  }
 0xb6f   : > { %6467 = vmatpush3.bf16.msra.mxu0 %v7404_v63  ;;  %6827 = vmatprep.subr.bf16.mxu1 %v8125_v36  ;;  %v7434_v63 = vld [vmem:[#allocation29 + $0x60] sm:$0xff]  }
 0xb70   : > { %6468 = vmatprep.subr.bf16.mxu0 %v7405_v1  ;;  %6841 = vmatprep.mubr.msk.bf16.mxu1 %vm8126_vm3, %v8125_v36  ;;  %v7437_v1 = vld [vmem:[#allocation29 + $0x28] sm:$0xff]  }
 0xb72   : > { %6828 = vmatpush3.bf16.msra.mxu1 %v7406_v2  ;;  %v7438_v2 = vld [vmem:[#allocation29 + $0x70] sm:$0xff]  }
 0xb73   : > { %6469 = vmatpush3.bf16.msra.mxu0 %v7407_v3  ;;  %6829 = vmatprep.subr.bf16.mxu1 %v8125_v36  ;;  %v7439_v3 = vld [vmem:[#allocation29 + $0x30] sm:$0xff]  }
 0xb74   : > { %6470 = vmatprep.subr.bf16.mxu0 %v7408_v12  ;;  %v6088_v12 = vld [vmem:[#allocation28] ss:$0 sm:$0xff] }
 0xb76   : > { %6830 = vmatpush3.bf16.msra.mxu1 %v7409_v14 }
 0xb77   : > { %6471 = vmatpush3.bf16.msra.mxu0 %v7410_v15  ;;  %6831 = vmatprep.subr.bf16.mxu1 %v8125_v36 }
 0xb78   : > { %6472 = vmatprep.subr.bf16.mxu0 %v7411_v16 }
 0xb7a   : > { %6832 = vmatpush3.bf16.msra.mxu1 %v7412_v17 }
 0xb7b   : > { %6473 = vmatpush3.bf16.msra.mxu0 %v7413_v18  ;;  %6833 = vmatprep.subr.bf16.mxu1 %v8125_v36 }
 0xb7c   : > { %6474 = vmatprep.subr.bf16.mxu0 %v7414_v22 }
 0xb7e   : > { %v6420_v5 = vpop.f32.mrb[32].mxu0  ;;  %6834 = vmatpush3.bf16.msra.mxu1 %v7415_v19 }
 0xb7f   : > { %v6421_v7 = vpop.f32.mrb[33].mxu0  ;;  %6475 = vmatpush3.bf16.msra.mxu0 %v7416_v20  ;;  %6835 = vmatprep.subr.bf16.mxu1 %v8125_v36 }
 0xb80   : > { %v6422_v8 = vadd.f32 %v6421_v7, %v6420_v5  ;;  %v6423_v9 = vpop.f32.mrb[34].mxu0  ;;  %v7440_v5 = vld [vmem:[#allocation29 + $0x78] sm:$0xff]  }
 0xb81   : > { %v6424_v10 = vpop.f32.mrb[35].mxu0  ;;  %v7441_v7 = vld [vmem:[#allocation29 + $0x38] sm:$0xff]  }
 0xb82   : > { %v3661_v11 = vadd.f32 %v6422_v8, %v8832_v21  ;;  %v7417_v21 = vld [vmem:[#allocation26 + $0x68] sm:$0xff]   ;;  %6836 = vmatpush3.bf16.msra.mxu1 %v7418_v23  ;;  %v4639_v23 = vld [vmem:[#allocation3 + $0x9] sm:$0xff] }
 0xb83   : > { %6476 = vmatprep.subr.bf16.mxu0 %v7417_v21  ;;  %6837 = vmatprep.subr.bf16.mxu1 %v8125_v36  ;;  %v7442_v8 = vld [vmem:[#allocation32 + $0x40] sm:$0xff]  }
 0xb84   : > { %6477 = vmatpush3.bf16.msra.mxu0 %v7419_v24 }
 0xb85   : > { %6478 = vmatprep.subr.bf16.mxu0 %v7420_v27  ;;  %v7443_v27 = vld [vmem:[#allocation32] sm:$0xff]  }
 0xb86   : > { %6838 = vmatpush3.bf16.msra.mxu1 %v7421_v28 }
 0xb87   : > { %6839 = vmatprep.subr.bf16.mxu1 %v8125_v36 }
 0xb88   : > { %6479 = vmatpush3.bf16.msra.mxu0 %v7422_v29  ;;  %v4638_v29 = vld [vmem:[#allocation3 + $0x1] sm:$0xff] }
 0xb89   : > { %6480 = vmatprep.subr.bf16.mxu0 %v7423_v30  ;;  %v7444_v30 = vld [vmem:[#allocation32 + $0x48] sm:$0xff]  }
 0xb8a   : > { %6840 = vmatpush3.bf16.msra.mxu1 %v7424_v31  ;;  %v4640_v31 = vpack.c.bf16 %v4639_v23, %v4638_v29  ;;  %v7476_v23 = vld [vmem:[%s9032_s26 + $0x98] sm:$0xff]   ;;  %v7482_v29 = vld [vmem:[%s9032_s26 + $0xa8] sm:$0xff]  }
 0xb8b   : > { %6865 = vmatprep.subr.bf16.mxu1 %v8125_v36 }
 0xb8c   : > { %6481 = vmatpush3.bf16.msra.mxu0 %v7425_v32  ;;  %v7445_v32 = vld [vmem:[#allocation32 + $0x8] sm:$0xff]  }
 0xb8d   : > { %6845 = vmatprep.subr.bf16.mxu0 %v8125_v36 }
 0xc40   : > { %v3884_v33 = vpop.f32.mrb[32].mxu1 }
 0xc41   : > { %v6451_v34 = vpop.f32.mrb[36].mxu0  ;;  %v6823_v35 = vpop.f32.mrb[33].mxu1 }
 0xc42   : > { %v6452_v37 = vpop.f32.mrb[37].mxu0  ;;  %v3887_v39 = vpop.f32.mrb[34].mxu1  ;;  %v7448_v35 = vld [vmem:[#allocation32 + $0x58] sm:$0xff]  }
 0xc43   : > { %v6453_v38 = vadd.f32 %v6452_v37, %v6451_v34  ;;  %v6454_v40 = vpop.f32.mrb[38].mxu0  ;;  %v6824_v26 = vpop.f32.mrb[35].mxu1  ;;  %v7447_v34 = vld [vmem:[#allocation32 + $0x10] sm:$0xff]   ;;  %v7449_v37 = vld [vmem:[#allocation32 + $0x18] sm:$0xff]   ;;  %v7451_v39 = vld [vmem:[#allocation32 + $0x20] sm:$0xff]  }
 0xc44   : > { %v6455_v41 = vpop.f32.mrb[39].mxu0  ;;  %v7452_v40 = vld [vmem:[#allocation32 + $0x68] sm:$0xff]  }
 0xc45   : > { %v3845_v42 = vadd.f32 %v6453_v38, %v3661_v11  ;;  %v7450_v38 = vld [vmem:[#allocation32 + $0x60] sm:$0xff]   ;;  %v7453_v26 = vld [vmem:[#allocation32 + $0x28] sm:$0xff]   ;;  %v7454_v41 = vld [vmem:[#allocation32 + $0x70] sm:$0xff]  }
 0xc47   : > { %v3885_v44 = vadd.f32 %v3884_v33, %v3845_v42  ;;  %v7446_v33 = vld [vmem:[#allocation32 + $0x50] sm:$0xff]   ;;  %v7456_v42 = vld [vmem:[#allocation32 + $0x78] sm:$0xff]  }
 0xc49   : > { %v3897_v45 = vadd.f32 %v6087_v43, %v3885_v44  ;;  %v7457_v43 = vld [vmem:[#allocation32 + $0x38] sm:$0xff]  }
 0xc4a   : > { %v4636_v44 = vld [vmem:[#allocation3 + $0x8] sm:$0xff] }
 0xc4b   : > { %vm3898_vm1 = vcmp.ge.f32.partialorder %v3897_v45, 0.0  ;;  %v3899_v46 = vmul.f32 0.01, %v3897_v45 }
 0xc4d   : > { %v3900_v47 = vsel %vm3898_vm1, %v3897_v45, %v3899_v46  ;;  %v4635_v45 = vld [vmem:[#allocation3] sm:$0xff] }
 0xc4e   : > { %3901 = vst [vmem:[#allocation5 + $0x1] sm:$0xff] %v3900_v47  ;;  %v3905_v48 = vpack.c.bf16 %v3900_v47, %v3900_v47  ;;  %v4637_v46 = vpack.c.bf16 %v4636_v44, %v4635_v45  ;;  %v7466_v47 = vld [vmem:[%s9032_s26 + $0x40] sm:$0xff]   ;;  %v7491_v44 = vld [vmem:[#allocation34 + $0x80] sm:$0xff]  }
 0xc4f   : > { %v7492_v45 = vld [vmem:[#allocation34] sm:$0xff]  }
 0xc50   : > { %4139 = vmatprep.mubr.bf16.mxu0 %v3905_v48  ;;  %v7468_v48 = vld [vmem:[%s9032_s26] sm:$0xff]  }
 0xc55   : > { %v3906_v50 = vld [vmem:[#allocation5 + $0x2] sm:$0xff] }
 0xc56   : > { %v3902_v51 = vld [vmem:[#allocation5] sm:$0xff]  ;;  %v3907_v13 = vpack.c.bf16 %v3906_v50, %v3906_v50 }
 0xc57   : > { %v3903_v53 = vpack.c.bf16 %v3902_v51, %v3902_v51  ;;  %v7471_v50 = vld [vmem:[%s9032_s26 + $0x8] sm:$0xff]   ;;  %v7472_v51 = vld [vmem:[%s9032_s26 + $0x50] sm:$0xff]  }
 0xc58   : > { %6842 = vmatmul.mubr.bf16.vlgmr.msra.gmra.mrb[36].mxu1 %v3907_v13  ;;  %v7475_v13 = vld [vmem:[%s9032_s26 + $0x58] sm:$0xff]  }
 0xc59   : > { %4140 = vmatmul.mubr.bf16.vlgmr.msra.gmra.mrb[40].mxu0 %v3903_v53  ;;  %6866 = vmatpush3.bf16.msra.mxu1 %v7426_v49  ;;  %v7469_v49 = vld [vmem:[%s9032_s26 + $0x48] sm:$0xff]   ;;  %v7477_v53 = vld [vmem:[%s9032_s26 + $0x18] sm:$0xff]  }
 0xc5a   : > { %6846 = vmatpush3.bf16.msra.mxu0 %v7427_v52  ;;  %6867 = vmatprep.subr.bf16.mxu1 %v8125_v36  ;;  %v7474_v52 = vld [vmem:[%s9032_s26 + $0x10] sm:$0xff]  }
 0xc5b   : > { %6847 = vmatprep.subr.bf16.mxu0 %v8125_v36  ;;  %6861 = vmatprep.mubr.msk.bf16.mxu0 %vm8126_vm3, %v8125_v36 }
 0xc5c   : > { %6881 = vmatprep.mubr.msk.bf16.mxu1 %vm8126_vm3, %v8125_v36 }
 0xc5d   : > { %6868 = vmatpush3.bf16.msra.mxu1 %v7428_v54  ;;  %v7478_v54 = vld [vmem:[%s9032_s26 + $0x60] sm:$0xff]  }
 0xc5e   : > { %6848 = vmatpush3.bf16.msra.mxu0 %v7429_v55  ;;  %6869 = vmatprep.subr.bf16.mxu1 %v8125_v36  ;;  %v4400_v55 = vadd.s32 8, %v8717_v60 }
 0xc5f   : > { %6849 = vmatprep.subr.bf16.mxu0 %v8125_v36 }
 0xc60   : > { %vm4404_vm4 = vcmp.eq.s32.totalorder %v4400_v55, %v8810_v25  ;;  %vm4401_vm5 = vcmp.eq.s32.totalorder %v4400_v55, %v8807_v57  ;;  %v7458_v25 = vld [vmem:[#allocation32 + $0x80] sm:$0xff]  }
 0xc61   : > { %6870 = vmatpush3.bf16.msra.mxu1 %v7430_v56  ;;  %v6129_v60 = vsel %vm4401_vm5, 1.0, %v8125_v36  ;;  %v7462_v57 = vld [vmem:[#allocation32 + $0xa0] sm:$0xff]  }
 0xc62   : > { %6850 = vmatpush3.bf16.msra.mxu0 %v7431_v59  ;;  %6871 = vmatprep.subr.bf16.mxu1 %v8125_v36 }
 0xc63   : > { %6851 = vmatprep.subr.bf16.mxu0 %v8125_v36 }
 0xc65   : > { %6872 = vmatpush3.bf16.msra.mxu1 %v7432_v61  ;;  %v6130_v61 = vsel %vm4404_vm4, 1.0, %v8125_v36 }
 0xc66   : > { %6852 = vmatpush3.bf16.msra.mxu0 %v7433_v62  ;;  %6873 = vmatprep.subr.bf16.mxu1 %v8125_v36 }
 0xc67   : > { %6853 = vmatprep.subr.bf16.mxu0 %v8125_v36 }
 0xc69   : > { %6874 = vmatpush3.bf16.msra.mxu1 %v7434_v63 }
 0xc6a   : > { %6854 = vmatpush3.bf16.msra.mxu0 %v7435_v6  ;;  %6875 = vmatprep.subr.bf16.mxu1 %v8125_v36 }
 0xc6b   : > { %6855 = vmatprep.subr.bf16.mxu0 %v8125_v36 }
 0xc6d   : > { %6876 = vmatpush3.bf16.msra.mxu1 %v7436_v0 }
 0xc6e   : > { %6856 = vmatpush3.bf16.msra.mxu0 %v7437_v1  ;;  %6877 = vmatprep.subr.bf16.mxu1 %v8125_v36 }
 0xc6f   : > { %6857 = vmatprep.subr.bf16.mxu0 %v8125_v36 }
 0xc71   : > { %6878 = vmatpush3.bf16.msra.mxu1 %v7438_v2 }
 0xc72   : > { %6858 = vmatpush3.bf16.msra.mxu0 %v7439_v3  ;;  %6879 = vmatprep.subr.bf16.mxu1 %v8125_v36  ;;  %v7459_v3 = vld [vmem:[#allocation32 + $0x88] sm:$0xff]  }
 0xc73   : > { %6859 = vmatprep.subr.bf16.mxu0 %v8125_v36 }
 0xc75   : > { %6880 = vmatpush3.bf16.msra.mxu1 %v7440_v5  ;;  %v7460_v5 = vld [vmem:[#allocation32 + $0x90] sm:$0xff]  }
 0xc76   : > { %6860 = vmatpush3.bf16.msra.mxu0 %v7441_v7  ;;  %6521 = vmatprep.subr.bf16.mxu1 %v7442_v8  ;;  %v7463_v7 = vld [vmem:[#allocation32 + $0xa8] sm:$0xff]  }
 0xd2b   : > { %v4181_v9 = vpop.f32.mrb[36].mxu1 }
 0xd2c   : > { %v6482_v10 = vpop.f32.mrb[40].mxu0  ;;  %v6843_v11 = vpop.f32.mrb[37].mxu1 }
 0xd2d   : > { %v6483_v14 = vpop.f32.mrb[41].mxu0  ;;  %v4184_v16 = vpop.f32.mrb[38].mxu1 }
 0xd2e   : > { %v6484_v15 = vadd.f32 %v6483_v14, %v6482_v10  ;;  %v6485_v17 = vpop.f32.mrb[42].mxu0  ;;  %v6844_v18 = vpop.f32.mrb[39].mxu1  ;;  %v7465_v16 = vld [vmem:[#allocation32 + $0xb8] sm:$0xff]  }
 0xd2f   : > { %v6486_v22 = vpop.f32.mrb[43].mxu0  ;;  %v4641_v17 = vld [vmem:[#allocation3 + $0x2] sm:$0xff]  ;;  %v4642_v18 = vld [vmem:[#allocation3 + $0xa] sm:$0xff] }
 0xd30   : > { %v4142_v19 = vadd.f32 %v6484_v15, %v6088_v12  ;;  %v7467_v22 = vld [vmem:[%s9032_s26 + $0x80] sm:$0xff]  }
 0xd32   : > { %v4182_v20 = vadd.f32 %v4181_v9, %v4142_v19  ;;  %v7464_v9 = vld [vmem:[#allocation32 + $0xb0] sm:$0xff]   ;;  %v4643_v19 = vpack.c.bf16 %v4642_v18, %v4641_v17 }
 0xd34   : > { %vm4187_vm2 = vcmp.ge.f32.partialorder %v4182_v20, 0.0  ;;  %v4188_v21 = vmul.f32 0.01, %v4182_v20 }
 0xd36   : > { %v4189_v24 = vsel %vm4187_vm2, %v4182_v20, %v4188_v21  ;;  %v7470_v20 = vld [vmem:[%s9032_s26 + $0x88] sm:$0xff]   ;;  %v7473_v21 = vld [vmem:[%s9032_s26 + $0x90] sm:$0xff]  }
 0xd37   : > { %v4190_v28 = vpack.c.bf16 %v4189_v24, %v4189_v24  ;;  %v7479_v24 = vld [vmem:[%s9032_s26 + $0xa0] sm:$0xff]  }
 0xd39   : > { %6862 = vmatmul.mubr.bf16.vlgmr.msra.gmra.mrb[44].mxu0 %v4190_v28  ;;  %6882 = vmatmul.mubr.bf16.vlgmr.msra.gmra.mrb[40].mxu1 %v4190_v28  ;;  %v7481_v28 = vld [vmem:[%s9032_s26 + $0x68] sm:$0xff]  }
 0xd3a   : > { %6522 = vmatpush3.bf16.msra.mxu1 %v7443_v27  ;;  %4868 = vmatprep.mubr.bf16.mxu1 %v4640_v31  ;;  %v7480_v27 = vld [vmem:[%s9032_s26 + $0x20] sm:$0xff]   ;;  %v7484_v31 = vld [vmem:[%s9032_s26 + $0x70] sm:$0xff]  }
 0xd3b   : > { %6523 = vmatprep.subr.bf16.mxu1 %v7444_v30  ;;  %6887 = vmatprep.mubr.msk.f32.mxu0 %vm2588_vm10, %v8815_v58  ;;  %v7455_v58 = vld [vmem:[#allocation32 + $0x30] sm:$0xff]   ;;  %v7483_v30 = vld [vmem:[%s9032_s26 + $0x28] sm:$0xff]  }
 0xd3e   : > { %6524 = vmatpush3.bf16.msra.mxu1 %v7445_v32  ;;  %v7485_v32 = vld [vmem:[%s9032_s26 + $0xb0] sm:$0xff]  }
 0xd3f   : > { %6525 = vmatprep.subr.bf16.mxu1 %v7446_v33  ;;  %v7486_v33 = vld [vmem:[%s9032_s26 + $0x30] sm:$0xff]  }
 0xd42   : > { %6526 = vmatpush3.bf16.msra.mxu1 %v7447_v34  ;;  %v7487_v34 = vld [vmem:[%s9032_s26 + $0x78] sm:$0xff]  }
 0xd43   : > { %6527 = vmatprep.subr.bf16.mxu1 %v7448_v35  ;;  %v7488_v35 = vld [vmem:[%s9032_s26 + $0xb8] sm:$0xff]  }
 0xd46   : > { %6528 = vmatpush3.bf16.msra.mxu1 %v7449_v37  ;;  %v7489_v37 = vld [vmem:[%s9032_s26 + $0x38] sm:$0xff]  }
 0xd47   : > { %6529 = vmatprep.subr.bf16.mxu1 %v7450_v38  ;;  %v7490_v38 = vld [vmem:[#allocation34 + $0x40] sm:$0xff]  }
 0xd4a   : > { %6530 = vmatpush3.bf16.msra.mxu1 %v7451_v39  ;;  %v6135_v39 = vld [vmem:[#allocation31] ss:$0 sm:$0xff] }
 0xd4b   : > { %6531 = vmatprep.subr.bf16.mxu1 %v7452_v40 }
 0xd4e   : > { %6532 = vmatpush3.bf16.msra.mxu1 %v7453_v26 }
 0xd4f   : > { %6533 = vmatprep.subr.bf16.mxu1 %v7454_v41 }
 0xd52   : > { %6534 = vmatpush3.bf16.msra.mxu1 %v7455_v58 }
 0xd53   : > { %6535 = vmatprep.subr.bf16.mxu1 %v7456_v42 }
 0xd56   : > { %6536 = vmatpush3.bf16.msra.mxu1 %v7457_v43 }
 0xd57   : > { %6552 = vmatprep.subr.bf16.mxu1 %v7466_v47 }
 0xd59   : > { %4869 = vmatmul.mubr.bf16.vlgmr.msra.gmra.mrb[44].mxu1 %v4637_v46 }
 0xd5a   : > { %6553 = vmatpush3.bf16.msra.mxu1 %v7468_v48 }
 0xd5b   : > { %6554 = vmatprep.subr.bf16.mxu1 %v7469_v49 }
 0xd5e   : > { %6555 = vmatpush3.bf16.msra.mxu1 %v7471_v50 }
 0xd5f   : > { %6556 = vmatprep.subr.bf16.mxu1 %v7472_v51  ;;  %v7493_v51 = vld [vmem:[#allocation34 + $0x48] sm:$0xff]  }
 0xd62   : > { %6557 = vmatpush3.bf16.msra.mxu1 %v7474_v52  ;;  %v7494_v52 = vld [vmem:[#allocation34 + $0x88] sm:$0xff]  }
 0xd63   : > { %6558 = vmatprep.subr.bf16.mxu1 %v7475_v13 }
 0xd66   : > { %6559 = vmatpush3.bf16.msra.mxu1 %v7477_v53 }
 0xd67   : > { %6560 = vmatprep.subr.bf16.mxu1 %v7478_v54 }
 0xd6a   : > { %6561 = vmatpush3.bf16.msra.mxu1 %v7480_v27  ;;  %v6184_v27 = vld [vmem:[%s9033_s4] ss:$0 sm:$0xff] }
 0xd6b   : > { %6562 = vmatprep.subr.bf16.mxu1 %v7481_v28 }
 0xd6e   : > { %6563 = vmatpush3.bf16.msra.mxu1 %v7483_v30 }
 0xd6f   : > { %6564 = vmatprep.subr.bf16.mxu1 %v7484_v31 }
 0xd72   : > { %6565 = vmatpush3.bf16.msra.mxu1 %v7486_v33 }
 0xd73   : > { %6566 = vmatprep.subr.bf16.mxu1 %v7487_v34 }
 0xd76   : > { %6567 = vmatpush3.bf16.msra.mxu1 %v7489_v37 }
 0xd77   : > { %6583 = vmatprep.subr.bf16.mxu1 %v7490_v38 }
 0xe0c   : > { %v4289_v56 = vpop.f32.mrb[44].mxu0  ;;  %v4394_v59 = vpop.f32.mrb[40].mxu1 }
 0xe0d   : > { %v6863_v62 = vpop.f32.mrb[45].mxu0  ;;  %v6883_v63 = vpop.f32.mrb[41].mxu1  ;;  %6885 = vmatprep.subr.mxu0 %v4394_v59 }
 0xe0e   : > { %v4292_v6 = vpop.f32.mrb[46].mxu0  ;;  %v4397_v0 = vpop.f32.mrb[42].mxu1  ;;  %6886 = vmatpush3.msra.mxu0 %v4394_v59  ;;  %v7496_v62 = vld [vmem:[#allocation34 + $0x50] sm:$0xff]  }
 0xe0f   : > { %v6864_v1 = vpop.f32.mrb[47].mxu0  ;;  %v6884_v2 = vpop.f32.mrb[43].mxu1  ;;  %6888 = vmatmul.mubr.msk.f32.vlgmr.msra.gmra.mrb[48].mxu0 %vm2588_vm10, %v6130_v61  ;;  %6890 = vmatprep.subr.mxu0 %v4289_v56  ;;  %v7495_v61 = vld [vmem:[#allocation34 + $0x8] sm:$0xff]   ;;  %v7497_v63 = vld [vmem:[#allocation34 + $0x90] sm:$0xff]   ;;  %v7499_v0 = vld [vmem:[#allocation34 + $0x58] sm:$0xff]  }
 0xe10   : > { %6891 = vmatpush3.msra.mxu0 %v4289_v56  ;;  %6892 = vmatprep.mubr.msk.f32.mxu0 %vm2588_vm10, %v8827_v4  ;;  %v7461_v4 = vld [vmem:[#allocation32 + $0x98] sm:$0xff]   ;;  %v7498_v6 = vld [vmem:[#allocation34 + $0x10] sm:$0xff]  }
 0xe11   : > { %6895 = vmatprep.subr.bf16.mxu0 %v8125_v36  ;;  %v7500_v1 = vld [vmem:[#allocation34 + $0x98] sm:$0xff]  }
 0xe12   : > { %v7501_v2 = vld [vmem:[#allocation34 + $0x18] sm:$0xff]  }
 0xe17   : > { %6893 = vmatmul.mubr.msk.f32.vlgmr.msra.gmra.mrb[48].mxu0 %vm2588_vm10, %v6129_v60  ;;  %v7502_v60 = vld [vmem:[#allocation34 + $0x60] sm:$0xff]  }
 0xe18   : > { %6896 = vmatpush3.bf16.msra.mxu0 %v7458_v25  ;;  %6911 = vmatprep.mubr.msk.bf16.mxu0 %vm8126_vm3, %v8125_v36  ;;  %v7503_v25 = vld [vmem:[#allocation34 + $0xa0] sm:$0xff]  }
 0xe19   : > { %6897 = vmatprep.subr.bf16.mxu0 %v8125_v36 }
 0xe1c   : > { %6898 = vmatpush3.bf16.msra.mxu0 %v7459_v3  ;;  %v7504_v3 = vld [vmem:[#allocation34 + $0x20] sm:$0xff]  }
 0xe1d   : > { %6899 = vmatprep.subr.bf16.mxu0 %v8125_v36 }
 0xe20   : > { %6900 = vmatpush3.bf16.msra.mxu0 %v7460_v5  ;;  %v7505_v5 = vld [vmem:[#allocation34 + $0x68] sm:$0xff]  }
 0xe21   : > { %6901 = vmatprep.subr.bf16.mxu0 %v8125_v36 }
 0xe24   : > { %6902 = vmatpush3.bf16.msra.mxu0 %v7461_v4  ;;  %v7506_v4 = vld [vmem:[#allocation34 + $0xa8] sm:$0xff]  }
 0xe25   : > { %6903 = vmatprep.subr.bf16.mxu0 %v8125_v36 }
 0xe28   : > { %6904 = vmatpush3.bf16.msra.mxu0 %v7462_v57  ;;  %v7507_v57 = vld [vmem:[#allocation34 + $0x28] sm:$0xff]  }
 0xe29   : > { %6905 = vmatprep.subr.bf16.mxu0 %v8125_v36 }
 0xe2c   : > { %v6537_v8 = vpop.f32.mrb[44].mxu1  ;;  %6906 = vmatpush3.bf16.msra.mxu0 %v7463_v7  ;;  %v7508_v7 = vld [vmem:[#allocation34 + $0x70] sm:$0xff]  }
 0xe2d   : > { %v6538_v10 = vpop.f32.mrb[45].mxu1  ;;  %6907 = vmatprep.subr.bf16.mxu0 %v8125_v36 }
 0xe2e   : > { %v8899_v11 = vadd.f32 %v6538_v10, %v6537_v8  ;;  %v6540_v12 = vpop.f32.mrb[46].mxu1  ;;  %v7509_v8 = vld [vmem:[#allocation34 + $0xb0] sm:$0xff]   ;;  %v7511_v10 = vld [vmem:[#allocation34 + $0x78] sm:$0xff]  }
 0xe2f   : > { %v6541_v14 = vpop.f32.mrb[47].mxu1 }
 0xe30   : > { %v8901_v15 = vadd.f32 %v6541_v14, %v6540_v12  ;;  %6908 = vmatpush3.bf16.msra.mxu0 %v7464_v9  ;;  %v7510_v9 = vld [vmem:[#allocation34 + $0x30] sm:$0xff]   ;;  %v7513_v12 = vld [vmem:[#allocation34 + $0x38] sm:$0xff]  }
 0xe31   : > { %6909 = vmatprep.subr.bf16.mxu0 %v8125_v36 }
 0xe34   : > { %6910 = vmatpush3.bf16.msra.mxu0 %v7465_v16 }
 0xe35   : > { %6915 = vmatprep.subr.bf16.mxu0 %v8125_v36 }
 0xe37   : > { %6912 = vmatmul.mubr.bf16.vlgmr.msra.gmra.mrb[52].mxu0 %v4643_v19 }
 0xe38   : > { %6916 = vmatpush3.bf16.msra.mxu0 %v7467_v22  ;;  %6931 = vmatprep.mubr.msk.bf16.mxu0 %vm8126_vm3, %v8125_v36 }
 0xe39   : > { %6917 = vmatprep.subr.bf16.mxu0 %v8125_v36 }
 0xe3c   : > { %6918 = vmatpush3.bf16.msra.mxu0 %v7470_v20 }
 0xe3d   : > { %6919 = vmatprep.subr.bf16.mxu0 %v8125_v36 }
 0xe40   : > { %6920 = vmatpush3.bf16.msra.mxu0 %v7473_v21 }
 0xe41   : > { %6921 = vmatprep.subr.bf16.mxu0 %v8125_v36 }
 0xe44   : > { %6922 = vmatpush3.bf16.msra.mxu0 %v7476_v23 }
 0xe45   : > { %6923 = vmatprep.subr.bf16.mxu0 %v8125_v36 }
 0xe48   : > { %6924 = vmatpush3.bf16.msra.mxu0 %v7479_v24 }
 0xe49   : > { %6925 = vmatprep.subr.bf16.mxu0 %v8125_v36 }
 0xe4c   : > { %6926 = vmatpush3.bf16.msra.mxu0 %v7482_v29 }
 0xe4d   : > { %6927 = vmatprep.subr.bf16.mxu0 %v8125_v36 }
 0xe50   : > { %6928 = vmatpush3.bf16.msra.mxu0 %v7485_v32 }
 0xe51   : > { %6929 = vmatprep.subr.bf16.mxu0 %v8125_v36 }
 0xe54   : > { %6930 = vmatpush3.bf16.msra.mxu0 %v7488_v35 }
 0xe55   : > { %6935 = vmatprep.subr.bf16.mxu0 %v8125_v36 }
 0xeea   : > { %v6894_v40 = vpop.f32.mrb[48].mxu0 }
 0xeeb   : > { %v4575_v26 = vadd.f32 %v6894_v40, %v6135_v39  ;;  %v4558_v41 = vpop.f32.mrb[49].mxu0  ;;  %v7514_v40 = vld [vmem:[#allocation35] sm:$0xff]  }
 0xeec   : > { %v4574_v58 = vadd.f32 %v6135_v39, %v4558_v41 }
 0xeed   : > { %4577 = vst [vmem:[#allocation4 + $0x9] sm:$0xff] %v4575_v26 }
 0xeee   : > { %4576 = vst [vmem:[#allocation4 + $0x1] sm:$0xff] %v4574_v58  ;;  %v4583_v42 = vpack.c.bf16 %v4575_v26, %v4574_v58 }
 0xef0   : > { %5094 = vmatprep.mubr.bf16.mxu1 %v4583_v42 }
 0xef4   : > { %v4585_v43 = vld [vmem:[#allocation4 + $0xa] sm:$0xff] }
 0xef5   : > { %v4584_v46 = vld [vmem:[#allocation4 + $0x2] sm:$0xff] }
 0xef6   : > { %v4578_v47 = vld [vmem:[#allocation4] sm:$0xff]  ;;  %v4579_v48 = vld [vmem:[#allocation4 + $0x8] sm:$0xff]  ;;  %v4586_v49 = vpack.c.bf16 %v4585_v43, %v4584_v46  ;;  %v7517_v46 = vld [vmem:[#allocation35 + $0x18] sm:$0xff]  }
 0xef7   : > { %v4580_v50 = vpack.c.bf16 %v4579_v48, %v4578_v47  ;;  %v7518_v47 = vld [vmem:[#allocation35 + $0x20] sm:$0xff]   ;;  %v7519_v48 = vld [vmem:[#allocation35 + $0x28] sm:$0xff]  }
 0xef8   : > { %6932 = vmatmul.mubr.bf16.vlgmr.msra.gmra.mrb[56].mxu0 %v4586_v49  ;;  %v7520_v49 = vld [vmem:[#allocation35 + $0x30] sm:$0xff]  }
 0xef9   : > { %5095 = vmatmul.mubr.bf16.vlgmr.msra.gmra.mrb[48].mxu1 %v4580_v50  ;;  %6936 = vmatpush3.bf16.msra.mxu0 %v7491_v44  ;;  %v7515_v44 = vld [vmem:[#allocation35 + $0x8] sm:$0xff]   ;;  %v7521_v50 = vld [vmem:[#allocation35 + $0x38] sm:$0xff]  }
 0xefa   : > { %6584 = vmatpush3.bf16.msra.mxu1 %v7492_v45  ;;  %6937 = vmatprep.subr.bf16.mxu0 %v8125_v36  ;;  %v7516_v45 = vld [vmem:[#allocation35 + $0x10] sm:$0xff]  }
 0xefb   : > { %6585 = vmatprep.subr.bf16.mxu1 %v7493_v51  ;;  %6951 = vmatprep.mubr.msk.bf16.mxu0 %vm8126_vm3, %v8125_v36 }
 0xefd   : > { %6938 = vmatpush3.bf16.msra.mxu0 %v7494_v52 }
 0xefe   : > { %6939 = vmatprep.subr.bf16.mxu0 %v8125_v36  ;;  %6586 = vmatpush3.bf16.msra.mxu1 %v7495_v61 }
 0xeff   : > { %6587 = vmatprep.subr.bf16.mxu1 %v7496_v62 }
 0xf01   : > { %6940 = vmatpush3.bf16.msra.mxu0 %v7497_v63 }
 0xf02   : > { %6588 = vmatpush3.bf16.msra.mxu1 %v7498_v6  ;;  %6941 = vmatprep.subr.bf16.mxu0 %v8125_v36 }
 0xf03   : > { %6589 = vmatprep.subr.bf16.mxu1 %v7499_v0 }
 0xf05   : > { %6942 = vmatpush3.bf16.msra.mxu0 %v7500_v1 }
 0xf06   : > { %6590 = vmatpush3.bf16.msra.mxu1 %v7501_v2  ;;  %6943 = vmatprep.subr.bf16.mxu0 %v8125_v36 }
 0xf07   : > { %6591 = vmatprep.subr.bf16.mxu1 %v7502_v60 }
 0xf09   : > { %6944 = vmatpush3.bf16.msra.mxu0 %v7503_v25 }
 0xf0a   : > { %v4911_v13 = vpop.f32.mrb[52].mxu0  ;;  %6592 = vmatpush3.bf16.msra.mxu1 %v7504_v3  ;;  %6945 = vmatprep.subr.bf16.mxu0 %v8125_v36 }
 0xf0b   : > { %v4912_v53 = vadd.f32 %v8899_v11, %v4911_v13  ;;  %v6913_v54 = vpop.f32.mrb[53].mxu0  ;;  %6593 = vmatprep.subr.bf16.mxu1 %v7505_v5  ;;  %v7512_v11 = vld [vmem:[#allocation34 + $0xb8] sm:$0xff]  }
 0xf0c   : > { %v4914_v55 = vpop.f32.mrb[54].mxu0 }
 0xf0d   : > { %v4915_v56 = vadd.f32 %v8901_v15, %v4914_v55  ;;  %v6914_v59 = vpop.f32.mrb[55].mxu0  ;;  %6946 = vmatpush3.bf16.msra.mxu0 %v7506_v4  ;;  %v6210_v4 = vld [vmem:[%s8276_s5] ss:$0 sm:$0xff] }
 0xf0e   : > { %6594 = vmatpush3.bf16.msra.mxu1 %v7507_v57  ;;  %6947 = vmatprep.subr.bf16.mxu0 %v8125_v36 }
 0xf0f   : > { %6595 = vmatprep.subr.bf16.mxu1 %v7508_v7 }
 0xf11   : > { %6948 = vmatpush3.bf16.msra.mxu0 %v7509_v8 }
 0xf12   : > { %6596 = vmatpush3.bf16.msra.mxu1 %v7510_v9  ;;  %6949 = vmatprep.subr.bf16.mxu0 %v8125_v36 }
 0xf13   : > { %6597 = vmatprep.subr.bf16.mxu1 %v7511_v10 }
 0xf15   : > { %6950 = vmatpush3.bf16.msra.mxu0 %v7512_v11 }
 0xf16   : > { %6598 = vmatpush3.bf16.msra.mxu1 %v7513_v12 }
 0xf17   : > { %6955 = vmatprep.subr.bf16.mxu1 %v8125_v36 }
 0xfcb   : > { %v5137_v14 = vpop.f32.mrb[56].mxu0 }
 0xfcc   : > { %v6568_v15 = vpop.f32.mrb[48].mxu1  ;;  %v6933_v16 = vpop.f32.mrb[57].mxu0 }
 0xfcd   : > { %v6569_v17 = vpop.f32.mrb[49].mxu1  ;;  %v5140_v22 = vpop.f32.mrb[58].mxu0 }
 0xfce   : > { %v6570_v18 = vadd.f32 %v6569_v17, %v6568_v15  ;;  %v6571_v19 = vpop.f32.mrb[50].mxu1  ;;  %v6934_v20 = vpop.f32.mrb[59].mxu0 }
 0xfcf   : > { %v6572_v21 = vpop.f32.mrb[51].mxu1 }
 0xfd0   : > { %v5097_v23 = vadd.f32 %v6570_v18, %v4912_v53  ;;  %v6573_v24 = vadd.f32 %v6572_v21, %v6571_v19  ;;  %v6185_v53 = vld [vmem:[%s8266_s13] ss:$0 sm:$0xff] }
 0xfd2   : > { %v5138_v28 = vadd.f32 %v5137_v14, %v5097_v23  ;;  %v5100_v29 = vadd.f32 %v6573_v24, %v4915_v56 }
 0xfd4   : > { %v5151_v30 = vadd.f32 %v6184_v27, %v5138_v28  ;;  %v5141_v31 = vadd.f32 %v5140_v22, %v5100_v29 }
 0xfd6   : > { %vm5153_vm6 = vcmp.ge.f32.partialorder %v5151_v30, 0.0  ;;  %v5155_v32 = vmul.f32 0.01, %v5151_v30  ;;  %v5152_v33 = vadd.f32 %v6184_v27, %v5141_v31 }
 0xfd8   : > { %v5157_v34 = vsel %vm5153_vm6, %v5151_v30, %v5155_v32  ;;  %vm5154_vm7 = vcmp.ge.f32.partialorder %v5152_v33, 0.0  ;;  %v5156_v35 = vmul.f32 0.01, %v5152_v33 }
 0xfd9   : > { %5159 = vst [vmem:[#allocation2 + $0x1] sm:$0xff] %v5157_v34 }
 0xfda   : > { %v5158_v37 = vsel %vm5154_vm7, %v5152_v33, %v5156_v35 }
 0xfdb   : > { %5160 = vst [vmem:[#allocation2 + $0x9] sm:$0xff] %v5158_v37  ;;  %v5166_v38 = vpack.c.bf16 %v5158_v37, %v5157_v34 }
 0xfdd   : > { %5401 = vmatprep.mubr.bf16.mxu1 %v5166_v38 }
 0xfe0   : > { %v5161_v39 = vld [vmem:[#allocation2] sm:$0xff] }
 0xfe2   : > { %v5167_v26 = vld [vmem:[#allocation2 + $0x2] sm:$0xff]  ;;  %v5168_v41 = vld [vmem:[#allocation2 + $0xa] sm:$0xff] }
 0xfe3   : > { %v5162_v58 = vld [vmem:[#allocation2 + $0x8] sm:$0xff]  ;;  %v5169_v42 = vpack.c.bf16 %v5168_v41, %v5167_v26 }
 0xfe4   : > { %v5163_v43 = vpack.c.bf16 %v5162_v58, %v5161_v39 }
 0xfe5   : > { %6952 = vmatmul.mubr.bf16.vlgmr.msra.gmra.mrb[60].mxu0 %v5169_v42 }
 0xfe6   : > { %5402 = vmatmul.mubr.bf16.vlgmr.msra.gmra.mrb[52].mxu1 %v5163_v43 }
 0xfe7   : > { %6956 = vmatpush3.bf16.msra.mxu1 %v7514_v40  ;;  %6971 = vmatprep.mubr.msk.bf16.mxu1 %vm8126_vm3, %v8125_v36 }
 0xfe8   : > { %6957 = vmatprep.subr.bf16.mxu1 %v8125_v36 }
 0xfeb   : > { %6958 = vmatpush3.bf16.msra.mxu1 %v7515_v44 }
 0xfec   : > { %6959 = vmatprep.subr.bf16.mxu1 %v8125_v36 }
 0xfef   : > { %6960 = vmatpush3.bf16.msra.mxu1 %v7516_v45 }
 0xff0   : > { %6961 = vmatprep.subr.bf16.mxu1 %v8125_v36 }
 0xff3   : > { %6962 = vmatpush3.bf16.msra.mxu1 %v7517_v46 }
 0xff4   : > { %6963 = vmatprep.subr.bf16.mxu1 %v8125_v36 }
 0xff7   : > { %6964 = vmatpush3.bf16.msra.mxu1 %v7518_v47 }
 0xff8   : > { %6965 = vmatprep.subr.bf16.mxu1 %v8125_v36 }
 0xffb   : > { %6966 = vmatpush3.bf16.msra.mxu1 %v7519_v48 }
 0xffc   : > { %6967 = vmatprep.subr.bf16.mxu1 %v8125_v36 }
 0xfff   : > { %6968 = vmatpush3.bf16.msra.mxu1 %v7520_v49 }
0x1000   : > { %6969 = vmatprep.subr.bf16.mxu1 %v8125_v36 }
0x1003   : > { %6970 = vmatpush3.bf16.msra.mxu1 %v7521_v50 }
0x10b8   : > { %v5444_v51 = vpop.f32.mrb[60].mxu0 }
0x10b9   : > { %v6599_v52 = vpop.f32.mrb[52].mxu1  ;;  %v6953_v13 = vpop.f32.mrb[61].mxu0 }
0x10ba   : > { %v6600_v54 = vpop.f32.mrb[53].mxu1  ;;  %v5447_v56 = vpop.f32.mrb[62].mxu0 }
0x10bb   : > { %v6601_v55 = vadd.f32 %v6600_v54, %v6599_v52  ;;  %v6602_v59 = vpop.f32.mrb[54].mxu1  ;;  %v6954_v61 = vpop.f32.mrb[63].mxu0 }
0x10bc   : > { %v6603_v62 = vpop.f32.mrb[55].mxu1 }
0x10bd   : > { %v5404_v63 = vadd.f32 %v6601_v55, %v6185_v53  ;;  %v6604_v6 = vadd.f32 %v6603_v62, %v6602_v59 }
0x10bf   : > { %v5445_v0 = vadd.f32 %v5444_v51, %v5404_v63  ;;  %v5407_v1 = vadd.f32 %v6604_v6, %v6185_v53 }
0x10c1   : > { %v5453_v2 = vmul.f32 0.01, %v5445_v0  ;;  %v5448_v36 = vadd.f32 %v5447_v56, %v5407_v1  ;;  %vm5451_vm3 = vcmp.ge.f32.partialorder %v5445_v0, 0.0 }
0x10c3   : > { %vm5452_vm8 = vcmp.ge.f32.partialorder %v5448_v36, 0.0  ;;  %v5454_v60 = vmul.f32 0.01, %v5448_v36  ;;  %v5455_v25 = vsel %vm5451_vm3, %v5445_v0, %v5453_v2 }
0x10c5   : > { %v5456_v3 = vsel %vm5452_vm8, %v5448_v36, %v5454_v60 }
0x10c6   : > { %v5457_v5 = vpack.c.bf16 %v5456_v3, %v5455_v25 }
0x10c8   : > { %6972 = vmatmul.mubr.bf16.vlgmr.msra.gmra.mrb[56].mxu1 %v5457_v5 }
0x119b   : > { %v5563_v57 = vpop.f32.mrb[56].mxu1 }
0x119c   : > { %v5564_v7 = vadd.f32 %v6210_v4, %v5563_v57  ;;  %v6973_v8 = vpop.f32.mrb[57].mxu1 }
0x119d   : > { %v5566_v9 = vpop.f32.mrb[58].mxu1 }
0x119e   : > { %5570 = vst [vmem:[%s1152_s22] sm:$0xff] %v5564_v7  ;;  %v5567_v10 = vadd.f32 %v6210_v4, %v5566_v9  ;;  %v6974_v11 = vpop.f32.mrb[59].mxu1 }
0x11a0   : > { %5571 = vst [vmem:[%s1152_s22 + $0x8] sm:$0xff] %v5567_v10 }
0x11a1 PF: > { %s9034_s11 = sld [smem:[#allocation62_spill]] }
0x11a7   : > { %s79_s7 = sadd.s32 1, %s9034_s11  }
0x11a8   : > { %p76_p11 = scmp.ge.s32.totalorder %s79_s7, 4  }
0x11aa   :  { %78 = sbr.rel (!%p76_p11) target bundleno = 56 (0x38), region = 270 }
0x11b1   :  { %5593 = vsyncpa [#allocation10], 1 }
0x11b2   :  { %5595 = vsyncpa [#allocation10 + $0x1], 1 }
0x11b3   :  { %5596 = vsyncpa [#allocation12], 1 }
0x11b4   :  { %5597 = vsyncpa [#allocation15], 1 }
0x11b5   :  { %5598 = vsyncpa [#allocation18], 1 }
0x11b6   :  { %5599 = vsyncpa [#allocation21], 1 }
0x11b7   :  { %5600 = vsyncpa [#allocation24], 1 }
0x11b8   :  { %5601 = vsyncpa [#allocation27], 1 }
0x11b9   :  { %5602 = vsyncpa [#allocation30], 1 }
0x11ba   :  { %5603 = vsyncpa [#allocation33], 1 }
0x11bb   :  { %5604 = vsyncpa [#allocation36], 1 }

</bundles_post_ra>
